<compile_context>
chip_gen: v6e
topology: v6e:2x2x1
jax: 0.10.0
libtpu: 0.0.40
codegen_flags: <defaults>
</compile_context>

<pallas_src>
import functools
import math

import numpy as np
import jax
import jax.numpy as jnp
from jax import lax
from jax.experimental import pallas as pl
from jax.experimental.pallas import tpu as pltpu

# ----------------------------- model config ---------------------------------
B = 2            # batch
L_TEXT = 8       # text sequence length
L_IMG = 4        # number of image regions
FEAT_DIM = 64    # stand-in for 2048 (image feature dim)
HIDDEN = 32      # stand-in for 768 (bert hidden)
NUM_HEADS = 4
HEAD_DIM = HIDDEN // NUM_HEADS
INTERMEDIATE = 64  # stand-in for 3072
RNN_H = 16       # LSTM hidden_size
OUT_SIZE = 8     # linear_1 out_size
VOCAB = 100
LN_EPS = 1e-12

# Explicit scoped-VMEM budget: above the v5e 16 MiB default, below v7x 64 MiB physical.
VMEM_LIMIT_BYTES = 48 * 1024 * 1024


def _cparams(semantics):
    return pltpu.CompilerParams(dimension_semantics=semantics,
                                vmem_limit_bytes=VMEM_LIMIT_BYTES)


def _row_tiling(M, block_rows=256):
    """Pick (tm, n_tiles). Never falls back to tm=M for large M: prefers a
    multiple-of-8 divisor of M near block_rows, else a cdiv grid (remainder
    block is masked by Pallas)."""
    if M <= block_rows:
        return M, 1
    for tm in range(block_rows, 7, -8):
        if M % tm == 0:
            return tm, M // tm
    return block_rows, pl.cdiv(M, block_rows)


def _ln(x, w, b, eps):
    """BertLayerNorm (TF style, eps inside the sqrt), f32 math."""
    u = jnp.mean(x, axis=-1, keepdims=True)
    s = jnp.mean((x - u) ** 2, axis=-1, keepdims=True)
    return w * ((x - u) * lax.rsqrt(s + eps)) + b


# ----------------------------- Pallas kernels --------------------------------
def _linear_kernel(x_ref, w_ref, b_ref, o_ref, *, activation):
    x = x_ref[...].astype(jnp.bfloat16)          # weights already bf16
    y = jnp.dot(x, w_ref[...], preferred_element_type=jnp.float32) + b_ref[...]
    if activation == "gelu":
        # TODO(synk): HF BERT/RoBERTa uses erf-gelu; tanh approximation kept for
        # TPU-safe lowering (small numeric divergence from the torch reference).
        y = jax.nn.gelu(y, approximate=True)
    o_ref[...] = y.astype(o_ref.dtype)


def linear(x, w, b, activation=None, out_dtype=jnp.bfloat16, block_rows=256):
    """y = x @ w + b.  x: [..., K], w: [K, N] (bf16), b: [N] f32. bf16 MXU, f32 acc."""
    orig = x.shape
    K = orig[-1]
    M = int(np.prod(orig[:-1]))
    N = w.shape[1]
    tm, nrows = _row_tiling(M, block_rows)
    # TODO(synk): at real roberta scale, add an N-tile grid axis (tn multiple of
    # 256 on v6e/v7x) instead of keeping the full-N weight block resident.
    out = pl.pallas_call(
        functools.partial(_linear_kernel, activation=activation),
        grid=(nrows,),
        in_specs=[
            pl.BlockSpec((tm, K), lambda i: (i, 0)),
            pl.BlockSpec((K, N), lambda i: (0, 0)),
            pl.BlockSpec((1, N), lambda i: (0, 0)),
        ],
        out_specs=pl.BlockSpec((tm, N), lambda i: (i, 0)),
        out_shape=jax.ShapeDtypeStruct((M, N), out_dtype),
        compiler_params=_cparams(("parallel",)),
    )(x.reshape(M, K), w, b.reshape(1, N))
    return out.reshape(orig[:-1] + (N,))


# ---- fused embedding-LayerNorm + QKV projection ------------------------------
def _prenorm_qkv_kernel(x_ref, w_ref, b_ref, lnw_ref, lnb_ref, qkv_ref, xn_ref, *, eps):
    xn = _ln(x_ref[...].astype(jnp.float32), lnw_ref[...], lnb_ref[...], eps)
    xn_ref[...] = xn.astype(xn_ref.dtype)                       # residual for attention
    y = jnp.dot(xn.astype(jnp.bfloat16), w_ref[...],
                preferred_element_type=jnp.float32) + b_ref[...]
    qkv_ref[...] = y.astype(qkv_ref.dtype)


def prenorm_qkv(x, ln_w, ln_b, w, b, block_rows=256):
    """LayerNorm(x) fused with the QKV projection; returns (qkv bf16, x_normed bf16)."""
    Bsz, L, H = x.shape
    M = Bsz * L
    N = w.shape[1]
    tm, nrows = _row_tiling(M, block_rows)
    qkv, xn = pl.pallas_call(
        functools.partial(_prenorm_qkv_kernel, eps=LN_EPS),
        grid=(nrows,),
        in_specs=[
            pl.BlockSpec((tm, H), lambda i: (i, 0)),
            pl.BlockSpec((H, N), lambda i: (0, 0)),
            pl.BlockSpec((1, N), lambda i: (0, 0)),
            pl.BlockSpec((1, H), lambda i: (0, 0)),
            pl.BlockSpec((1, H), lambda i: (0, 0)),
        ],
        out_specs=(pl.BlockSpec((tm, N), lambda i: (i, 0)),
                   pl.BlockSpec((tm, H), lambda i: (i, 0))),
        out_shape=(jax.ShapeDtypeStruct((M, N), jnp.bfloat16),
                   jax.ShapeDtypeStruct((M, H), jnp.bfloat16)),
        compiler_params=_cparams(("parallel",)),
    )(x.reshape(M, H), w, b.reshape(1, N), ln_w.reshape(1, H), ln_b.reshape(1, H))
    return qkv.reshape(Bsz, L, N), xn.reshape(Bsz, L, H)


# ---- fused attention block: MHA + out-proj + residual + LayerNorm -----------
def _mha_core(q, k, v, mask, wo, bo, *, num_heads, scale):
    """q:[Lq,H] k,v:[Lk,H] mask:[1,Lk] wo:[H,H] bf16 -> attn_out:[Lq,H] f32."""
    Lq, H = q.shape
    Dh = H // num_heads
    ctxs = []
    for h in range(num_heads):
        sl = slice(h * Dh, (h + 1) * Dh)
        qh = q[:, sl].astype(jnp.bfloat16)
        kh = k[:, sl].astype(jnp.bfloat16)
        vh = v[:, sl].astype(jnp.bfloat16)
        s = jnp.dot(qh, kh.T, preferred_element_type=jnp.float32) * scale + mask
        s = s - jnp.max(s, axis=-1, keepdims=True)
        p = jnp.exp(s)
        p = p * pl.reciprocal(jnp.sum(p, axis=-1, keepdims=True), approx=True)
        ctxs.append(jnp.dot(p.astype(jnp.bfloat16), vh,
                            preferred_element_type=jnp.float32))        # [Lq, Dh]
    # Lane-dense [Lq, H] context, then ONE full-K output projection on the MXU.
    ctx = jnp.concatenate(ctxs, axis=-1).astype(jnp.bfloat16)
    return jnp.dot(ctx, wo, preferred_element_type=jnp.float32) + bo


def _add_ln_store(attn, res, lnw, lnb, o_ref, eps):
    y = attn + res.astype(jnp.float32)
    o_ref[0] = _ln(y, lnw, lnb, eps).astype(o_ref.dtype)


def _self_attn_block_kernel(qkv_ref, m_ref, wo_ref, bo_ref, res_ref,
                            lnw_ref, lnb_ref, o_ref,
                            *, num_heads, hidden, scale, eps):
    qkv = qkv_ref[0]                              # [L, 3H] bf16
    q = qkv[:, 0 * hidden:1 * hidden]
    k = qkv[:, 1 * hidden:2 * hidden]
    v = qkv[:, 2 * hidden:3 * hidden]
    attn = _mha_core(q, k, v, m_ref[0], wo_ref[...], bo_ref[...],
                     num_heads=num_heads, scale=scale)
    _add_ln_store(attn, res_ref[0], lnw_ref[...], lnb_ref[...], o_ref, eps)


def _cross_attn_block_kernel(q_ref, kv_ref, m_ref, wo_ref, bo_ref, res_ref,
                             lnw_ref, lnb_ref, o_ref,
                             *, num_heads, hidden, scale, eps):
    q = q_ref[0]                                  # [tq, H] bf16
    kv = kv_ref[0]                                # [Lk, 2H] bf16
    k = kv[:, 0 * hidden:1 * hidden]
    v = kv[:, 1 * hidden:2 * hidden]
    attn = _mha_core(q, k, v, m_ref[0], wo_ref[...], bo_ref[...],
                     num_heads=num_heads, scale=scale)
    _add_ln_store(attn, res_ref[0], lnw_ref[...], lnb_ref[...], o_ref, eps)


def attn_block_self(qkv, ext_mask, wo, bo, residual, ln_w, ln_b, num_heads):
    """qkv: [B, L, 3H] bf16, ext_mask: [B, 1, L] f32, residual: [B, L, H]."""
    Bsz, L, H3 = qkv.shape
    H = H3 // 3
    scale = 1.0 / math.sqrt(H // num_heads)
    # TODO(synk): at real roberta scale (L=512) add a parallel Lq-tile grid axis
    # (pass separate q / kv views of the fused qkv tensor) for v7x megacore
    # occupancy, VMEM headroom and vreg pressure (flash-style Lq tiles of 128-256).
    return pl.pallas_call(
        functools.partial(_self_attn_block_kernel, num_heads=num_heads,
                          hidden=H, scale=scale, eps=LN_EPS),
        grid=(Bsz,),
        in_specs=[
            pl.BlockSpec((1, L, H3), lambda b: (b, 0, 0)),
            pl.BlockSpec((1, 1, L), lambda b: (b, 0, 0)),
            pl.BlockSpec((H, H), lambda b: (0, 0)),
            pl.BlockSpec((1, H), lambda b: (0, 0)),
            pl.BlockSpec((1, L, H), lambda b: (b, 0, 0)),
            pl.BlockSpec((1, H), lambda b: (0, 0)),
            pl.BlockSpec((1, H), lambda b: (0, 0)),
        ],
        out_specs=pl.BlockSpec((1, L, H), lambda b: (b, 0, 0)),
        out_shape=jax.ShapeDtypeStruct((Bsz, L, H), jnp.bfloat16),
        compiler_params=_cparams(("parallel",)),
    )(qkv, ext_mask, wo, bo.reshape(1, H), residual,
      ln_w.reshape(1, H), ln_b.reshape(1, H))


def attn_block_cross(q, kv, ext_mask, wo, bo, residual, ln_w, ln_b, num_heads,
                     q_block=256):
    """q: [B, Lq, H] bf16, kv: [B, Lk, 2H] bf16, ext_mask: [B, 1, Lk] f32."""
    Bsz, Lq, H = q.shape
    Lk = kv.shape[1]
    scale = 1.0 / math.sqrt(H // num_heads)
    tq, nq = _row_tiling(Lq, q_block)   # Lq tile axis: megacore occupancy on v7x
    return pl.pallas_call(
        functools.partial(_cross_attn_block_kernel, num_heads=num_heads,
                          hidden=H, scale=scale, eps=LN_EPS),
        grid=(Bsz, nq),
        in_specs=[
            pl.BlockSpec((1, tq, H), lambda b, qi: (b, qi, 0)),
            pl.BlockSpec((1, Lk, 2 * H), lambda b, qi: (b, 0, 0)),
            pl.BlockSpec((1, 1, Lk), lambda b, qi: (b, 0, 0)),
            pl.BlockSpec((H, H), lambda b, qi: (0, 0)),
            pl.BlockSpec((1, H), lambda b, qi: (0, 0)),
            pl.BlockSpec((1, tq, H), lambda b, qi: (b, qi, 0)),
            pl.BlockSpec((1, H), lambda b, qi: (0, 0)),
            pl.BlockSpec((1, H), lambda b, qi: (0, 0)),
        ],
        out_specs=pl.BlockSpec((1, tq, H), lambda b, qi: (b, qi, 0)),
        out_shape=jax.ShapeDtypeStruct((Bsz, Lq, H), jnp.bfloat16),
        compiler_params=_cparams(("parallel", "parallel")),
    )(q, kv, ext_mask, wo, bo.reshape(1, H), residual,
      ln_w.reshape(1, H), ln_b.reshape(1, H))


# ---- fused FFN block: wi-matmul + gelu + wo2-matmul + residual + LN ----------
def _ffn_block_kernel(x_ref, wi_ref, bi_ref, wo2_ref, bo2_ref,
                      lnw_ref, lnb_ref, o_ref, *, eps):
    x = x_ref[...]                                           # [tm, H] bf16
    inter = jnp.dot(x.astype(jnp.bfloat16), wi_ref[...],
                    preferred_element_type=jnp.float32) + bi_ref[...]
    inter = jax.nn.gelu(inter, approximate=True)             # TODO(synk): erf-gelu in HF
    out = jnp.dot(inter.astype(jnp.bfloat16), wo2_ref[...],
                  preferred_element_type=jnp.float32) + bo2_ref[...]
    y = out + x.astype(jnp.float32)                          # residual
    o_ref[...] = _ln(y, lnw_ref[...], lnb_ref[...], eps).astype(o_ref.dtype)


def ffn_block(x, wi, bi, wo2, bo2, ln_w, ln_b, block_rows=256):
    Bsz, L, H = x.shape
    M = Bsz * L
    I = wi.shape[1]
    tm, nrows = _row_tiling(M, block_rows)
    # TODO(synk): at real scale (H=768, I=3072) additionally tile I with a
    # [tm, H] f32 accumulator scratch + pl.when init/finalize to bound VMEM on v7x.
    out = pl.pallas_call(
        functools.partial(_ffn_block_kernel, eps=LN_EPS),
        grid=(nrows,),
        in_specs=[
            pl.BlockSpec((tm, H), lambda i: (i, 0)),
            pl.BlockSpec((H, I), lambda i: (0, 0)),
            pl.BlockSpec((1, I), lambda i: (0, 0)),
            pl.BlockSpec((I, H), lambda i: (0, 0)),
            pl.BlockSpec((1, H), lambda i: (0, 0)),
            pl.BlockSpec((1, H), lambda i: (0, 0)),
            pl.BlockSpec((1, H), lambda i: (0, 0)),
        ],
        out_specs=pl.BlockSpec((tm, H), lambda i: (i, 0)),
        out_shape=jax.ShapeDtypeStruct((M, H), jnp.bfloat16),
        compiler_params=_cparams(("parallel",)),
    )(x.reshape(M, H), wi, bi.reshape(1, I), wo2, bo2.reshape(1, H),
      ln_w.reshape(1, H), ln_b.reshape(1, H))
    return out.reshape(Bsz, L, H)


# ---- fused LSTM recurrence + linear_1 head -----------------------------------
def _lstm_head_kernel(xg_ref, whh_ref, w1_ref, b1_ref, h_ref, y_ref,
                      *, seq_len, hidden):
    Bsz = h_ref.shape[0]

    def body(t, carry):
        h, c = carry
        # One fused recurrent matmul per step: [B,H] @ [H,4H] -> lane-dense gates.
        gates = xg_ref[t] + jnp.dot(h.astype(jnp.bfloat16), whh_ref[...],
                                    preferred_element_type=jnp.float32)   # [B, 4H]
        i_g = jax.nn.sigmoid(gates[:, 0 * hidden:1 * hidden])
        f_g = jax.nn.sigmoid(gates[:, 1 * hidden:2 * hidden])
        g_g = jnp.tanh(gates[:, 2 * hidden:3 * hidden])
        o_g = jax.nn.sigmoid(gates[:, 3 * hidden:4 * hidden])
        c = f_g * c + i_g * g_g
        h = o_g * jnp.tanh(c)
        return (h, c)

    h0 = jnp.zeros((Bsz, hidden), jnp.float32)
    c0 = jnp.zeros((Bsz, hidden), jnp.float32)
    h, _ = lax.fori_loop(0, seq_len, body, (h0, c0), unroll=True)
    h_ref[...] = h
    y_ref[...] = (jnp.dot(h.astype(jnp.bfloat16), w1_ref[...],
                          preferred_element_type=jnp.float32)
                  + b1_ref[...]).astype(y_ref.dtype)


def lstm_head(x, w_ih_t, w_hh_t, b, w1, b1):
    """Single-layer unidirectional LSTM (PyTorch gate order i,f,g,o) fused with
    linear_1.  x: [B, L, in]; w_ih_t: [in, 4H] bf16; w_hh_t: [H, 4H] bf16;
    b = b_ih + b_hh f32 [4H]."""
    Bsz, L, _ = x.shape
    H4 = w_ih_t.shape[1]
    H = H4 // 4
    OUT = w1.shape[1]
    # Input projection for all timesteps at once; [L, B, 4H] lane-dense gates.
    xg = linear(x, w_ih_t, b, out_dtype=jnp.float32)           # [B, L, 4H]
    xg = xg.transpose(1, 0, 2)                                 # [L, B, 4H]
    h, y = pl.pallas_call(
        functools.partial(_lstm_head_kernel, seq_len=L, hidden=H),
        grid=(1,),
        in_specs=[
            pl.BlockSpec((L, Bsz, H4), lambda i: (0, 0, 0)),
            pl.BlockSpec((H, H4), lambda i: (0, 0)),
            pl.BlockSpec((H, OUT), lambda i: (0, 0)),
            pl.BlockSpec((1, OUT), lambda i: (0, 0)),
        ],
        out_specs=(pl.BlockSpec((Bsz, H), lambda i: (0, 0)),
                   pl.BlockSpec((Bsz, OUT), lambda i: (0, 0))),
        out_shape=(jax.ShapeDtypeStruct((Bsz, H), jnp.float32),
                   jax.ShapeDtypeStruct((Bsz, OUT), jnp.float32)),
        compiler_params=_cparams(("arbitrary",)),
    )(xg, w_hh_t, w1, b1.reshape(1, OUT))
    return h, y


# --------------------------- transformer layers ------------------------------
def bert_self_layer(p, hidden, ext_mask, num_heads, prenorm=None):
    if prenorm is not None:
        # Embedding LayerNorm fused into the QKV projection prologue; the kernel
        # also emits the normalized hidden used as the attention residual.
        ln_w, ln_b = prenorm
        qkv, residual = prenorm_qkv(hidden, ln_w, ln_b, p["w_qkv"], p["b_qkv"])
    else:
        qkv = linear(hidden, p["w_qkv"], p["b_qkv"])             # [B, L, 3H] bf16
        residual = hidden
    h1 = attn_block_self(qkv, ext_mask, p["wo"], p["bo"], residual,
                         p["ln1_w"], p["ln1_b"], num_heads)      # [B, L, H] bf16
    return ffn_block(h1, p["wi"], p["bi"], p["wo2"], p["bo2"],
                     p["ln2_w"], p["ln2_b"])


def bert_cross_layer(p, s1, s2, ext_mask_s2, num_heads):
    q = linear(s1, p["wq"], p["bq"])                             # [B, Lq, H] bf16
    kv = linear(s2, p["w_kv"], p["b_kv"])                        # [B, Lk, 2H] bf16
    h1 = attn_block_cross(q, kv, ext_mask_s2, p["wo"], p["bo"], s1,
                          p["ln1_w"], p["ln1_b"], num_heads)     # [B, Lq, H] bf16
    return ffn_block(h1, p["wi"], p["bi"], p["wo2"], p["bo2"],
                     p["ln2_w"], p["ln2_b"])


def roberta_standin(p, input_ids, input_mask, num_heads):
    # TODO(synk): pretrained roberta-base (12 layers, hidden 768) replaced by a
    # deterministic 1-layer stand-in at reduced width; same op structure.
    _, L = input_ids.shape
    emb = p["word_emb"][input_ids] + p["pos_emb"][jnp.arange(L)][None]  # gather: JAX glue
    ext_mask = (1.0 - input_mask.astype(jnp.float32))[:, None, :] * -10000.0  # [B,1,L]
    return bert_self_layer(p["layer"], emb, ext_mask, num_heads,
                           prenorm=(p["emb_ln_w"], p["emb_ln_b"]))


# ------------------------------ parameters -----------------------------------
def init_params(key):
    keys = iter(jax.random.split(key, 64))

    def nrm_f32(shape):
        # matches init_weight(): normal(mean=0, std=0.02), zero biases
        return 0.02 * jax.random.normal(next(keys), shape, dtype=jnp.float32)

    def nrm(shape):
        # weight matrices pre-cast to bf16 once (no per-step in-kernel casts)
        return nrm_f32(shape).astype(jnp.bfloat16)

    def bert_layer_params():
        H, I = HIDDEN, INTERMEDIATE
        wq, wk, wv = nrm_f32((H, H)), nrm_f32((H, H)), nrm_f32((H, H))
        return dict(
            # fused projections (QKV for self-attn, KV for cross-attn), bf16
            w_qkv=jnp.concatenate([wq, wk, wv], axis=1).astype(jnp.bfloat16),
            b_qkv=jnp.zeros((3 * H,), jnp.float32),
            wq=wq.astype(jnp.bfloat16), bq=jnp.zeros((H,), jnp.float32),
            w_kv=jnp.concatenate([wk, wv], axis=1).astype(jnp.bfloat16),
            b_kv=jnp.zeros((2 * H,), jnp.float32),
            wo=nrm((H, H)), bo=jnp.zeros((H,), jnp.float32),
            ln1_w=jnp.ones((H,), jnp.float32), ln1_b=jnp.zeros((H,), jnp.float32),
            wi=nrm((H, I)), bi=jnp.zeros((I,), jnp.float32),
            wo2=nrm((I, H)), bo2=jnp.zeros((H,), jnp.float32),
            ln2_w=jnp.ones((H,), jnp.float32), ln2_b=jnp.zeros((H,), jnp.float32),
        )

    params = dict(
        roberta=dict(
            word_emb=nrm_f32((VOCAB, HIDDEN)),
            pos_emb=nrm_f32((L_TEXT, HIDDEN)),
            emb_ln_w=jnp.ones((HIDDEN,), jnp.float32),
            emb_ln_b=jnp.zeros((HIDDEN,), jnp.float32),
            layer=bert_layer_params(),
        ),
        feat_w=nrm((FEAT_DIM, HIDDEN)), feat_b=jnp.zeros((HIDDEN,), jnp.float32),
        img_self=bert_layer_params(),
        cross=bert_layer_params(),
        # LSTM weights stored pre-transposed ([in,4H] / [H,4H]) and bf16;
        # gate order along the lane axis is PyTorch's (i, f, g, o).
        lstm_w_ih_t=nrm((HIDDEN, 4 * RNN_H)),
        lstm_w_hh_t=nrm((RNN_H, 4 * RNN_H)),
        lstm_b=jnp.zeros((4 * RNN_H,), jnp.float32),   # b_ih + b_hh
        lin1_w=nrm((RNN_H, OUT_SIZE)), lin1_b=jnp.zeros((OUT_SIZE,), jnp.float32),
    )
    return params


# ------------------------------- forward -------------------------------------
def visbert_forward(params, img_feat, text2, image_mask):
    # text2: [B, 2, L]; row 0 = token ids, row 1 = attention mask
    # TODO(synk): ids carried as float32 (matches torch .long() cast); lossy for
    # vocab sizes > 2^24, fine at this scale.
    input_ids = text2[:, 0, :].astype(jnp.int32)
    input_mask = text2[:, 1, :].astype(jnp.float32)

    sentence_output = roberta_standin(params["roberta"], input_ids, input_mask,
                                      NUM_HEADS)                        # [B, L_TEXT, H] bf16

    img_feat_ = linear(img_feat, params["feat_w"], params["feat_b"])    # [B, L_IMG, H] bf16

    ext_image_mask = (1.0 - image_mask.astype(jnp.float32))[:, None, :] * -10000.0  # [B,1,L_IMG]

    visual_output = bert_self_layer(params["img_self"], img_feat_,
                                    ext_image_mask, NUM_HEADS)          # [B, L_IMG, H] bf16

    s2_cross_output_layer = bert_cross_layer(params["cross"], sentence_output,
                                             visual_output, ext_image_mask,
                                             NUM_HEADS)                 # [B, L_TEXT, H] bf16

    # nn.LSTM(..., num_layers=1, bidirectional=False); h_n[0].squeeze() -> [B, RNN_H]
    # dropout: inference mode (identity); linear_1 fused into the LSTM kernel.
    h, y_1 = lstm_head(s2_cross_output_layer, params["lstm_w_ih_t"],
                       params["lstm_w_hh_t"], params["lstm_b"],
                       params["lin1_w"], params["lin1_b"])
    return y_1, h


# --------------------------------- main ---------------------------------------
if __name__ == "__main__":
    key = jax.random.PRNGKey(0)
    pkey, k1, k2 = jax.random.split(key, 3)
    params = init_params(pkey)

    img_feat = jax.random.normal(k1, (B, L_IMG, FEAT_DIM), dtype=jnp.float32)
    ids = jax.random.randint(k2, (B, L_TEXT), 0, VOCAB).astype(jnp.float32)
    txt_mask = jnp.ones((B, L_TEXT), jnp.float32)
    text2 = jnp.stack([ids, txt_mask], axis=1)          # [B, 2, L_TEXT]
    image_mask = jnp.ones((B, L_IMG), jnp.float32)

    y_1, h = jax.jit(visbert_forward)(params, img_feat, text2, image_mask)
    jax.block_until_ready((y_1, h))

    assert y_1.shape == (B, OUT_SIZE) and h.shape == (B, RNN_H)
    assert bool(jnp.all(jnp.isfinite(y_1))) and bool(jnp.all(jnp.isfinite(h)))
    print("KERNEL_OK")
</pallas_src>

<mosaic_0001>
module attributes {stable_mosaic.version = 11 : i64} {
  func.func @_linear_kernel(%arg0: i32, %arg1: memref<16x32xbf16, #tpu.memory_space<vmem>>, %arg2: memref<32x32xbf16, #tpu.memory_space<vmem>>, %arg3: memref<1x32xf32, #tpu.memory_space<vmem>>, %arg4: memref<16x32xbf16, #tpu.memory_space<vmem>>) attributes {dimension_semantics = [#tpu.dimension_semantics<parallel>], iteration_bounds = array<i64: 1>, scalar_prefetch = 0 : i64, scratch_operands = 0 : i64, tpu.core_type = #tpu.core_type<tc>, window_params = [{transform_indices = @transform_0, window_bounds = array<i64: 16, 32>}, {pipeline_mode = #tpu.pipeline_mode<synchronous>, transform_indices = @transform_1, window_bounds = array<i64: 32, 32>}, {pipeline_mode = #tpu.pipeline_mode<synchronous>, transform_indices = @transform_2, window_bounds = array<i64: 1, 32>}, {transform_indices = @transform_3, window_bounds = array<i64: 16, 32>}]} {
    %c0 = arith.constant 0 : index
    %c0_0 = arith.constant 0 : index
    %0 = vector.load %arg1[%c0, %c0_0] : memref<16x32xbf16, #tpu.memory_space<vmem>>, vector<16x32xbf16>
    %c0_1 = arith.constant 0 : index
    %c0_2 = arith.constant 0 : index
    %1 = vector.load %arg2[%c0_1, %c0_2] : memref<32x32xbf16, #tpu.memory_space<vmem>>, vector<32x32xbf16>
    %cst = arith.constant dense<0.000000e+00> : vector<16x32xf32>
    %2 = tpu.matmul %0, %1, %cst {dimension_numbers = #tpu.dot_dimension_numbers<[1], [0], [0], [1], [0, 0, 1, 1], [], []>} : vector<16x32xbf16>, vector<32x32xbf16>, vector<16x32xf32> -> vector<16x32xf32>
    %c0_3 = arith.constant 0 : index
    %c0_4 = arith.constant 0 : index
    %3 = vector.load %arg3[%c0_3, %c0_4] : memref<1x32xf32, #tpu.memory_space<vmem>>, vector<1x32xf32>
    %4 = vector.broadcast %3 : vector<1x32xf32> to vector<16x32xf32>
    %5 = arith.addf %2, %4 : vector<16x32xf32>
    %6 = arith.truncf %5 : vector<16x32xf32> to vector<16x32xbf16>
    %c0_5 = arith.constant 0 : index
    %c0_6 = arith.constant 0 : index
    %7 = vector.load %arg4[%c0_5, %c0_6] : memref<16x32xbf16, #tpu.memory_space<vmem>>, vector<16x32xbf16>
    tpu.vector_store %arg4[%c0_5, %c0_6], %6 {strides = array<i32>} : memref<16x32xbf16, #tpu.memory_space<vmem>>, vector<16x32xbf16>,
    return
  }
  func.func @transform_0(%arg0: i32) -> (i32, i32) {
    %c0_i32 = arith.constant 0 : i32
    %c0_i32_0 = arith.constant 0 : i32
    return %arg0, %c0_i32 : i32, i32
  }
  func.func @transform_1(%arg0: i32) -> (i32, i32) {
    %c0_i32 = arith.constant 0 : i32
    %c0_i32_0 = arith.constant 0 : i32
    %c0_i32_1 = arith.constant 0 : i32
    return %c0_i32, %c0_i32_0 : i32, i32
  }
  func.func @transform_2(%arg0: i32) -> (i32, i32) {
    %c0_i32 = arith.constant 0 : i32
    %c0_i32_0 = arith.constant 0 : i32
    %c0_i32_1 = arith.constant 0 : i32
    return %c0_i32, %c0_i32_0 : i32, i32
  }
  func.func @transform_3(%arg0: i32) -> (i32, i32) {
    %c0_i32 = arith.constant 0 : i32
    %c0_i32_0 = arith.constant 0 : i32
    return %arg0, %c0_i32 : i32, i32
  }
}

module attributes {stable_mosaic.version = 11 : i64} {
  func.func @_prenorm_qkv_kernel(%arg0: i32, %arg1: memref<16x32xf32, #tpu.memory_space<vmem>>, %arg2: memref<32x96xbf16, #tpu.memory_space<vmem>>, %arg3: memref<1x96xf32, #tpu.memory_space<vmem>>, %arg4: memref<1x32xf32, #tpu.memory_space<vmem>>, %arg5: memref<1x32xf32, #tpu.memory_space<vmem>>, %arg6: memref<16x96xbf16, #tpu.memory_space<vmem>>, %arg7: memref<16x32xbf16, #tpu.memory_space<vmem>>) attributes {dimension_semantics = [#tpu.dimension_semantics<parallel>], iteration_bounds = array<i64: 1>, scalar_prefetch = 0 : i64, scratch_operands = 0 : i64, tpu.core_type = #tpu.core_type<tc>, window_params = [{transform_indices = @transform_0, window_bounds = array<i64: 16, 32>}, {pipeline_mode = #tpu.pipeline_mode<synchronous>, transform_indices = @transform_1, window_bounds = array<i64: 32, 96>}, {pipeline_mode = #tpu.pipeline_mode<synchronous>, transform_indices = @transform_2, window_bounds = array<i64: 1, 96>}, {pipeline_mode = #tpu.pipeline_mode<synchronous>, transform_indices = @transform_3, window_bounds = array<i64: 1, 32>}, {pipeline_mode = #tpu.pipeline_mode<synchronous>, transform_indices = @transform_4, window_bounds = array<i64: 1, 32>}, {transform_indices = @transform_5, window_bounds = array<i64: 16, 96>}, {transform_indices = @transform_6, window_bounds = array<i64: 16, 32>}]} {
    %c0 = arith.constant 0 : index
    %c0_0 = arith.constant 0 : index
    %0 = vector.load %arg1[%c0, %c0_0] : memref<16x32xf32, #tpu.memory_space<vmem>>, vector<16x32xf32>
    %c0_1 = arith.constant 0 : index
    %c0_2 = arith.constant 0 : index
    %1 = vector.load %arg4[%c0_1, %c0_2] : memref<1x32xf32, #tpu.memory_space<vmem>>, vector<1x32xf32>
    %c0_3 = arith.constant 0 : index
    %c0_4 = arith.constant 0 : index
    %2 = vector.load %arg5[%c0_3, %c0_4] : memref<1x32xf32, #tpu.memory_space<vmem>>, vector<1x32xf32>
    %cst = arith.constant dense<0.000000e+00> : vector<16xf32>
    %3 = vector.multi_reduction <add>, %0, %cst [1] : vector<16x32xf32> to vector<16xf32>
    %4 = vector.shape_cast %3 : vector<16xf32> to vector<16x1xf32>
    %cst_5 = arith.constant 3.200000e+01 : f32
    %5 = vector.broadcast %cst_5 : f32 to vector<16x1xf32>
    %6 = arith.divf %4, %5 : vector<16x1xf32>
    %7 = vector.broadcast %6 : vector<16x1xf32> to vector<16x32xf32>
    %8 = arith.subf %0, %7 : vector<16x32xf32>
    %9 = arith.mulf %8, %8 : vector<16x32xf32>
    %cst_6 = arith.constant dense<0.000000e+00> : vector<16xf32>
    %10 = vector.multi_reduction <add>, %9, %cst_6 [1] : vector<16x32xf32> to vector<16xf32>
    %11 = vector.shape_cast %10 : vector<16xf32> to vector<16x1xf32>
    %cst_7 = arith.constant 3.200000e+01 : f32
    %12 = vector.broadcast %cst_7 : f32 to vector<16x1xf32>
    %13 = arith.divf %11, %12 : vector<16x1xf32>
    %14 = vector.broadcast %6 : vector<16x1xf32> to vector<16x32xf32>
    %15 = arith.subf %0, %14 : vector<16x32xf32>
    %cst_8 = arith.constant 9.99999996E-13 : f32
    %16 = vector.broadcast %cst_8 : f32 to vector<16x1xf32>
    %17 = arith.addf %13, %16 : vector<16x1xf32>
    %18 = math.rsqrt %17 : vector<16x1xf32>
    %19 = vector.broadcast %18 : vector<16x1xf32> to vector<16x32xf32>
    %20 = arith.mulf %15, %19 : vector<16x32xf32>
    %21 = vector.broadcast %1 : vector<1x32xf32> to vector<16x32xf32>
    %22 = arith.mulf %21, %20 : vector<16x32xf32>
    %23 = vector.broadcast %2 : vector<1x32xf32> to vector<16x32xf32>
    %24 = arith.addf %22, %23 : vector<16x32xf32>
    %25 = arith.truncf %24 : vector<16x32xf32> to vector<16x32xbf16>
    %c0_9 = arith.constant 0 : index
    %c0_10 = arith.constant 0 : index
    %26 = vector.load %arg7[%c0_9, %c0_10] : memref<16x32xbf16, #tpu.memory_space<vmem>>, vector<16x32xbf16>
    tpu.vector_store %arg7[%c0_9, %c0_10], %25 {strides = array<i32>} : memref<16x32xbf16, #tpu.memory_space<vmem>>, vector<16x32xbf16>,
    %27 = arith.truncf %24 : vector<16x32xf32> to vector<16x32xbf16>
    %c0_11 = arith.constant 0 : index
    %c0_12 = arith.constant 0 : index
    %28 = vector.load %arg2[%c0_11, %c0_12] : memref<32x96xbf16, #tpu.memory_space<vmem>>, vector<32x96xbf16>
    %cst_13 = arith.constant dense<0.000000e+00> : vector<16x96xf32>
    %29 = tpu.matmul %27, %28, %cst_13 {dimension_numbers = #tpu.dot_dimension_numbers<[1], [0], [0], [1], [0, 0, 1, 1], [], []>} : vector<16x32xbf16>, vector<32x96xbf16>, vector<16x96xf32> -> vector<16x96xf32>
    %c0_14 = arith.constant 0 : index
    %c0_15 = arith.constant 0 : index
    %30 = vector.load %arg3[%c0_14, %c0_15] : memref<1x96xf32, #tpu.memory_space<vmem>>, vector<1x96xf32>
    %31 = vector.broadcast %30 : vector<1x96xf32> to vector<16x96xf32>
    %32 = arith.addf %29, %31 : vector<16x96xf32>
    %33 = arith.truncf %32 : vector<16x96xf32> to vector<16x96xbf16>
    %c0_16 = arith.constant 0 : index
    %c0_17 = arith.constant 0 : index
    %34 = vector.load %arg6[%c0_16, %c0_17] : memref<16x96xbf16, #tpu.memory_space<vmem>>, vector<16x96xbf16>
    tpu.vector_store %arg6[%c0_16, %c0_17], %33 {strides = array<i32>} : memref<16x96xbf16, #tpu.memory_space<vmem>>, vector<16x96xbf16>,
    return
  }
  func.func @transform_0(%arg0: i32) -> (i32, i32) {
    %c0_i32 = arith.constant 0 : i32
    %c0_i32_0 = arith.constant 0 : i32
    return %arg0, %c0_i32 : i32, i32
  }
  func.func @transform_1(%arg0: i32) -> (i32, i32) {
    %c0_i32 = arith.constant 0 : i32
    %c0_i32_0 = arith.constant 0 : i32
    %c0_i32_1 = arith.constant 0 : i32
    return %c0_i32, %c0_i32_0 : i32, i32
  }
  func.func @transform_2(%arg0: i32) -> (i32, i32) {
    %c0_i32 = arith.constant 0 : i32
    %c0_i32_0 = arith.constant 0 : i32
    %c0_i32_1 = arith.constant 0 : i32
    return %c0_i32, %c0_i32_0 : i32, i32
  }
  func.func @transform_3(%arg0: i32) -> (i32, i32) {
    %c0_i32 = arith.constant 0 : i32
    %c0_i32_0 = arith.constant 0 : i32
    %c0_i32_1 = arith.constant 0 : i32
    return %c0_i32, %c0_i32_0 : i32, i32
  }
  func.func @transform_4(%arg0: i32) -> (i32, i32) {
    %c0_i32 = arith.constant 0 : i32
    %c0_i32_0 = arith.constant 0 : i32
    %c0_i32_1 = arith.constant 0 : i32
    return %c0_i32, %c0_i32_0 : i32, i32
  }
  func.func @transform_5(%arg0: i32) -> (i32, i32) {
    %c0_i32 = arith.constant 0 : i32
    %c0_i32_0 = arith.constant 0 : i32
    return %arg0, %c0_i32 : i32, i32
  }
  func.func @transform_6(%arg0: i32) -> (i32, i32) {
    %c0_i32 = arith.constant 0 : i32
    %c0_i32_0 = arith.constant 0 : i32
    return %arg0, %c0_i32 : i32, i32
  }
}

module attributes {stable_mosaic.version = 11 : i64} {
  func.func @_ffn_block_kernel(%arg0: i32, %arg1: memref<16x32xbf16, #tpu.memory_space<vmem>>, %arg2: memref<32x64xbf16, #tpu.memory_space<vmem>>, %arg3: memref<1x64xf32, #tpu.memory_space<vmem>>, %arg4: memref<64x32xbf16, #tpu.memory_space<vmem>>, %arg5: memref<1x32xf32, #tpu.memory_space<vmem>>, %arg6: memref<1x32xf32, #tpu.memory_space<vmem>>, %arg7: memref<1x32xf32, #tpu.memory_space<vmem>>, %arg8: memref<16x32xbf16, #tpu.memory_space<vmem>>) attributes {dimension_semantics = [#tpu.dimension_semantics<parallel>], iteration_bounds = array<i64: 1>, scalar_prefetch = 0 : i64, scratch_operands = 0 : i64, tpu.core_type = #tpu.core_type<tc>, window_params = [{transform_indices = @transform_0, window_bounds = array<i64: 16, 32>}, {pipeline_mode = #tpu.pipeline_mode<synchronous>, transform_indices = @transform_1, window_bounds = array<i64: 32, 64>}, {pipeline_mode = #tpu.pipeline_mode<synchronous>, transform_indices = @transform_2, window_bounds = array<i64: 1, 64>}, {pipeline_mode = #tpu.pipeline_mode<synchronous>, transform_indices = @transform_3, window_bounds = array<i64: 64, 32>}, {pipeline_mode = #tpu.pipeline_mode<synchronous>, transform_indices = @transform_4, window_bounds = array<i64: 1, 32>}, {pipeline_mode = #tpu.pipeline_mode<synchronous>, transform_indices = @transform_5, window_bounds = array<i64: 1, 32>}, {pipeline_mode = #tpu.pipeline_mode<synchronous>, transform_indices = @transform_6, window_bounds = array<i64: 1, 32>}, {transform_indices = @transform_7, window_bounds = array<i64: 16, 32>}]} {
    %c0 = arith.constant 0 : index
    %c0_0 = arith.constant 0 : index
    %0 = vector.load %arg1[%c0, %c0_0] : memref<16x32xbf16, #tpu.memory_space<vmem>>, vector<16x32xbf16>
    %c0_1 = arith.constant 0 : index
    %c0_2 = arith.constant 0 : index
    %1 = vector.load %arg2[%c0_1, %c0_2] : memref<32x64xbf16, #tpu.memory_space<vmem>>, vector<32x64xbf16>
    %cst = arith.constant dense<0.000000e+00> : vector<16x64xf32>
    %2 = tpu.matmul %0, %1, %cst {dimension_numbers = #tpu.dot_dimension_numbers<[1], [0], [0], [1], [0, 0, 1, 1], [], []>} : vector<16x32xbf16>, vector<32x64xbf16>, vector<16x64xf32> -> vector<16x64xf32>
    %c0_3 = arith.constant 0 : index
    %c0_4 = arith.constant 0 : index
    %3 = vector.load %arg3[%c0_3, %c0_4] : memref<1x64xf32, #tpu.memory_space<vmem>>, vector<1x64xf32>
    %4 = vector.broadcast %3 : vector<1x64xf32> to vector<16x64xf32>
    %5 = arith.addf %2, %4 : vector<16x64xf32>
    %6 = arith.mulf %5, %5 : vector<16x64xf32>
    %7 = arith.mulf %5, %6 : vector<16x64xf32>
    %cst_5 = arith.constant 4.471500e-02 : f32
    %8 = vector.broadcast %cst_5 : f32 to vector<16x64xf32>
    %9 = arith.mulf %8, %7 : vector<16x64xf32>
    %10 = arith.addf %5, %9 : vector<16x64xf32>
    %cst_6 = arith.constant 0.797884583 : f32
    %11 = vector.broadcast %cst_6 : f32 to vector<16x64xf32>
    %12 = arith.mulf %11, %10 : vector<16x64xf32>
    %13 = math.tanh %12 : vector<16x64xf32>
    %cst_7 = arith.constant 1.000000e+00 : f32
    %14 = vector.broadcast %cst_7 : f32 to vector<16x64xf32>
    %15 = arith.addf %14, %13 : vector<16x64xf32>
    %cst_8 = arith.constant 5.000000e-01 : f32
    %16 = vector.broadcast %cst_8 : f32 to vector<16x64xf32>
    %17 = arith.mulf %16, %15 : vector<16x64xf32>
    %18 = arith.mulf %5, %17 : vector<16x64xf32>
    %19 = arith.truncf %18 : vector<16x64xf32> to vector<16x64xbf16>
    %c0_9 = arith.constant 0 : index
    %c0_10 = arith.constant 0 : index
    %20 = vector.load %arg4[%c0_9, %c0_10] : memref<64x32xbf16, #tpu.memory_space<vmem>>, vector<64x32xbf16>
    %cst_11 = arith.constant dense<0.000000e+00> : vector<16x32xf32>
    %21 = tpu.matmul %19, %20, %cst_11 {dimension_numbers = #tpu.dot_dimension_numbers<[1], [0], [0], [1], [0, 0, 1, 1], [], []>} : vector<16x64xbf16>, vector<64x32xbf16>, vector<16x32xf32> -> vector<16x32xf32>
    %c0_12 = arith.constant 0 : index
    %c0_13 = arith.constant 0 : index
    %22 = vector.load %arg5[%c0_12, %c0_13] : memref<1x32xf32, #tpu.memory_space<vmem>>, vector<1x32xf32>
    %23 = vector.broadcast %22 : vector<1x32xf32> to vector<16x32xf32>
    %24 = arith.addf %21, %23 : vector<16x32xf32>
    %25 = arith.extf %0 : vector<16x32xbf16> to vector<16x32xf32>
    %26 = arith.addf %24, %25 : vector<16x32xf32>
    %c0_14 = arith.constant 0 : index
    %c0_15 = arith.constant 0 : index
    %27 = vector.load %arg6[%c0_14, %c0_15] : memref<1x32xf32, #tpu.memory_space<vmem>>, vector<1x32xf32>
    %c0_16 = arith.constant 0 : index
    %c0_17 = arith.constant 0 : index
    %28 = vector.load %arg7[%c0_16, %c0_17] : memref<1x32xf32, #tpu.memory_space<vmem>>, vector<1x32xf32>
    %cst_18 = arith.constant dense<0.000000e+00> : vector<16xf32>
    %29 = vector.multi_reduction <add>, %26, %cst_18 [1] : vector<16x32xf32> to vector<16xf32>
    %30 = vector.shape_cast %29 : vector<16xf32> to vector<16x1xf32>
    %cst_19 = arith.constant 3.200000e+01 : f32
    %31 = vector.broadcast %cst_19 : f32 to vector<16x1xf32>
    %32 = arith.divf %30, %31 : vector<16x1xf32>
    %33 = vector.broadcast %32 : vector<16x1xf32> to vector<16x32xf32>
    %34 = arith.subf %26, %33 : vector<16x32xf32>
    %35 = arith.mulf %34, %34 : vector<16x32xf32>
    %cst_20 = arith.constant dense<0.000000e+00> : vector<16xf32>
    %36 = vector.multi_reduction <add>, %35, %cst_20 [1] : vector<16x32xf32> to vector<16xf32>
    %37 = vector.shape_cast %36 : vector<16xf32> to vector<16x1xf32>
    %cst_21 = arith.constant 3.200000e+01 : f32
    %38 = vector.broadcast %cst_21 : f32 to vector<16x1xf32>
    %39 = arith.divf %37, %38 : vector<16x1xf32>
    %40 = vector.broadcast %32 : vector<16x1xf32> to vector<16x32xf32>
    %41 = arith.subf %26, %40 : vector<16x32xf32>
    %cst_22 = arith.constant 9.99999996E-13 : f32
    %42 = vector.broadcast %cst_22 : f32 to vector<16x1xf32>
    %43 = arith.addf %39, %42 : vector<16x1xf32>
    %44 = math.rsqrt %43 : vector<16x1xf32>
    %45 = vector.broadcast %44 : vector<16x1xf32> to vector<16x32xf32>
    %46 = arith.mulf %41, %45 : vector<16x32xf32>
    %47 = vector.broadcast %27 : vector<1x32xf32> to vector<16x32xf32>
    %48 = arith.mulf %47, %46 : vector<16x32xf32>
    %49 = vector.broadcast %28 : vector<1x32xf32> to vector<16x32xf32>
    %50 = arith.addf %48, %49 : vector<16x32xf32>
    %51 = arith.truncf %50 : vector<16x32xf32> to vector<16x32xbf16>
    %c0_23 = arith.constant 0 : index
    %c0_24 = arith.constant 0 : index
    %52 = vector.load %arg8[%c0_23, %c0_24] : memref<16x32xbf16, #tpu.memory_space<vmem>>, vector<16x32xbf16>
    tpu.vector_store %arg8[%c0_23, %c0_24], %51 {strides = array<i32>} : memref<16x32xbf16, #tpu.memory_space<vmem>>, vector<16x32xbf16>,
    return
  }
  func.func @transform_0(%arg0: i32) -> (i32, i32) {
    %c0_i32 = arith.constant 0 : i32
    %c0_i32_0 = arith.constant 0 : i32
    return %arg0, %c0_i32 : i32, i32
  }
  func.func @transform_1(%arg0: i32) -> (i32, i32) {
    %c0_i32 = arith.constant 0 : i32
    %c0_i32_0 = arith.constant 0 : i32
    %c0_i32_1 = arith.constant 0 : i32
    return %c0_i32, %c0_i32_0 : i32, i32
  }
  func.func @transform_2(%arg0: i32) -> (i32, i32) {
    %c0_i32 = arith.constant 0 : i32
    %c0_i32_0 = arith.constant 0 : i32
    %c0_i32_1 = arith.constant 0 : i32
    return %c0_i32, %c0_i32_0 : i32, i32
  }
  func.func @transform_3(%arg0: i32) -> (i32, i32) {
    %c0_i32 = arith.constant 0 : i32
    %c0_i32_0 = arith.constant 0 : i32
    %c0_i32_1 = arith.constant 0 : i32
    return %c0_i32, %c0_i32_0 : i32, i32
  }
  func.func @transform_4(%arg0: i32) -> (i32, i32) {
    %c0_i32 = arith.constant 0 : i32
    %c0_i32_0 = arith.constant 0 : i32
    %c0_i32_1 = arith.constant 0 : i32
    return %c0_i32, %c0_i32_0 : i32, i32
  }
  func.func @transform_5(%arg0: i32) -> (i32, i32) {
    %c0_i32 = arith.constant 0 : i32
    %c0_i32_0 = arith.constant 0 : i32
    %c0_i32_1 = arith.constant 0 : i32
    return %c0_i32, %c0_i32_0 : i32, i32
  }
  func.func @transform_6(%arg0: i32) -> (i32, i32) {
    %c0_i32 = arith.constant 0 : i32
    %c0_i32_0 = arith.constant 0 : i32
    %c0_i32_1 = arith.constant 0 : i32
    return %c0_i32, %c0_i32_0 : i32, i32
  }
  func.func @transform_7(%arg0: i32) -> (i32, i32) {
    %c0_i32 = arith.constant 0 : i32
    %c0_i32_0 = arith.constant 0 : i32
    return %arg0, %c0_i32 : i32, i32
  }
}

module attributes {stable_mosaic.version = 11 : i64} {
  func.func @_self_attn_block_kernel(%arg0: i32, %arg1: memref<1x8x96xbf16, #tpu.memory_space<vmem>>, %arg2: memref<1x1x8xf32, #tpu.memory_space<vmem>>, %arg3: memref<32x32xbf16, #tpu.memory_space<vmem>>, %arg4: memref<1x32xf32, #tpu.memory_space<vmem>>, %arg5: memref<1x8x32xbf16, #tpu.memory_space<vmem>>, %arg6: memref<1x32xf32, #tpu.memory_space<vmem>>, %arg7: memref<1x32xf32, #tpu.memory_space<vmem>>, %arg8: memref<1x8x32xbf16, #tpu.memory_space<vmem>>) attributes {dimension_semantics = [#tpu.dimension_semantics<parallel>], iteration_bounds = array<i64: 2>, scalar_prefetch = 0 : i64, scratch_operands = 0 : i64, tpu.core_type = #tpu.core_type<tc>, window_params = [{transform_indices = @transform_0, window_bounds = array<i64: 1, 8, 96>}, {transform_indices = @transform_1, window_bounds = array<i64: 1, 1, 8>}, {pipeline_mode = #tpu.pipeline_mode<synchronous>, transform_indices = @transform_2, window_bounds = array<i64: 32, 32>}, {pipeline_mode = #tpu.pipeline_mode<synchronous>, transform_indices = @transform_3, window_bounds = array<i64: 1, 32>}, {transform_indices = @transform_4, window_bounds = array<i64: 1, 8, 32>}, {pipeline_mode = #tpu.pipeline_mode<synchronous>, transform_indices = @transform_5, window_bounds = array<i64: 1, 32>}, {pipeline_mode = #tpu.pipeline_mode<synchronous>, transform_indices = @transform_6, window_bounds = array<i64: 1, 32>}, {transform_indices = @transform_7, window_bounds = array<i64: 1, 8, 32>}]} {
    %c0 = arith.constant 0 : index
    %c0_0 = arith.constant 0 : index
    %c0_1 = arith.constant 0 : index
    %0 = vector.load %arg1[%c0, %c0_0, %c0_1] : memref<1x8x96xbf16, #tpu.memory_space<vmem>>, vector<1x8x96xbf16>
    %1 = vector.shape_cast %0 : vector<1x8x96xbf16> to vector<8x96xbf16>
    %2 = vector.extract_strided_slice %1 {offsets = [0, 0], sizes = [8, 32], strides = [1, 1]} : vector<8x96xbf16> to vector<8x32xbf16>
    %3 = vector.extract_strided_slice %1 {offsets = [0, 32], sizes = [8, 32], strides = [1, 1]} : vector<8x96xbf16> to vector<8x32xbf16>
    %4 = vector.extract_strided_slice %1 {offsets = [0, 64], sizes = [8, 32], strides = [1, 1]} : vector<8x96xbf16> to vector<8x32xbf16>
    %c0_2 = arith.constant 0 : index
    %c0_3 = arith.constant 0 : index
    %c0_4 = arith.constant 0 : index
    %5 = vector.load %arg2[%c0_2, %c0_3, %c0_4] : memref<1x1x8xf32, #tpu.memory_space<vmem>>, vector<1x1x8xf32>
    %6 = vector.shape_cast %5 : vector<1x1x8xf32> to vector<1x8xf32>
    %c0_5 = arith.constant 0 : index
    %c0_6 = arith.constant 0 : index
    %7 = vector.load %arg3[%c0_5, %c0_6] : memref<32x32xbf16, #tpu.memory_space<vmem>>, vector<32x32xbf16>
    %c0_7 = arith.constant 0 : index
    %c0_8 = arith.constant 0 : index
    %8 = vector.load %arg4[%c0_7, %c0_8] : memref<1x32xf32, #tpu.memory_space<vmem>>, vector<1x32xf32>
    %9 = vector.extract_strided_slice %2 {offsets = [0, 0], sizes = [8, 8], strides = [1, 1]} : vector<8x32xbf16> to vector<8x8xbf16>
    %10 = vector.extract_strided_slice %3 {offsets = [0, 0], sizes = [8, 8], strides = [1, 1]} : vector<8x32xbf16> to vector<8x8xbf16>
    %11 = vector.extract_strided_slice %4 {offsets = [0, 0], sizes = [8, 8], strides = [1, 1]} : vector<8x32xbf16> to vector<8x8xbf16>
    %12 = tpu.transpose %10, [1, 0] : vector<8x8xbf16> -> vector<8x8xbf16>
    %cst = arith.constant dense<0.000000e+00> : vector<8x8xf32>
    %13 = tpu.matmul %9, %12, %cst {dimension_numbers = #tpu.dot_dimension_numbers<[1], [0], [0], [1], [0, 0, 1, 1], [], []>} : vector<8x8xbf16>, vector<8x8xbf16>, vector<8x8xf32> -> vector<8x8xf32>
    %cst_9 = arith.constant 0.353553385 : f32
    %14 = vector.broadcast %cst_9 : f32 to vector<8x8xf32>
    %15 = arith.mulf %13, %14 : vector<8x8xf32>
    %16 = vector.broadcast %6 : vector<1x8xf32> to vector<8x8xf32>
    %17 = arith.addf %15, %16 : vector<8x8xf32>
    %cst_10 = arith.constant dense<0xFF800000> : vector<8xf32>
    %18 = vector.multi_reduction <maximumf>, %17, %cst_10 [1] : vector<8x8xf32> to vector<8xf32>
    %19 = vector.shape_cast %18 : vector<8xf32> to vector<8x1xf32>
    %20 = vector.broadcast %19 : vector<8x1xf32> to vector<8x8xf32>
    %21 = arith.subf %17, %20 : vector<8x8xf32>
    %22 = math.exp %21 : vector<8x8xf32>
    %cst_11 = arith.constant dense<0.000000e+00> : vector<8xf32>
    %23 = vector.multi_reduction <add>, %22, %cst_11 [1] : vector<8x8xf32> to vector<8xf32>
    %24 = vector.shape_cast %23 : vector<8xf32> to vector<8x1xf32>
    %25 = tpu.reciprocal %24 {approx = true} : vector<8x1xf32> -> vector<8x1xf32>
    %26 = vector.broadcast %25 : vector<8x1xf32> to vector<8x8xf32>
    %27 = arith.mulf %22, %26 : vector<8x8xf32>
    %28 = arith.truncf %27 : vector<8x8xf32> to vector<8x8xbf16>
    %cst_12 = arith.constant dense<0.000000e+00> : vector<8x8xf32>
    %29 = tpu.matmul %28, %11, %cst_12 {dimension_numbers = #tpu.dot_dimension_numbers<[1], [0], [0], [1], [0, 0, 1, 1], [], []>} : vector<8x8xbf16>, vector<8x8xbf16>, vector<8x8xf32> -> vector<8x8xf32>
    %30 = vector.extract_strided_slice %2 {offsets = [0, 8], sizes = [8, 8], strides = [1, 1]} : vector<8x32xbf16> to vector<8x8xbf16>
    %31 = vector.extract_strided_slice %3 {offsets = [0, 8], sizes = [8, 8], strides = [1, 1]} : vector<8x32xbf16> to vector<8x8xbf16>
    %32 = vector.extract_strided_slice %4 {offsets = [0, 8], sizes = [8, 8], strides = [1, 1]} : vector<8x32xbf16> to vector<8x8xbf16>
    %33 = tpu.transpose %31, [1, 0] : vector<8x8xbf16> -> vector<8x8xbf16>
    %cst_13 = arith.constant dense<0.000000e+00> : vector<8x8xf32>
    %34 = tpu.matmul %30, %33, %cst_13 {dimension_numbers = #tpu.dot_dimension_numbers<[1], [0], [0], [1], [0, 0, 1, 1], [], []>} : vector<8x8xbf16>, vector<8x8xbf16>, vector<8x8xf32> -> vector<8x8xf32>
    %cst_14 = arith.constant 0.353553385 : f32
    %35 = vector.broadcast %cst_14 : f32 to vector<8x8xf32>
    %36 = arith.mulf %34, %35 : vector<8x8xf32>
    %37 = vector.broadcast %6 : vector<1x8xf32> to vector<8x8xf32>
    %38 = arith.addf %36, %37 : vector<8x8xf32>
    %cst_15 = arith.constant dense<0xFF800000> : vector<8xf32>
    %39 = vector.multi_reduction <maximumf>, %38, %cst_15 [1] : vector<8x8xf32> to vector<8xf32>
    %40 = vector.shape_cast %39 : vector<8xf32> to vector<8x1xf32>
    %41 = vector.broadcast %40 : vector<8x1xf32> to vector<8x8xf32>
    %42 = arith.subf %38, %41 : vector<8x8xf32>
    %43 = math.exp %42 : vector<8x8xf32>
    %cst_16 = arith.constant dense<0.000000e+00> : vector<8xf32>
    %44 = vector.multi_reduction <add>, %43, %cst_16 [1] : vector<8x8xf32> to vector<8xf32>
    %45 = vector.shape_cast %44 : vector<8xf32> to vector<8x1xf32>
    %46 = tpu.reciprocal %45 {approx = true} : vector<8x1xf32> -> vector<8x1xf32>
    %47 = vector.broadcast %46 : vector<8x1xf32> to vector<8x8xf32>
    %48 = arith.mulf %43, %47 : vector<8x8xf32>
    %49 = arith.truncf %48 : vector<8x8xf32> to vector<8x8xbf16>
    %cst_17 = arith.constant dense<0.000000e+00> : vector<8x8xf32>
    %50 = tpu.matmul %49, %32, %cst_17 {dimension_numbers = #tpu.dot_dimension_numbers<[1], [0], [0], [1], [0, 0, 1, 1], [], []>} : vector<8x8xbf16>, vector<8x8xbf16>, vector<8x8xf32> -> vector<8x8xf32>
    %51 = vector.extract_strided_slice %2 {offsets = [0, 16], sizes = [8, 8], strides = [1, 1]} : vector<8x32xbf16> to vector<8x8xbf16>
    %52 = vector.extract_strided_slice %3 {offsets = [0, 16], sizes = [8, 8], strides = [1, 1]} : vector<8x32xbf16> to vector<8x8xbf16>
    %53 = vector.extract_strided_slice %4 {offsets = [0, 16], sizes = [8, 8], strides = [1, 1]} : vector<8x32xbf16> to vector<8x8xbf16>
    %54 = tpu.transpose %52, [1, 0] : vector<8x8xbf16> -> vector<8x8xbf16>
    %cst_18 = arith.constant dense<0.000000e+00> : vector<8x8xf32>
    %55 = tpu.matmul %51, %54, %cst_18 {dimension_numbers = #tpu.dot_dimension_numbers<[1], [0], [0], [1], [0, 0, 1, 1], [], []>} : vector<8x8xbf16>, vector<8x8xbf16>, vector<8x8xf32> -> vector<8x8xf32>
    %cst_19 = arith.constant 0.353553385 : f32
    %56 = vector.broadcast %cst_19 : f32 to vector<8x8xf32>
    %57 = arith.mulf %55, %56 : vector<8x8xf32>
    %58 = vector.broadcast %6 : vector<1x8xf32> to vector<8x8xf32>
    %59 = arith.addf %57, %58 : vector<8x8xf32>
    %cst_20 = arith.constant dense<0xFF800000> : vector<8xf32>
    %60 = vector.multi_reduction <maximumf>, %59, %cst_20 [1] : vector<8x8xf32> to vector<8xf32>
    %61 = vector.shape_cast %60 : vector<8xf32> to vector<8x1xf32>
    %62 = vector.broadcast %61 : vector<8x1xf32> to vector<8x8xf32>
    %63 = arith.subf %59, %62 : vector<8x8xf32>
    %64 = math.exp %63 : vector<8x8xf32>
    %cst_21 = arith.constant dense<0.000000e+00> : vector<8xf32>
    %65 = vector.multi_reduction <add>, %64, %cst_21 [1] : vector<8x8xf32> to vector<8xf32>
    %66 = vector.shape_cast %65 : vector<8xf32> to vector<8x1xf32>
    %67 = tpu.reciprocal %66 {approx = true} : vector<8x1xf32> -> vector<8x1xf32>
    %68 = vector.broadcast %67 : vector<8x1xf32> to vector<8x8xf32>
    %69 = arith.mulf %64, %68 : vector<8x8xf32>
    %70 = arith.truncf %69 : vector<8x8xf32> to vector<8x8xbf16>
    %cst_22 = arith.constant dense<0.000000e+00> : vector<8x8xf32>
    %71 = tpu.matmul %70, %53, %cst_22 {dimension_numbers = #tpu.dot_dimension_numbers<[1], [0], [0], [1], [0, 0, 1, 1], [], []>} : vector<8x8xbf16>, vector<8x8xbf16>, vector<8x8xf32> -> vector<8x8xf32>
    %72 = vector.extract_strided_slice %2 {offsets = [0, 24], sizes = [8, 8], strides = [1, 1]} : vector<8x32xbf16> to vector<8x8xbf16>
    %73 = vector.extract_strided_slice %3 {offsets = [0, 24], sizes = [8, 8], strides = [1, 1]} : vector<8x32xbf16> to vector<8x8xbf16>
    %74 = vector.extract_strided_slice %4 {offsets = [0, 24], sizes = [8, 8], strides = [1, 1]} : vector<8x32xbf16> to vector<8x8xbf16>
    %75 = tpu.transpose %73, [1, 0] : vector<8x8xbf16> -> vector<8x8xbf16>
    %cst_23 = arith.constant dense<0.000000e+00> : vector<8x8xf32>
    %76 = tpu.matmul %72, %75, %cst_23 {dimension_numbers = #tpu.dot_dimension_numbers<[1], [0], [0], [1], [0, 0, 1, 1], [], []>} : vector<8x8xbf16>, vector<8x8xbf16>, vector<8x8xf32> -> vector<8x8xf32>
    %cst_24 = arith.constant 0.353553385 : f32
    %77 = vector.broadcast %cst_24 : f32 to vector<8x8xf32>
    %78 = arith.mulf %76, %77 : vector<8x8xf32>
    %79 = vector.broadcast %6 : vector<1x8xf32> to vector<8x8xf32>
    %80 = arith.addf %78, %79 : vector<8x8xf32>
    %cst_25 = arith.constant dense<0xFF800000> : vector<8xf32>
    %81 = vector.multi_reduction <maximumf>, %80, %cst_25 [1] : vector<8x8xf32> to vector<8xf32>
    %82 = vector.shape_cast %81 : vector<8xf32> to vector<8x1xf32>
    %83 = vector.broadcast %82 : vector<8x1xf32> to vector<8x8xf32>
    %84 = arith.subf %80, %83 : vector<8x8xf32>
    %85 = math.exp %84 : vector<8x8xf32>
    %cst_26 = arith.constant dense<0.000000e+00> : vector<8xf32>
    %86 = vector.multi_reduction <add>, %85, %cst_26 [1] : vector<8x8xf32> to vector<8xf32>
    %87 = vector.shape_cast %86 : vector<8xf32> to vector<8x1xf32>
    %88 = tpu.reciprocal %87 {approx = true} : vector<8x1xf32> -> vector<8x1xf32>
    %89 = vector.broadcast %88 : vector<8x1xf32> to vector<8x8xf32>
    %90 = arith.mulf %85, %89 : vector<8x8xf32>
    %91 = arith.truncf %90 : vector<8x8xf32> to vector<8x8xbf16>
    %cst_27 = arith.constant dense<0.000000e+00> : vector<8x8xf32>
    %92 = tpu.matmul %91, %74, %cst_27 {dimension_numbers = #tpu.dot_dimension_numbers<[1], [0], [0], [1], [0, 0, 1, 1], [], []>} : vector<8x8xbf16>, vector<8x8xbf16>, vector<8x8xf32> -> vector<8x8xf32>
    %93 = tpu.concatenate %29, %50, %71, %92 in 1 : vector<8x8xf32>, vector<8x8xf32>, vector<8x8xf32>, vector<8x8xf32> -> vector<8x32xf32>
    %94 = arith.truncf %93 : vector<8x32xf32> to vector<8x32xbf16>
    %cst_28 = arith.constant dense<0.000000e+00> : vector<8x32xf32>
    %95 = tpu.matmul %94, %7, %cst_28 {dimension_numbers = #tpu.dot_dimension_numbers<[1], [0], [0], [1], [0, 0, 1, 1], [], []>} : vector<8x32xbf16>, vector<32x32xbf16>, vector<8x32xf32> -> vector<8x32xf32>
    %96 = vector.broadcast %8 : vector<1x32xf32> to vector<8x32xf32>
    %97 = arith.addf %95, %96 : vector<8x32xf32>
    %c0_29 = arith.constant 0 : index
    %c0_30 = arith.constant 0 : index
    %c0_31 = arith.constant 0 : index
    %98 = vector.load %arg5[%c0_29, %c0_30, %c0_31] : memref<1x8x32xbf16, #tpu.memory_space<vmem>>, vector<1x8x32xbf16>
    %99 = vector.shape_cast %98 : vector<1x8x32xbf16> to vector<8x32xbf16>
    %c0_32 = arith.constant 0 : index
    %c0_33 = arith.constant 0 : index
    %100 = vector.load %arg6[%c0_32, %c0_33] : memref<1x32xf32, #tpu.memory_space<vmem>>, vector<1x32xf32>
    %c0_34 = arith.constant 0 : index
    %c0_35 = arith.constant 0 : index
    %101 = vector.load %arg7[%c0_34, %c0_35] : memref<1x32xf32, #tpu.memory_space<vmem>>, vector<1x32xf32>
    %102 = arith.extf %99 : vector<8x32xbf16> to vector<8x32xf32>
    %103 = arith.addf %97, %102 : vector<8x32xf32>
    %cst_36 = arith.constant dense<0.000000e+00> : vector<8xf32>
    %104 = vector.multi_reduction <add>, %103, %cst_36 [1] : vector<8x32xf32> to vector<8xf32>
    %105 = vector.shape_cast %104 : vector<8xf32> to vector<8x1xf32>
    %cst_37 = arith.constant 3.200000e+01 : f32
    %106 = vector.broadcast %cst_37 : f32 to vector<8x1xf32>
    %107 = arith.divf %105, %106 : vector<8x1xf32>
    %108 = vector.broadcast %107 : vector<8x1xf32> to vector<8x32xf32>
    %109 = arith.subf %103, %108 : vector<8x32xf32>
    %110 = arith.mulf %109, %109 : vector<8x32xf32>
    %cst_38 = arith.constant dense<0.000000e+00> : vector<8xf32>
    %111 = vector.multi_reduction <add>, %110, %cst_38 [1] : vector<8x32xf32> to vector<8xf32>
    %112 = vector.shape_cast %111 : vector<8xf32> to vector<8x1xf32>
    %cst_39 = arith.constant 3.200000e+01 : f32
    %113 = vector.broadcast %cst_39 : f32 to vector<8x1xf32>
    %114 = arith.divf %112, %113 : vector<8x1xf32>
    %115 = vector.broadcast %107 : vector<8x1xf32> to vector<8x32xf32>
    %116 = arith.subf %103, %115 : vector<8x32xf32>
    %cst_40 = arith.constant 9.99999996E-13 : f32
    %117 = vector.broadcast %cst_40 : f32 to vector<8x1xf32>
    %118 = arith.addf %114, %117 : vector<8x1xf32>
    %119 = math.rsqrt %118 : vector<8x1xf32>
    %120 = vector.broadcast %119 : vector<8x1xf32> to vector<8x32xf32>
    %121 = arith.mulf %116, %120 : vector<8x32xf32>
    %122 = vector.broadcast %100 : vector<1x32xf32> to vector<8x32xf32>
    %123 = arith.mulf %122, %121 : vector<8x32xf32>
    %124 = vector.broadcast %101 : vector<1x32xf32> to vector<8x32xf32>
    %125 = arith.addf %123, %124 : vector<8x32xf32>
    %126 = arith.truncf %125 : vector<8x32xf32> to vector<8x32xbf16>
    %c0_41 = arith.constant 0 : index
    %c0_42 = arith.constant 0 : index
    %c0_43 = arith.constant 0 : index
    %127 = vector.load %arg8[%c0_41, %c0_42, %c0_43] : memref<1x8x32xbf16, #tpu.memory_space<vmem>>, vector<1x8x32xbf16>
    %128 = vector.shape_cast %127 : vector<1x8x32xbf16> to vector<8x32xbf16>
    %129 = vector.shape_cast %126 : vector<8x32xbf16> to vector<1x8x32xbf16>
    tpu.vector_store %arg8[%c0_41, %c0_42, %c0_43], %129 {strides = array<i32>} : memref<1x8x32xbf16, #tpu.memory_space<vmem>>, vector<1x8x32xbf16>,
    return
  }
  func.func @transform_0(%arg0: i32) -> (i32, i32, i32) {
    %c0_i32 = arith.constant 0 : i32
    %c0_i32_0 = arith.constant 0 : i32
    %c0_i32_1 = arith.constant 0 : i32
    return %arg0, %c0_i32, %c0_i32_0 : i32, i32, i32
  }
  func.func @transform_1(%arg0: i32) -> (i32, i32, i32) {
    %c0_i32 = arith.constant 0 : i32
    %c0_i32_0 = arith.constant 0 : i32
    %c0_i32_1 = arith.constant 0 : i32
    return %arg0, %c0_i32, %c0_i32_0 : i32, i32, i32
  }
  func.func @transform_2(%arg0: i32) -> (i32, i32) {
    %c0_i32 = arith.constant 0 : i32
    %c0_i32_0 = arith.constant 0 : i32
    %c0_i32_1 = arith.constant 0 : i32
    return %c0_i32, %c0_i32_0 : i32, i32
  }
  func.func @transform_3(%arg0: i32) -> (i32, i32) {
    %c0_i32 = arith.constant 0 : i32
    %c0_i32_0 = arith.constant 0 : i32
    %c0_i32_1 = arith.constant 0 : i32
    return %c0_i32, %c0_i32_0 : i32, i32
  }
  func.func @transform_4(%arg0: i32) -> (i32, i32, i32) {
    %c0_i32 = arith.constant 0 : i32
    %c0_i32_0 = arith.constant 0 : i32
    %c0_i32_1 = arith.constant 0 : i32
    return %arg0, %c0_i32, %c0_i32_0 : i32, i32, i32
  }
  func.func @transform_5(%arg0: i32) -> (i32, i32) {
    %c0_i32 = arith.constant 0 : i32
    %c0_i32_0 = arith.constant 0 : i32
    %c0_i32_1 = arith.constant 0 : i32
    return %c0_i32, %c0_i32_0 : i32, i32
  }
  func.func @transform_6(%arg0: i32) -> (i32, i32) {
    %c0_i32 = arith.constant 0 : i32
    %c0_i32_0 = arith.constant 0 : i32
    %c0_i32_1 = arith.constant 0 : i32
    return %c0_i32, %c0_i32_0 : i32, i32
  }
  func.func @transform_7(%arg0: i32) -> (i32, i32, i32) {
    %c0_i32 = arith.constant 0 : i32
    %c0_i32_0 = arith.constant 0 : i32
    %c0_i32_1 = arith.constant 0 : i32
    return %arg0, %c0_i32, %c0_i32_0 : i32, i32, i32
  }
}

module attributes {stable_mosaic.version = 11 : i64} {
  func.func @_linear_kernel(%arg0: i32, %arg1: memref<8x64xf32, #tpu.memory_space<vmem>>, %arg2: memref<64x32xbf16, #tpu.memory_space<vmem>>, %arg3: memref<1x32xf32, #tpu.memory_space<vmem>>, %arg4: memref<8x32xbf16, #tpu.memory_space<vmem>>) attributes {dimension_semantics = [#tpu.dimension_semantics<parallel>], iteration_bounds = array<i64: 1>, scalar_prefetch = 0 : i64, scratch_operands = 0 : i64, tpu.core_type = #tpu.core_type<tc>, window_params = [{transform_indices = @transform_0, window_bounds = array<i64: 8, 64>}, {pipeline_mode = #tpu.pipeline_mode<synchronous>, transform_indices = @transform_1, window_bounds = array<i64: 64, 32>}, {pipeline_mode = #tpu.pipeline_mode<synchronous>, transform_indices = @transform_2, window_bounds = array<i64: 1, 32>}, {transform_indices = @transform_3, window_bounds = array<i64: 8, 32>}]} {
    %c0 = arith.constant 0 : index
    %c0_0 = arith.constant 0 : index
    %0 = vector.load %arg1[%c0, %c0_0] : memref<8x64xf32, #tpu.memory_space<vmem>>, vector<8x64xf32>
    %1 = arith.truncf %0 : vector<8x64xf32> to vector<8x64xbf16>
    %c0_1 = arith.constant 0 : index
    %c0_2 = arith.constant 0 : index
    %2 = vector.load %arg2[%c0_1, %c0_2] : memref<64x32xbf16, #tpu.memory_space<vmem>>, vector<64x32xbf16>
    %cst = arith.constant dense<0.000000e+00> : vector<8x32xf32>
    %3 = tpu.matmul %1, %2, %cst {dimension_numbers = #tpu.dot_dimension_numbers<[1], [0], [0], [1], [0, 0, 1, 1], [], []>} : vector<8x64xbf16>, vector<64x32xbf16>, vector<8x32xf32> -> vector<8x32xf32>
    %c0_3 = arith.constant 0 : index
    %c0_4 = arith.constant 0 : index
    %4 = vector.load %arg3[%c0_3, %c0_4] : memref<1x32xf32, #tpu.memory_space<vmem>>, vector<1x32xf32>
    %5 = vector.broadcast %4 : vector<1x32xf32> to vector<8x32xf32>
    %6 = arith.addf %3, %5 : vector<8x32xf32>
    %7 = arith.truncf %6 : vector<8x32xf32> to vector<8x32xbf16>
    %c0_5 = arith.constant 0 : index
    %c0_6 = arith.constant 0 : index
    %8 = vector.load %arg4[%c0_5, %c0_6] : memref<8x32xbf16, #tpu.memory_space<vmem>>, vector<8x32xbf16>
    tpu.vector_store %arg4[%c0_5, %c0_6], %7 {strides = array<i32>} : memref<8x32xbf16, #tpu.memory_space<vmem>>, vector<8x32xbf16>,
    return
  }
  func.func @transform_0(%arg0: i32) -> (i32, i32) {
    %c0_i32 = arith.constant 0 : i32
    %c0_i32_0 = arith.constant 0 : i32
    return %arg0, %c0_i32 : i32, i32
  }
  func.func @transform_1(%arg0: i32) -> (i32, i32) {
    %c0_i32 = arith.constant 0 : i32
    %c0_i32_0 = arith.constant 0 : i32
    %c0_i32_1 = arith.constant 0 : i32
    return %c0_i32, %c0_i32_0 : i32, i32
  }
  func.func @transform_2(%arg0: i32) -> (i32, i32) {
    %c0_i32 = arith.constant 0 : i32
    %c0_i32_0 = arith.constant 0 : i32
    %c0_i32_1 = arith.constant 0 : i32
    return %c0_i32, %c0_i32_0 : i32, i32
  }
  func.func @transform_3(%arg0: i32) -> (i32, i32) {
    %c0_i32 = arith.constant 0 : i32
    %c0_i32_0 = arith.constant 0 : i32
    return %arg0, %c0_i32 : i32, i32
  }
}

module attributes {stable_mosaic.version = 11 : i64} {
  func.func @_linear_kernel(%arg0: i32, %arg1: memref<8x32xbf16, #tpu.memory_space<vmem>>, %arg2: memref<32x96xbf16, #tpu.memory_space<vmem>>, %arg3: memref<1x96xf32, #tpu.memory_space<vmem>>, %arg4: memref<8x96xbf16, #tpu.memory_space<vmem>>) attributes {dimension_semantics = [#tpu.dimension_semantics<parallel>], iteration_bounds = array<i64: 1>, scalar_prefetch = 0 : i64, scratch_operands = 0 : i64, tpu.core_type = #tpu.core_type<tc>, window_params = [{transform_indices = @transform_0, window_bounds = array<i64: 8, 32>}, {pipeline_mode = #tpu.pipeline_mode<synchronous>, transform_indices = @transform_1, window_bounds = array<i64: 32, 96>}, {pipeline_mode = #tpu.pipeline_mode<synchronous>, transform_indices = @transform_2, window_bounds = array<i64: 1, 96>}, {transform_indices = @transform_3, window_bounds = array<i64: 8, 96>}]} {
    %c0 = arith.constant 0 : index
    %c0_0 = arith.constant 0 : index
    %0 = vector.load %arg1[%c0, %c0_0] : memref<8x32xbf16, #tpu.memory_space<vmem>>, vector<8x32xbf16>
    %c0_1 = arith.constant 0 : index
    %c0_2 = arith.constant 0 : index
    %1 = vector.load %arg2[%c0_1, %c0_2] : memref<32x96xbf16, #tpu.memory_space<vmem>>, vector<32x96xbf16>
    %cst = arith.constant dense<0.000000e+00> : vector<8x96xf32>
    %2 = tpu.matmul %0, %1, %cst {dimension_numbers = #tpu.dot_dimension_numbers<[1], [0], [0], [1], [0, 0, 1, 1], [], []>} : vector<8x32xbf16>, vector<32x96xbf16>, vector<8x96xf32> -> vector<8x96xf32>
    %c0_3 = arith.constant 0 : index
    %c0_4 = arith.constant 0 : index
    %3 = vector.load %arg3[%c0_3, %c0_4] : memref<1x96xf32, #tpu.memory_space<vmem>>, vector<1x96xf32>
    %4 = vector.broadcast %3 : vector<1x96xf32> to vector<8x96xf32>
    %5 = arith.addf %2, %4 : vector<8x96xf32>
    %6 = arith.truncf %5 : vector<8x96xf32> to vector<8x96xbf16>
    %c0_5 = arith.constant 0 : index
    %c0_6 = arith.constant 0 : index
    %7 = vector.load %arg4[%c0_5, %c0_6] : memref<8x96xbf16, #tpu.memory_space<vmem>>, vector<8x96xbf16>
    tpu.vector_store %arg4[%c0_5, %c0_6], %6 {strides = array<i32>} : memref<8x96xbf16, #tpu.memory_space<vmem>>, vector<8x96xbf16>,
    return
  }
  func.func @transform_0(%arg0: i32) -> (i32, i32) {
    %c0_i32 = arith.constant 0 : i32
    %c0_i32_0 = arith.constant 0 : i32
    return %arg0, %c0_i32 : i32, i32
  }
  func.func @transform_1(%arg0: i32) -> (i32, i32) {
    %c0_i32 = arith.constant 0 : i32
    %c0_i32_0 = arith.constant 0 : i32
    %c0_i32_1 = arith.constant 0 : i32
    return %c0_i32, %c0_i32_0 : i32, i32
  }
  func.func @transform_2(%arg0: i32) -> (i32, i32) {
    %c0_i32 = arith.constant 0 : i32
    %c0_i32_0 = arith.constant 0 : i32
    %c0_i32_1 = arith.constant 0 : i32
    return %c0_i32, %c0_i32_0 : i32, i32
  }
  func.func @transform_3(%arg0: i32) -> (i32, i32) {
    %c0_i32 = arith.constant 0 : i32
    %c0_i32_0 = arith.constant 0 : i32
    return %arg0, %c0_i32 : i32, i32
  }
}

module attributes {stable_mosaic.version = 11 : i64} {
  func.func @_ffn_block_kernel(%arg0: i32, %arg1: memref<8x32xbf16, #tpu.memory_space<vmem>>, %arg2: memref<32x64xbf16, #tpu.memory_space<vmem>>, %arg3: memref<1x64xf32, #tpu.memory_space<vmem>>, %arg4: memref<64x32xbf16, #tpu.memory_space<vmem>>, %arg5: memref<1x32xf32, #tpu.memory_space<vmem>>, %arg6: memref<1x32xf32, #tpu.memory_space<vmem>>, %arg7: memref<1x32xf32, #tpu.memory_space<vmem>>, %arg8: memref<8x32xbf16, #tpu.memory_space<vmem>>) attributes {dimension_semantics = [#tpu.dimension_semantics<parallel>], iteration_bounds = array<i64: 1>, scalar_prefetch = 0 : i64, scratch_operands = 0 : i64, tpu.core_type = #tpu.core_type<tc>, window_params = [{transform_indices = @transform_0, window_bounds = array<i64: 8, 32>}, {pipeline_mode = #tpu.pipeline_mode<synchronous>, transform_indices = @transform_1, window_bounds = array<i64: 32, 64>}, {pipeline_mode = #tpu.pipeline_mode<synchronous>, transform_indices = @transform_2, window_bounds = array<i64: 1, 64>}, {pipeline_mode = #tpu.pipeline_mode<synchronous>, transform_indices = @transform_3, window_bounds = array<i64: 64, 32>}, {pipeline_mode = #tpu.pipeline_mode<synchronous>, transform_indices = @transform_4, window_bounds = array<i64: 1, 32>}, {pipeline_mode = #tpu.pipeline_mode<synchronous>, transform_indices = @transform_5, window_bounds = array<i64: 1, 32>}, {pipeline_mode = #tpu.pipeline_mode<synchronous>, transform_indices = @transform_6, window_bounds = array<i64: 1, 32>}, {transform_indices = @transform_7, window_bounds = array<i64: 8, 32>}]} {
    %c0 = arith.constant 0 : index
    %c0_0 = arith.constant 0 : index
    %0 = vector.load %arg1[%c0, %c0_0] : memref<8x32xbf16, #tpu.memory_space<vmem>>, vector<8x32xbf16>
    %c0_1 = arith.constant 0 : index
    %c0_2 = arith.constant 0 : index
    %1 = vector.load %arg2[%c0_1, %c0_2] : memref<32x64xbf16, #tpu.memory_space<vmem>>, vector<32x64xbf16>
    %cst = arith.constant dense<0.000000e+00> : vector<8x64xf32>
    %2 = tpu.matmul %0, %1, %cst {dimension_numbers = #tpu.dot_dimension_numbers<[1], [0], [0], [1], [0, 0, 1, 1], [], []>} : vector<8x32xbf16>, vector<32x64xbf16>, vector<8x64xf32> -> vector<8x64xf32>
    %c0_3 = arith.constant 0 : index
    %c0_4 = arith.constant 0 : index
    %3 = vector.load %arg3[%c0_3, %c0_4] : memref<1x64xf32, #tpu.memory_space<vmem>>, vector<1x64xf32>
    %4 = vector.broadcast %3 : vector<1x64xf32> to vector<8x64xf32>
    %5 = arith.addf %2, %4 : vector<8x64xf32>
    %6 = arith.mulf %5, %5 : vector<8x64xf32>
    %7 = arith.mulf %5, %6 : vector<8x64xf32>
    %cst_5 = arith.constant 4.471500e-02 : f32
    %8 = vector.broadcast %cst_5 : f32 to vector<8x64xf32>
    %9 = arith.mulf %8, %7 : vector<8x64xf32>
    %10 = arith.addf %5, %9 : vector<8x64xf32>
    %cst_6 = arith.constant 0.797884583 : f32
    %11 = vector.broadcast %cst_6 : f32 to vector<8x64xf32>
    %12 = arith.mulf %11, %10 : vector<8x64xf32>
    %13 = math.tanh %12 : vector<8x64xf32>
    %cst_7 = arith.constant 1.000000e+00 : f32
    %14 = vector.broadcast %cst_7 : f32 to vector<8x64xf32>
    %15 = arith.addf %14, %13 : vector<8x64xf32>
    %cst_8 = arith.constant 5.000000e-01 : f32
    %16 = vector.broadcast %cst_8 : f32 to vector<8x64xf32>
    %17 = arith.mulf %16, %15 : vector<8x64xf32>
    %18 = arith.mulf %5, %17 : vector<8x64xf32>
    %19 = arith.truncf %18 : vector<8x64xf32> to vector<8x64xbf16>
    %c0_9 = arith.constant 0 : index
    %c0_10 = arith.constant 0 : index
    %20 = vector.load %arg4[%c0_9, %c0_10] : memref<64x32xbf16, #tpu.memory_space<vmem>>, vector<64x32xbf16>
    %cst_11 = arith.constant dense<0.000000e+00> : vector<8x32xf32>
    %21 = tpu.matmul %19, %20, %cst_11 {dimension_numbers = #tpu.dot_dimension_numbers<[1], [0], [0], [1], [0, 0, 1, 1], [], []>} : vector<8x64xbf16>, vector<64x32xbf16>, vector<8x32xf32> -> vector<8x32xf32>
    %c0_12 = arith.constant 0 : index
    %c0_13 = arith.constant 0 : index
    %22 = vector.load %arg5[%c0_12, %c0_13] : memref<1x32xf32, #tpu.memory_space<vmem>>, vector<1x32xf32>
    %23 = vector.broadcast %22 : vector<1x32xf32> to vector<8x32xf32>
    %24 = arith.addf %21, %23 : vector<8x32xf32>
    %25 = arith.extf %0 : vector<8x32xbf16> to vector<8x32xf32>
    %26 = arith.addf %24, %25 : vector<8x32xf32>
    %c0_14 = arith.constant 0 : index
    %c0_15 = arith.constant 0 : index
    %27 = vector.load %arg6[%c0_14, %c0_15] : memref<1x32xf32, #tpu.memory_space<vmem>>, vector<1x32xf32>
    %c0_16 = arith.constant 0 : index
    %c0_17 = arith.constant 0 : index
    %28 = vector.load %arg7[%c0_16, %c0_17] : memref<1x32xf32, #tpu.memory_space<vmem>>, vector<1x32xf32>
    %cst_18 = arith.constant dense<0.000000e+00> : vector<8xf32>
    %29 = vector.multi_reduction <add>, %26, %cst_18 [1] : vector<8x32xf32> to vector<8xf32>
    %30 = vector.shape_cast %29 : vector<8xf32> to vector<8x1xf32>
    %cst_19 = arith.constant 3.200000e+01 : f32
    %31 = vector.broadcast %cst_19 : f32 to vector<8x1xf32>
    %32 = arith.divf %30, %31 : vector<8x1xf32>
    %33 = vector.broadcast %32 : vector<8x1xf32> to vector<8x32xf32>
    %34 = arith.subf %26, %33 : vector<8x32xf32>
    %35 = arith.mulf %34, %34 : vector<8x32xf32>
    %cst_20 = arith.constant dense<0.000000e+00> : vector<8xf32>
    %36 = vector.multi_reduction <add>, %35, %cst_20 [1] : vector<8x32xf32> to vector<8xf32>
    %37 = vector.shape_cast %36 : vector<8xf32> to vector<8x1xf32>
    %cst_21 = arith.constant 3.200000e+01 : f32
    %38 = vector.broadcast %cst_21 : f32 to vector<8x1xf32>
    %39 = arith.divf %37, %38 : vector<8x1xf32>
    %40 = vector.broadcast %32 : vector<8x1xf32> to vector<8x32xf32>
    %41 = arith.subf %26, %40 : vector<8x32xf32>
    %cst_22 = arith.constant 9.99999996E-13 : f32
    %42 = vector.broadcast %cst_22 : f32 to vector<8x1xf32>
    %43 = arith.addf %39, %42 : vector<8x1xf32>
    %44 = math.rsqrt %43 : vector<8x1xf32>
    %45 = vector.broadcast %44 : vector<8x1xf32> to vector<8x32xf32>
    %46 = arith.mulf %41, %45 : vector<8x32xf32>
    %47 = vector.broadcast %27 : vector<1x32xf32> to vector<8x32xf32>
    %48 = arith.mulf %47, %46 : vector<8x32xf32>
    %49 = vector.broadcast %28 : vector<1x32xf32> to vector<8x32xf32>
    %50 = arith.addf %48, %49 : vector<8x32xf32>
    %51 = arith.truncf %50 : vector<8x32xf32> to vector<8x32xbf16>
    %c0_23 = arith.constant 0 : index
    %c0_24 = arith.constant 0 : index
    %52 = vector.load %arg8[%c0_23, %c0_24] : memref<8x32xbf16, #tpu.memory_space<vmem>>, vector<8x32xbf16>
    tpu.vector_store %arg8[%c0_23, %c0_24], %51 {strides = array<i32>} : memref<8x32xbf16, #tpu.memory_space<vmem>>, vector<8x32xbf16>,
    return
  }
  func.func @transform_0(%arg0: i32) -> (i32, i32) {
    %c0_i32 = arith.constant 0 : i32
    %c0_i32_0 = arith.constant 0 : i32
    return %arg0, %c0_i32 : i32, i32
  }
  func.func @transform_1(%arg0: i32) -> (i32, i32) {
    %c0_i32 = arith.constant 0 : i32
    %c0_i32_0 = arith.constant 0 : i32
    %c0_i32_1 = arith.constant 0 : i32
    return %c0_i32, %c0_i32_0 : i32, i32
  }
  func.func @transform_2(%arg0: i32) -> (i32, i32) {
    %c0_i32 = arith.constant 0 : i32
    %c0_i32_0 = arith.constant 0 : i32
    %c0_i32_1 = arith.constant 0 : i32
    return %c0_i32, %c0_i32_0 : i32, i32
  }
  func.func @transform_3(%arg0: i32) -> (i32, i32) {
    %c0_i32 = arith.constant 0 : i32
    %c0_i32_0 = arith.constant 0 : i32
    %c0_i32_1 = arith.constant 0 : i32
    return %c0_i32, %c0_i32_0 : i32, i32
  }
  func.func @transform_4(%arg0: i32) -> (i32, i32) {
    %c0_i32 = arith.constant 0 : i32
    %c0_i32_0 = arith.constant 0 : i32
    %c0_i32_1 = arith.constant 0 : i32
    return %c0_i32, %c0_i32_0 : i32, i32
  }
  func.func @transform_5(%arg0: i32) -> (i32, i32) {
    %c0_i32 = arith.constant 0 : i32
    %c0_i32_0 = arith.constant 0 : i32
    %c0_i32_1 = arith.constant 0 : i32
    return %c0_i32, %c0_i32_0 : i32, i32
  }
  func.func @transform_6(%arg0: i32) -> (i32, i32) {
    %c0_i32 = arith.constant 0 : i32
    %c0_i32_0 = arith.constant 0 : i32
    %c0_i32_1 = arith.constant 0 : i32
    return %c0_i32, %c0_i32_0 : i32, i32
  }
  func.func @transform_7(%arg0: i32) -> (i32, i32) {
    %c0_i32 = arith.constant 0 : i32
    %c0_i32_0 = arith.constant 0 : i32
    return %arg0, %c0_i32 : i32, i32
  }
}

module attributes {stable_mosaic.version = 11 : i64} {
  func.func @_self_attn_block_kernel(%arg0: i32, %arg1: memref<1x4x96xbf16, #tpu.memory_space<vmem>>, %arg2: memref<1x1x4xf32, #tpu.memory_space<vmem>>, %arg3: memref<32x32xbf16, #tpu.memory_space<vmem>>, %arg4: memref<1x32xf32, #tpu.memory_space<vmem>>, %arg5: memref<1x4x32xbf16, #tpu.memory_space<vmem>>, %arg6: memref<1x32xf32, #tpu.memory_space<vmem>>, %arg7: memref<1x32xf32, #tpu.memory_space<vmem>>, %arg8: memref<1x4x32xbf16, #tpu.memory_space<vmem>>) attributes {dimension_semantics = [#tpu.dimension_semantics<parallel>], iteration_bounds = array<i64: 2>, scalar_prefetch = 0 : i64, scratch_operands = 0 : i64, tpu.core_type = #tpu.core_type<tc>, window_params = [{transform_indices = @transform_0, window_bounds = array<i64: 1, 4, 96>}, {transform_indices = @transform_1, window_bounds = array<i64: 1, 1, 4>}, {pipeline_mode = #tpu.pipeline_mode<synchronous>, transform_indices = @transform_2, window_bounds = array<i64: 32, 32>}, {pipeline_mode = #tpu.pipeline_mode<synchronous>, transform_indices = @transform_3, window_bounds = array<i64: 1, 32>}, {transform_indices = @transform_4, window_bounds = array<i64: 1, 4, 32>}, {pipeline_mode = #tpu.pipeline_mode<synchronous>, transform_indices = @transform_5, window_bounds = array<i64: 1, 32>}, {pipeline_mode = #tpu.pipeline_mode<synchronous>, transform_indices = @transform_6, window_bounds = array<i64: 1, 32>}, {transform_indices = @transform_7, window_bounds = array<i64: 1, 4, 32>}]} {
    %c0 = arith.constant 0 : index
    %c0_0 = arith.constant 0 : index
    %c0_1 = arith.constant 0 : index
    %0 = vector.load %arg1[%c0, %c0_0, %c0_1] : memref<1x4x96xbf16, #tpu.memory_space<vmem>>, vector<1x4x96xbf16>
    %1 = vector.shape_cast %0 : vector<1x4x96xbf16> to vector<4x96xbf16>
    %2 = vector.extract_strided_slice %1 {offsets = [0, 0], sizes = [4, 32], strides = [1, 1]} : vector<4x96xbf16> to vector<4x32xbf16>
    %3 = vector.extract_strided_slice %1 {offsets = [0, 32], sizes = [4, 32], strides = [1, 1]} : vector<4x96xbf16> to vector<4x32xbf16>
    %4 = vector.extract_strided_slice %1 {offsets = [0, 64], sizes = [4, 32], strides = [1, 1]} : vector<4x96xbf16> to vector<4x32xbf16>
    %c0_2 = arith.constant 0 : index
    %c0_3 = arith.constant 0 : index
    %c0_4 = arith.constant 0 : index
    %5 = vector.load %arg2[%c0_2, %c0_3, %c0_4] : memref<1x1x4xf32, #tpu.memory_space<vmem>>, vector<1x1x4xf32>
    %6 = vector.shape_cast %5 : vector<1x1x4xf32> to vector<1x4xf32>
    %c0_5 = arith.constant 0 : index
    %c0_6 = arith.constant 0 : index
    %7 = vector.load %arg3[%c0_5, %c0_6] : memref<32x32xbf16, #tpu.memory_space<vmem>>, vector<32x32xbf16>
    %c0_7 = arith.constant 0 : index
    %c0_8 = arith.constant 0 : index
    %8 = vector.load %arg4[%c0_7, %c0_8] : memref<1x32xf32, #tpu.memory_space<vmem>>, vector<1x32xf32>
    %9 = vector.extract_strided_slice %2 {offsets = [0, 0], sizes = [4, 8], strides = [1, 1]} : vector<4x32xbf16> to vector<4x8xbf16>
    %10 = vector.extract_strided_slice %3 {offsets = [0, 0], sizes = [4, 8], strides = [1, 1]} : vector<4x32xbf16> to vector<4x8xbf16>
    %11 = vector.extract_strided_slice %4 {offsets = [0, 0], sizes = [4, 8], strides = [1, 1]} : vector<4x32xbf16> to vector<4x8xbf16>
    %12 = tpu.transpose %10, [1, 0] : vector<4x8xbf16> -> vector<8x4xbf16>
    %cst = arith.constant dense<0.000000e+00> : vector<4x4xf32>
    %13 = tpu.matmul %9, %12, %cst {dimension_numbers = #tpu.dot_dimension_numbers<[1], [0], [0], [1], [0, 0, 1, 1], [], []>} : vector<4x8xbf16>, vector<8x4xbf16>, vector<4x4xf32> -> vector<4x4xf32>
    %cst_9 = arith.constant 0.353553385 : f32
    %14 = vector.broadcast %cst_9 : f32 to vector<4x4xf32>
    %15 = arith.mulf %13, %14 : vector<4x4xf32>
    %16 = vector.broadcast %6 : vector<1x4xf32> to vector<4x4xf32>
    %17 = arith.addf %15, %16 : vector<4x4xf32>
    %cst_10 = arith.constant dense<0xFF800000> : vector<4xf32>
    %18 = vector.multi_reduction <maximumf>, %17, %cst_10 [1] : vector<4x4xf32> to vector<4xf32>
    %19 = vector.shape_cast %18 : vector<4xf32> to vector<4x1xf32>
    %20 = vector.broadcast %19 : vector<4x1xf32> to vector<4x4xf32>
    %21 = arith.subf %17, %20 : vector<4x4xf32>
    %22 = math.exp %21 : vector<4x4xf32>
    %cst_11 = arith.constant dense<0.000000e+00> : vector<4xf32>
    %23 = vector.multi_reduction <add>, %22, %cst_11 [1] : vector<4x4xf32> to vector<4xf32>
    %24 = vector.shape_cast %23 : vector<4xf32> to vector<4x1xf32>
    %25 = tpu.reciprocal %24 {approx = true} : vector<4x1xf32> -> vector<4x1xf32>
    %26 = vector.broadcast %25 : vector<4x1xf32> to vector<4x4xf32>
    %27 = arith.mulf %22, %26 : vector<4x4xf32>
    %28 = arith.truncf %27 : vector<4x4xf32> to vector<4x4xbf16>
    %cst_12 = arith.constant dense<0.000000e+00> : vector<4x8xf32>
    %29 = tpu.matmul %28, %11, %cst_12 {dimension_numbers = #tpu.dot_dimension_numbers<[1], [0], [0], [1], [0, 0, 1, 1], [], []>} : vector<4x4xbf16>, vector<4x8xbf16>, vector<4x8xf32> -> vector<4x8xf32>
    %30 = vector.extract_strided_slice %2 {offsets = [0, 8], sizes = [4, 8], strides = [1, 1]} : vector<4x32xbf16> to vector<4x8xbf16>
    %31 = vector.extract_strided_slice %3 {offsets = [0, 8], sizes = [4, 8], strides = [1, 1]} : vector<4x32xbf16> to vector<4x8xbf16>
    %32 = vector.extract_strided_slice %4 {offsets = [0, 8], sizes = [4, 8], strides = [1, 1]} : vector<4x32xbf16> to vector<4x8xbf16>
    %33 = tpu.transpose %31, [1, 0] : vector<4x8xbf16> -> vector<8x4xbf16>
    %cst_13 = arith.constant dense<0.000000e+00> : vector<4x4xf32>
    %34 = tpu.matmul %30, %33, %cst_13 {dimension_numbers = #tpu.dot_dimension_numbers<[1], [0], [0], [1], [0, 0, 1, 1], [], []>} : vector<4x8xbf16>, vector<8x4xbf16>, vector<4x4xf32> -> vector<4x4xf32>
    %cst_14 = arith.constant 0.353553385 : f32
    %35 = vector.broadcast %cst_14 : f32 to vector<4x4xf32>
    %36 = arith.mulf %34, %35 : vector<4x4xf32>
    %37 = vector.broadcast %6 : vector<1x4xf32> to vector<4x4xf32>
    %38 = arith.addf %36, %37 : vector<4x4xf32>
    %cst_15 = arith.constant dense<0xFF800000> : vector<4xf32>
    %39 = vector.multi_reduction <maximumf>, %38, %cst_15 [1] : vector<4x4xf32> to vector<4xf32>
    %40 = vector.shape_cast %39 : vector<4xf32> to vector<4x1xf32>
    %41 = vector.broadcast %40 : vector<4x1xf32> to vector<4x4xf32>
    %42 = arith.subf %38, %41 : vector<4x4xf32>
    %43 = math.exp %42 : vector<4x4xf32>
    %cst_16 = arith.constant dense<0.000000e+00> : vector<4xf32>
    %44 = vector.multi_reduction <add>, %43, %cst_16 [1] : vector<4x4xf32> to vector<4xf32>
    %45 = vector.shape_cast %44 : vector<4xf32> to vector<4x1xf32>
    %46 = tpu.reciprocal %45 {approx = true} : vector<4x1xf32> -> vector<4x1xf32>
    %47 = vector.broadcast %46 : vector<4x1xf32> to vector<4x4xf32>
    %48 = arith.mulf %43, %47 : vector<4x4xf32>
    %49 = arith.truncf %48 : vector<4x4xf32> to vector<4x4xbf16>
    %cst_17 = arith.constant dense<0.000000e+00> : vector<4x8xf32>
    %50 = tpu.matmul %49, %32, %cst_17 {dimension_numbers = #tpu.dot_dimension_numbers<[1], [0], [0], [1], [0, 0, 1, 1], [], []>} : vector<4x4xbf16>, vector<4x8xbf16>, vector<4x8xf32> -> vector<4x8xf32>
    %51 = vector.extract_strided_slice %2 {offsets = [0, 16], sizes = [4, 8], strides = [1, 1]} : vector<4x32xbf16> to vector<4x8xbf16>
    %52 = vector.extract_strided_slice %3 {offsets = [0, 16], sizes = [4, 8], strides = [1, 1]} : vector<4x32xbf16> to vector<4x8xbf16>
    %53 = vector.extract_strided_slice %4 {offsets = [0, 16], sizes = [4, 8], strides = [1, 1]} : vector<4x32xbf16> to vector<4x8xbf16>
    %54 = tpu.transpose %52, [1, 0] : vector<4x8xbf16> -> vector<8x4xbf16>
    %cst_18 = arith.constant dense<0.000000e+00> : vector<4x4xf32>
    %55 = tpu.matmul %51, %54, %cst_18 {dimension_numbers = #tpu.dot_dimension_numbers<[1], [0], [0], [1], [0, 0, 1, 1], [], []>} : vector<4x8xbf16>, vector<8x4xbf16>, vector<4x4xf32> -> vector<4x4xf32>
    %cst_19 = arith.constant 0.353553385 : f32
    %56 = vector.broadcast %cst_19 : f32 to vector<4x4xf32>
    %57 = arith.mulf %55, %56 : vector<4x4xf32>
    %58 = vector.broadcast %6 : vector<1x4xf32> to vector<4x4xf32>
    %59 = arith.addf %57, %58 : vector<4x4xf32>
    %cst_20 = arith.constant dense<0xFF800000> : vector<4xf32>
    %60 = vector.multi_reduction <maximumf>, %59, %cst_20 [1] : vector<4x4xf32> to vector<4xf32>
    %61 = vector.shape_cast %60 : vector<4xf32> to vector<4x1xf32>
    %62 = vector.broadcast %61 : vector<4x1xf32> to vector<4x4xf32>
    %63 = arith.subf %59, %62 : vector<4x4xf32>
    %64 = math.exp %63 : vector<4x4xf32>
    %cst_21 = arith.constant dense<0.000000e+00> : vector<4xf32>
    %65 = vector.multi_reduction <add>, %64, %cst_21 [1] : vector<4x4xf32> to vector<4xf32>
    %66 = vector.shape_cast %65 : vector<4xf32> to vector<4x1xf32>
    %67 = tpu.reciprocal %66 {approx = true} : vector<4x1xf32> -> vector<4x1xf32>
    %68 = vector.broadcast %67 : vector<4x1xf32> to vector<4x4xf32>
    %69 = arith.mulf %64, %68 : vector<4x4xf32>
    %70 = arith.truncf %69 : vector<4x4xf32> to vector<4x4xbf16>
    %cst_22 = arith.constant dense<0.000000e+00> : vector<4x8xf32>
    %71 = tpu.matmul %70, %53, %cst_22 {dimension_numbers = #tpu.dot_dimension_numbers<[1], [0], [0], [1], [0, 0, 1, 1], [], []>} : vector<4x4xbf16>, vector<4x8xbf16>, vector<4x8xf32> -> vector<4x8xf32>
    %72 = vector.extract_strided_slice %2 {offsets = [0, 24], sizes = [4, 8], strides = [1, 1]} : vector<4x32xbf16> to vector<4x8xbf16>
    %73 = vector.extract_strided_slice %3 {offsets = [0, 24], sizes = [4, 8], strides = [1, 1]} : vector<4x32xbf16> to vector<4x8xbf16>
    %74 = vector.extract_strided_slice %4 {offsets = [0, 24], sizes = [4, 8], strides = [1, 1]} : vector<4x32xbf16> to vector<4x8xbf16>
    %75 = tpu.transpose %73, [1, 0] : vector<4x8xbf16> -> vector<8x4xbf16>
    %cst_23 = arith.constant dense<0.000000e+00> : vector<4x4xf32>
    %76 = tpu.matmul %72, %75, %cst_23 {dimension_numbers = #tpu.dot_dimension_numbers<[1], [0], [0], [1], [0, 0, 1, 1], [], []>} : vector<4x8xbf16>, vector<8x4xbf16>, vector<4x4xf32> -> vector<4x4xf32>
    %cst_24 = arith.constant 0.353553385 : f32
    %77 = vector.broadcast %cst_24 : f32 to vector<4x4xf32>
    %78 = arith.mulf %76, %77 : vector<4x4xf32>
    %79 = vector.broadcast %6 : vector<1x4xf32> to vector<4x4xf32>
    %80 = arith.addf %78, %79 : vector<4x4xf32>
    %cst_25 = arith.constant dense<0xFF800000> : vector<4xf32>
    %81 = vector.multi_reduction <maximumf>, %80, %cst_25 [1] : vector<4x4xf32> to vector<4xf32>
    %82 = vector.shape_cast %81 : vector<4xf32> to vector<4x1xf32>
    %83 = vector.broadcast %82 : vector<4x1xf32> to vector<4x4xf32>
    %84 = arith.subf %80, %83 : vector<4x4xf32>
    %85 = math.exp %84 : vector<4x4xf32>
    %cst_26 = arith.constant dense<0.000000e+00> : vector<4xf32>
    %86 = vector.multi_reduction <add>, %85, %cst_26 [1] : vector<4x4xf32> to vector<4xf32>
    %87 = vector.shape_cast %86 : vector<4xf32> to vector<4x1xf32>
    %88 = tpu.reciprocal %87 {approx = true} : vector<4x1xf32> -> vector<4x1xf32>
    %89 = vector.broadcast %88 : vector<4x1xf32> to vector<4x4xf32>
    %90 = arith.mulf %85, %89 : vector<4x4xf32>
    %91 = arith.truncf %90 : vector<4x4xf32> to vector<4x4xbf16>
    %cst_27 = arith.constant dense<0.000000e+00> : vector<4x8xf32>
    %92 = tpu.matmul %91, %74, %cst_27 {dimension_numbers = #tpu.dot_dimension_numbers<[1], [0], [0], [1], [0, 0, 1, 1], [], []>} : vector<4x4xbf16>, vector<4x8xbf16>, vector<4x8xf32> -> vector<4x8xf32>
    %93 = tpu.concatenate %29, %50, %71, %92 in 1 : vector<4x8xf32>, vector<4x8xf32>, vector<4x8xf32>, vector<4x8xf32> -> vector<4x32xf32>
    %94 = arith.truncf %93 : vector<4x32xf32> to vector<4x32xbf16>
    %cst_28 = arith.constant dense<0.000000e+00> : vector<4x32xf32>
    %95 = tpu.matmul %94, %7, %cst_28 {dimension_numbers = #tpu.dot_dimension_numbers<[1], [0], [0], [1], [0, 0, 1, 1], [], []>} : vector<4x32xbf16>, vector<32x32xbf16>, vector<4x32xf32> -> vector<4x32xf32>
    %96 = vector.broadcast %8 : vector<1x32xf32> to vector<4x32xf32>
    %97 = arith.addf %95, %96 : vector<4x32xf32>
    %c0_29 = arith.constant 0 : index
    %c0_30 = arith.constant 0 : index
    %c0_31 = arith.constant 0 : index
    %98 = vector.load %arg5[%c0_29, %c0_30, %c0_31] : memref<1x4x32xbf16, #tpu.memory_space<vmem>>, vector<1x4x32xbf16>
    %99 = vector.shape_cast %98 : vector<1x4x32xbf16> to vector<4x32xbf16>
    %c0_32 = arith.constant 0 : index
    %c0_33 = arith.constant 0 : index
    %100 = vector.load %arg6[%c0_32, %c0_33] : memref<1x32xf32, #tpu.memory_space<vmem>>, vector<1x32xf32>
    %c0_34 = arith.constant 0 : index
    %c0_35 = arith.constant 0 : index
    %101 = vector.load %arg7[%c0_34, %c0_35] : memref<1x32xf32, #tpu.memory_space<vmem>>, vector<1x32xf32>
    %102 = arith.extf %99 : vector<4x32xbf16> to vector<4x32xf32>
    %103 = arith.addf %97, %102 : vector<4x32xf32>
    %cst_36 = arith.constant dense<0.000000e+00> : vector<4xf32>
    %104 = vector.multi_reduction <add>, %103, %cst_36 [1] : vector<4x32xf32> to vector<4xf32>
    %105 = vector.shape_cast %104 : vector<4xf32> to vector<4x1xf32>
    %cst_37 = arith.constant 3.200000e+01 : f32
    %106 = vector.broadcast %cst_37 : f32 to vector<4x1xf32>
    %107 = arith.divf %105, %106 : vector<4x1xf32>
    %108 = vector.broadcast %107 : vector<4x1xf32> to vector<4x32xf32>
    %109 = arith.subf %103, %108 : vector<4x32xf32>
    %110 = arith.mulf %109, %109 : vector<4x32xf32>
    %cst_38 = arith.constant dense<0.000000e+00> : vector<4xf32>
    %111 = vector.multi_reduction <add>, %110, %cst_38 [1] : vector<4x32xf32> to vector<4xf32>
    %112 = vector.shape_cast %111 : vector<4xf32> to vector<4x1xf32>
    %cst_39 = arith.constant 3.200000e+01 : f32
    %113 = vector.broadcast %cst_39 : f32 to vector<4x1xf32>
    %114 = arith.divf %112, %113 : vector<4x1xf32>
    %115 = vector.broadcast %107 : vector<4x1xf32> to vector<4x32xf32>
    %116 = arith.subf %103, %115 : vector<4x32xf32>
    %cst_40 = arith.constant 9.99999996E-13 : f32
    %117 = vector.broadcast %cst_40 : f32 to vector<4x1xf32>
    %118 = arith.addf %114, %117 : vector<4x1xf32>
    %119 = math.rsqrt %118 : vector<4x1xf32>
    %120 = vector.broadcast %119 : vector<4x1xf32> to vector<4x32xf32>
    %121 = arith.mulf %116, %120 : vector<4x32xf32>
    %122 = vector.broadcast %100 : vector<1x32xf32> to vector<4x32xf32>
    %123 = arith.mulf %122, %121 : vector<4x32xf32>
    %124 = vector.broadcast %101 : vector<1x32xf32> to vector<4x32xf32>
    %125 = arith.addf %123, %124 : vector<4x32xf32>
    %126 = arith.truncf %125 : vector<4x32xf32> to vector<4x32xbf16>
    %c0_41 = arith.constant 0 : index
    %c0_42 = arith.constant 0 : index
    %c0_43 = arith.constant 0 : index
    %127 = vector.load %arg8[%c0_41, %c0_42, %c0_43] : memref<1x4x32xbf16, #tpu.memory_space<vmem>>, vector<1x4x32xbf16>
    %128 = vector.shape_cast %127 : vector<1x4x32xbf16> to vector<4x32xbf16>
    %129 = vector.shape_cast %126 : vector<4x32xbf16> to vector<1x4x32xbf16>
    tpu.vector_store %arg8[%c0_41, %c0_42, %c0_43], %129 {strides = array<i32>} : memref<1x4x32xbf16, #tpu.memory_space<vmem>>, vector<1x4x32xbf16>,
    return
  }
  func.func @transform_0(%arg0: i32) -> (i32, i32, i32) {
    %c0_i32 = arith.constant 0 : i32
    %c0_i32_0 = arith.constant 0 : i32
    %c0_i32_1 = arith.constant 0 : i32
    return %arg0, %c0_i32, %c0_i32_0 : i32, i32, i32
  }
  func.func @transform_1(%arg0: i32) -> (i32, i32, i32) {
    %c0_i32 = arith.constant 0 : i32
    %c0_i32_0 = arith.constant 0 : i32
    %c0_i32_1 = arith.constant 0 : i32
    return %arg0, %c0_i32, %c0_i32_0 : i32, i32, i32
  }
  func.func @transform_2(%arg0: i32) -> (i32, i32) {
    %c0_i32 = arith.constant 0 : i32
    %c0_i32_0 = arith.constant 0 : i32
    %c0_i32_1 = arith.constant 0 : i32
    return %c0_i32, %c0_i32_0 : i32, i32
  }
  func.func @transform_3(%arg0: i32) -> (i32, i32) {
    %c0_i32 = arith.constant 0 : i32
    %c0_i32_0 = arith.constant 0 : i32
    %c0_i32_1 = arith.constant 0 : i32
    return %c0_i32, %c0_i32_0 : i32, i32
  }
  func.func @transform_4(%arg0: i32) -> (i32, i32, i32) {
    %c0_i32 = arith.constant 0 : i32
    %c0_i32_0 = arith.constant 0 : i32
    %c0_i32_1 = arith.constant 0 : i32
    return %arg0, %c0_i32, %c0_i32_0 : i32, i32, i32
  }
  func.func @transform_5(%arg0: i32) -> (i32, i32) {
    %c0_i32 = arith.constant 0 : i32
    %c0_i32_0 = arith.constant 0 : i32
    %c0_i32_1 = arith.constant 0 : i32
    return %c0_i32, %c0_i32_0 : i32, i32
  }
  func.func @transform_6(%arg0: i32) -> (i32, i32) {
    %c0_i32 = arith.constant 0 : i32
    %c0_i32_0 = arith.constant 0 : i32
    %c0_i32_1 = arith.constant 0 : i32
    return %c0_i32, %c0_i32_0 : i32, i32
  }
  func.func @transform_7(%arg0: i32) -> (i32, i32, i32) {
    %c0_i32 = arith.constant 0 : i32
    %c0_i32_0 = arith.constant 0 : i32
    %c0_i32_1 = arith.constant 0 : i32
    return %arg0, %c0_i32, %c0_i32_0 : i32, i32, i32
  }
}

module attributes {stable_mosaic.version = 11 : i64} {
  func.func @_linear_kernel(%arg0: i32, %arg1: memref<8x32xbf16, #tpu.memory_space<vmem>>, %arg2: memref<32x64xbf16, #tpu.memory_space<vmem>>, %arg3: memref<1x64xf32, #tpu.memory_space<vmem>>, %arg4: memref<8x64xbf16, #tpu.memory_space<vmem>>) attributes {dimension_semantics = [#tpu.dimension_semantics<parallel>], iteration_bounds = array<i64: 1>, scalar_prefetch = 0 : i64, scratch_operands = 0 : i64, tpu.core_type = #tpu.core_type<tc>, window_params = [{transform_indices = @transform_0, window_bounds = array<i64: 8, 32>}, {pipeline_mode = #tpu.pipeline_mode<synchronous>, transform_indices = @transform_1, window_bounds = array<i64: 32, 64>}, {pipeline_mode = #tpu.pipeline_mode<synchronous>, transform_indices = @transform_2, window_bounds = array<i64: 1, 64>}, {transform_indices = @transform_3, window_bounds = array<i64: 8, 64>}]} {
    %c0 = arith.constant 0 : index
    %c0_0 = arith.constant 0 : index
    %0 = vector.load %arg1[%c0, %c0_0] : memref<8x32xbf16, #tpu.memory_space<vmem>>, vector<8x32xbf16>
    %c0_1 = arith.constant 0 : index
    %c0_2 = arith.constant 0 : index
    %1 = vector.load %arg2[%c0_1, %c0_2] : memref<32x64xbf16, #tpu.memory_space<vmem>>, vector<32x64xbf16>
    %cst = arith.constant dense<0.000000e+00> : vector<8x64xf32>
    %2 = tpu.matmul %0, %1, %cst {dimension_numbers = #tpu.dot_dimension_numbers<[1], [0], [0], [1], [0, 0, 1, 1], [], []>} : vector<8x32xbf16>, vector<32x64xbf16>, vector<8x64xf32> -> vector<8x64xf32>
    %c0_3 = arith.constant 0 : index
    %c0_4 = arith.constant 0 : index
    %3 = vector.load %arg3[%c0_3, %c0_4] : memref<1x64xf32, #tpu.memory_space<vmem>>, vector<1x64xf32>
    %4 = vector.broadcast %3 : vector<1x64xf32> to vector<8x64xf32>
    %5 = arith.addf %2, %4 : vector<8x64xf32>
    %6 = arith.truncf %5 : vector<8x64xf32> to vector<8x64xbf16>
    %c0_5 = arith.constant 0 : index
    %c0_6 = arith.constant 0 : index
    %7 = vector.load %arg4[%c0_5, %c0_6] : memref<8x64xbf16, #tpu.memory_space<vmem>>, vector<8x64xbf16>
    tpu.vector_store %arg4[%c0_5, %c0_6], %6 {strides = array<i32>} : memref<8x64xbf16, #tpu.memory_space<vmem>>, vector<8x64xbf16>,
    return
  }
  func.func @transform_0(%arg0: i32) -> (i32, i32) {
    %c0_i32 = arith.constant 0 : i32
    %c0_i32_0 = arith.constant 0 : i32
    return %arg0, %c0_i32 : i32, i32
  }
  func.func @transform_1(%arg0: i32) -> (i32, i32) {
    %c0_i32 = arith.constant 0 : i32
    %c0_i32_0 = arith.constant 0 : i32
    %c0_i32_1 = arith.constant 0 : i32
    return %c0_i32, %c0_i32_0 : i32, i32
  }
  func.func @transform_2(%arg0: i32) -> (i32, i32) {
    %c0_i32 = arith.constant 0 : i32
    %c0_i32_0 = arith.constant 0 : i32
    %c0_i32_1 = arith.constant 0 : i32
    return %c0_i32, %c0_i32_0 : i32, i32
  }
  func.func @transform_3(%arg0: i32) -> (i32, i32) {
    %c0_i32 = arith.constant 0 : i32
    %c0_i32_0 = arith.constant 0 : i32
    return %arg0, %c0_i32 : i32, i32
  }
}

module attributes {stable_mosaic.version = 11 : i64} {
  func.func @_cross_attn_block_kernel(%arg0: i32, %arg1: i32, %arg2: memref<1x8x32xbf16, #tpu.memory_space<vmem>>, %arg3: memref<1x4x64xbf16, #tpu.memory_space<vmem>>, %arg4: memref<1x1x4xf32, #tpu.memory_space<vmem>>, %arg5: memref<32x32xbf16, #tpu.memory_space<vmem>>, %arg6: memref<1x32xf32, #tpu.memory_space<vmem>>, %arg7: memref<1x8x32xbf16, #tpu.memory_space<vmem>>, %arg8: memref<1x32xf32, #tpu.memory_space<vmem>>, %arg9: memref<1x32xf32, #tpu.memory_space<vmem>>, %arg10: memref<1x8x32xbf16, #tpu.memory_space<vmem>>) attributes {dimension_semantics = [#tpu.dimension_semantics<parallel>, #tpu.dimension_semantics<parallel>], iteration_bounds = array<i64: 2, 1>, scalar_prefetch = 0 : i64, scratch_operands = 0 : i64, tpu.core_type = #tpu.core_type<tc>, window_params = [{transform_indices = @transform_0, window_bounds = array<i64: 1, 8, 32>}, {transform_indices = @transform_1, window_bounds = array<i64: 1, 4, 64>}, {transform_indices = @transform_2, window_bounds = array<i64: 1, 1, 4>}, {pipeline_mode = #tpu.pipeline_mode<synchronous>, transform_indices = @transform_3, window_bounds = array<i64: 32, 32>}, {pipeline_mode = #tpu.pipeline_mode<synchronous>, transform_indices = @transform_4, window_bounds = array<i64: 1, 32>}, {transform_indices = @transform_5, window_bounds = array<i64: 1, 8, 32>}, {pipeline_mode = #tpu.pipeline_mode<synchronous>, transform_indices = @transform_6, window_bounds = array<i64: 1, 32>}, {pipeline_mode = #tpu.pipeline_mode<synchronous>, transform_indices = @transform_7, window_bounds = array<i64: 1, 32>}, {transform_indices = @transform_8, window_bounds = array<i64: 1, 8, 32>}]} {
    %c0 = arith.constant 0 : index
    %c0_0 = arith.constant 0 : index
    %c0_1 = arith.constant 0 : index
    %0 = vector.load %arg2[%c0, %c0_0, %c0_1] : memref<1x8x32xbf16, #tpu.memory_space<vmem>>, vector<1x8x32xbf16>
    %1 = vector.shape_cast %0 : vector<1x8x32xbf16> to vector<8x32xbf16>
    %c0_2 = arith.constant 0 : index
    %c0_3 = arith.constant 0 : index
    %c0_4 = arith.constant 0 : index
    %2 = vector.load %arg3[%c0_2, %c0_3, %c0_4] : memref<1x4x64xbf16, #tpu.memory_space<vmem>>, vector<1x4x64xbf16>
    %3 = vector.shape_cast %2 : vector<1x4x64xbf16> to vector<4x64xbf16>
    %4 = vector.extract_strided_slice %3 {offsets = [0, 0], sizes = [4, 32], strides = [1, 1]} : vector<4x64xbf16> to vector<4x32xbf16>
    %5 = vector.extract_strided_slice %3 {offsets = [0, 32], sizes = [4, 32], strides = [1, 1]} : vector<4x64xbf16> to vector<4x32xbf16>
    %c0_5 = arith.constant 0 : index
    %c0_6 = arith.constant 0 : index
    %c0_7 = arith.constant 0 : index
    %6 = vector.load %arg4[%c0_5, %c0_6, %c0_7] : memref<1x1x4xf32, #tpu.memory_space<vmem>>, vector<1x1x4xf32>
    %7 = vector.shape_cast %6 : vector<1x1x4xf32> to vector<1x4xf32>
    %c0_8 = arith.constant 0 : index
    %c0_9 = arith.constant 0 : index
    %8 = vector.load %arg5[%c0_8, %c0_9] : memref<32x32xbf16, #tpu.memory_space<vmem>>, vector<32x32xbf16>
    %c0_10 = arith.constant 0 : index
    %c0_11 = arith.constant 0 : index
    %9 = vector.load %arg6[%c0_10, %c0_11] : memref<1x32xf32, #tpu.memory_space<vmem>>, vector<1x32xf32>
    %10 = vector.extract_strided_slice %1 {offsets = [0, 0], sizes = [8, 8], strides = [1, 1]} : vector<8x32xbf16> to vector<8x8xbf16>
    %11 = vector.extract_strided_slice %4 {offsets = [0, 0], sizes = [4, 8], strides = [1, 1]} : vector<4x32xbf16> to vector<4x8xbf16>
    %12 = vector.extract_strided_slice %5 {offsets = [0, 0], sizes = [4, 8], strides = [1, 1]} : vector<4x32xbf16> to vector<4x8xbf16>
    %13 = tpu.transpose %11, [1, 0] : vector<4x8xbf16> -> vector<8x4xbf16>
    %cst = arith.constant dense<0.000000e+00> : vector<8x4xf32>
    %14 = tpu.matmul %10, %13, %cst {dimension_numbers = #tpu.dot_dimension_numbers<[1], [0], [0], [1], [0, 0, 1, 1], [], []>} : vector<8x8xbf16>, vector<8x4xbf16>, vector<8x4xf32> -> vector<8x4xf32>
    %cst_12 = arith.constant 0.353553385 : f32
    %15 = vector.broadcast %cst_12 : f32 to vector<8x4xf32>
    %16 = arith.mulf %14, %15 : vector<8x4xf32>
    %17 = vector.broadcast %7 : vector<1x4xf32> to vector<8x4xf32>
    %18 = arith.addf %16, %17 : vector<8x4xf32>
    %cst_13 = arith.constant dense<0xFF800000> : vector<8xf32>
    %19 = vector.multi_reduction <maximumf>, %18, %cst_13 [1] : vector<8x4xf32> to vector<8xf32>
    %20 = vector.shape_cast %19 : vector<8xf32> to vector<8x1xf32>
    %21 = vector.broadcast %20 : vector<8x1xf32> to vector<8x4xf32>
    %22 = arith.subf %18, %21 : vector<8x4xf32>
    %23 = math.exp %22 : vector<8x4xf32>
    %cst_14 = arith.constant dense<0.000000e+00> : vector<8xf32>
    %24 = vector.multi_reduction <add>, %23, %cst_14 [1] : vector<8x4xf32> to vector<8xf32>
    %25 = vector.shape_cast %24 : vector<8xf32> to vector<8x1xf32>
    %26 = tpu.reciprocal %25 {approx = true} : vector<8x1xf32> -> vector<8x1xf32>
    %27 = vector.broadcast %26 : vector<8x1xf32> to vector<8x4xf32>
    %28 = arith.mulf %23, %27 : vector<8x4xf32>
    %29 = arith.truncf %28 : vector<8x4xf32> to vector<8x4xbf16>
    %cst_15 = arith.constant dense<0.000000e+00> : vector<8x8xf32>
    %30 = tpu.matmul %29, %12, %cst_15 {dimension_numbers = #tpu.dot_dimension_numbers<[1], [0], [0], [1], [0, 0, 1, 1], [], []>} : vector<8x4xbf16>, vector<4x8xbf16>, vector<8x8xf32> -> vector<8x8xf32>
    %31 = vector.extract_strided_slice %1 {offsets = [0, 8], sizes = [8, 8], strides = [1, 1]} : vector<8x32xbf16> to vector<8x8xbf16>
    %32 = vector.extract_strided_slice %4 {offsets = [0, 8], sizes = [4, 8], strides = [1, 1]} : vector<4x32xbf16> to vector<4x8xbf16>
    %33 = vector.extract_strided_slice %5 {offsets = [0, 8], sizes = [4, 8], strides = [1, 1]} : vector<4x32xbf16> to vector<4x8xbf16>
    %34 = tpu.transpose %32, [1, 0] : vector<4x8xbf16> -> vector<8x4xbf16>
    %cst_16 = arith.constant dense<0.000000e+00> : vector<8x4xf32>
    %35 = tpu.matmul %31, %34, %cst_16 {dimension_numbers = #tpu.dot_dimension_numbers<[1], [0], [0], [1], [0, 0, 1, 1], [], []>} : vector<8x8xbf16>, vector<8x4xbf16>, vector<8x4xf32> -> vector<8x4xf32>
    %cst_17 = arith.constant 0.353553385 : f32
    %36 = vector.broadcast %cst_17 : f32 to vector<8x4xf32>
    %37 = arith.mulf %35, %36 : vector<8x4xf32>
    %38 = vector.broadcast %7 : vector<1x4xf32> to vector<8x4xf32>
    %39 = arith.addf %37, %38 : vector<8x4xf32>
    %cst_18 = arith.constant dense<0xFF800000> : vector<8xf32>
    %40 = vector.multi_reduction <maximumf>, %39, %cst_18 [1] : vector<8x4xf32> to vector<8xf32>
    %41 = vector.shape_cast %40 : vector<8xf32> to vector<8x1xf32>
    %42 = vector.broadcast %41 : vector<8x1xf32> to vector<8x4xf32>
    %43 = arith.subf %39, %42 : vector<8x4xf32>
    %44 = math.exp %43 : vector<8x4xf32>
    %cst_19 = arith.constant dense<0.000000e+00> : vector<8xf32>
    %45 = vector.multi_reduction <add>, %44, %cst_19 [1] : vector<8x4xf32> to vector<8xf32>
    %46 = vector.shape_cast %45 : vector<8xf32> to vector<8x1xf32>
    %47 = tpu.reciprocal %46 {approx = true} : vector<8x1xf32> -> vector<8x1xf32>
    %48 = vector.broadcast %47 : vector<8x1xf32> to vector<8x4xf32>
    %49 = arith.mulf %44, %48 : vector<8x4xf32>
    %50 = arith.truncf %49 : vector<8x4xf32> to vector<8x4xbf16>
    %cst_20 = arith.constant dense<0.000000e+00> : vector<8x8xf32>
    %51 = tpu.matmul %50, %33, %cst_20 {dimension_numbers = #tpu.dot_dimension_numbers<[1], [0], [0], [1], [0, 0, 1, 1], [], []>} : vector<8x4xbf16>, vector<4x8xbf16>, vector<8x8xf32> -> vector<8x8xf32>
    %52 = vector.extract_strided_slice %1 {offsets = [0, 16], sizes = [8, 8], strides = [1, 1]} : vector<8x32xbf16> to vector<8x8xbf16>
    %53 = vector.extract_strided_slice %4 {offsets = [0, 16], sizes = [4, 8], strides = [1, 1]} : vector<4x32xbf16> to vector<4x8xbf16>
    %54 = vector.extract_strided_slice %5 {offsets = [0, 16], sizes = [4, 8], strides = [1, 1]} : vector<4x32xbf16> to vector<4x8xbf16>
    %55 = tpu.transpose %53, [1, 0] : vector<4x8xbf16> -> vector<8x4xbf16>
    %cst_21 = arith.constant dense<0.000000e+00> : vector<8x4xf32>
    %56 = tpu.matmul %52, %55, %cst_21 {dimension_numbers = #tpu.dot_dimension_numbers<[1], [0], [0], [1], [0, 0, 1, 1], [], []>} : vector<8x8xbf16>, vector<8x4xbf16>, vector<8x4xf32> -> vector<8x4xf32>
    %cst_22 = arith.constant 0.353553385 : f32
    %57 = vector.broadcast %cst_22 : f32 to vector<8x4xf32>
    %58 = arith.mulf %56, %57 : vector<8x4xf32>
    %59 = vector.broadcast %7 : vector<1x4xf32> to vector<8x4xf32>
    %60 = arith.addf %58, %59 : vector<8x4xf32>
    %cst_23 = arith.constant dense<0xFF800000> : vector<8xf32>
    %61 = vector.multi_reduction <maximumf>, %60, %cst_23 [1] : vector<8x4xf32> to vector<8xf32>
    %62 = vector.shape_cast %61 : vector<8xf32> to vector<8x1xf32>
    %63 = vector.broadcast %62 : vector<8x1xf32> to vector<8x4xf32>
    %64 = arith.subf %60, %63 : vector<8x4xf32>
    %65 = math.exp %64 : vector<8x4xf32>
    %cst_24 = arith.constant dense<0.000000e+00> : vector<8xf32>
    %66 = vector.multi_reduction <add>, %65, %cst_24 [1] : vector<8x4xf32> to vector<8xf32>
    %67 = vector.shape_cast %66 : vector<8xf32> to vector<8x1xf32>
    %68 = tpu.reciprocal %67 {approx = true} : vector<8x1xf32> -> vector<8x1xf32>
    %69 = vector.broadcast %68 : vector<8x1xf32> to vector<8x4xf32>
    %70 = arith.mulf %65, %69 : vector<8x4xf32>
    %71 = arith.truncf %70 : vector<8x4xf32> to vector<8x4xbf16>
    %cst_25 = arith.constant dense<0.000000e+00> : vector<8x8xf32>
    %72 = tpu.matmul %71, %54, %cst_25 {dimension_numbers = #tpu.dot_dimension_numbers<[1], [0], [0], [1], [0, 0, 1, 1], [], []>} : vector<8x4xbf16>, vector<4x8xbf16>, vector<8x8xf32> -> vector<8x8xf32>
    %73 = vector.extract_strided_slice %1 {offsets = [0, 24], sizes = [8, 8], strides = [1, 1]} : vector<8x32xbf16> to vector<8x8xbf16>
    %74 = vector.extract_strided_slice %4 {offsets = [0, 24], sizes = [4, 8], strides = [1, 1]} : vector<4x32xbf16> to vector<4x8xbf16>
    %75 = vector.extract_strided_slice %5 {offsets = [0, 24], sizes = [4, 8], strides = [1, 1]} : vector<4x32xbf16> to vector<4x8xbf16>
    %76 = tpu.transpose %74, [1, 0] : vector<4x8xbf16> -> vector<8x4xbf16>
    %cst_26 = arith.constant dense<0.000000e+00> : vector<8x4xf32>
    %77 = tpu.matmul %73, %76, %cst_26 {dimension_numbers = #tpu.dot_dimension_numbers<[1], [0], [0], [1], [0, 0, 1, 1], [], []>} : vector<8x8xbf16>, vector<8x4xbf16>, vector<8x4xf32> -> vector<8x4xf32>
    %cst_27 = arith.constant 0.353553385 : f32
    %78 = vector.broadcast %cst_27 : f32 to vector<8x4xf32>
    %79 = arith.mulf %77, %78 : vector<8x4xf32>
    %80 = vector.broadcast %7 : vector<1x4xf32> to vector<8x4xf32>
    %81 = arith.addf %79, %80 : vector<8x4xf32>
    %cst_28 = arith.constant dense<0xFF800000> : vector<8xf32>
    %82 = vector.multi_reduction <maximumf>, %81, %cst_28 [1] : vector<8x4xf32> to vector<8xf32>
    %83 = vector.shape_cast %82 : vector<8xf32> to vector<8x1xf32>
    %84 = vector.broadcast %83 : vector<8x1xf32> to vector<8x4xf32>
    %85 = arith.subf %81, %84 : vector<8x4xf32>
    %86 = math.exp %85 : vector<8x4xf32>
    %cst_29 = arith.constant dense<0.000000e+00> : vector<8xf32>
    %87 = vector.multi_reduction <add>, %86, %cst_29 [1] : vector<8x4xf32> to vector<8xf32>
    %88 = vector.shape_cast %87 : vector<8xf32> to vector<8x1xf32>
    %89 = tpu.reciprocal %88 {approx = true} : vector<8x1xf32> -> vector<8x1xf32>
    %90 = vector.broadcast %89 : vector<8x1xf32> to vector<8x4xf32>
    %91 = arith.mulf %86, %90 : vector<8x4xf32>
    %92 = arith.truncf %91 : vector<8x4xf32> to vector<8x4xbf16>
    %cst_30 = arith.constant dense<0.000000e+00> : vector<8x8xf32>
    %93 = tpu.matmul %92, %75, %cst_30 {dimension_numbers = #tpu.dot_dimension_numbers<[1], [0], [0], [1], [0, 0, 1, 1], [], []>} : vector<8x4xbf16>, vector<4x8xbf16>, vector<8x8xf32> -> vector<8x8xf32>
    %94 = tpu.concatenate %30, %51, %72, %93 in 1 : vector<8x8xf32>, vector<8x8xf32>, vector<8x8xf32>, vector<8x8xf32> -> vector<8x32xf32>
    %95 = arith.truncf %94 : vector<8x32xf32> to vector<8x32xbf16>
    %cst_31 = arith.constant dense<0.000000e+00> : vector<8x32xf32>
    %96 = tpu.matmul %95, %8, %cst_31 {dimension_numbers = #tpu.dot_dimension_numbers<[1], [0], [0], [1], [0, 0, 1, 1], [], []>} : vector<8x32xbf16>, vector<32x32xbf16>, vector<8x32xf32> -> vector<8x32xf32>
    %97 = vector.broadcast %9 : vector<1x32xf32> to vector<8x32xf32>
    %98 = arith.addf %96, %97 : vector<8x32xf32>
    %c0_32 = arith.constant 0 : index
    %c0_33 = arith.constant 0 : index
    %c0_34 = arith.constant 0 : index
    %99 = vector.load %arg7[%c0_32, %c0_33, %c0_34] : memref<1x8x32xbf16, #tpu.memory_space<vmem>>, vector<1x8x32xbf16>
    %100 = vector.shape_cast %99 : vector<1x8x32xbf16> to vector<8x32xbf16>
    %c0_35 = arith.constant 0 : index
    %c0_36 = arith.constant 0 : index
    %101 = vector.load %arg8[%c0_35, %c0_36] : memref<1x32xf32, #tpu.memory_space<vmem>>, vector<1x32xf32>
    %c0_37 = arith.constant 0 : index
    %c0_38 = arith.constant 0 : index
    %102 = vector.load %arg9[%c0_37, %c0_38] : memref<1x32xf32, #tpu.memory_space<vmem>>, vector<1x32xf32>
    %103 = arith.extf %100 : vector<8x32xbf16> to vector<8x32xf32>
    %104 = arith.addf %98, %103 : vector<8x32xf32>
    %cst_39 = arith.constant dense<0.000000e+00> : vector<8xf32>
    %105 = vector.multi_reduction <add>, %104, %cst_39 [1] : vector<8x32xf32> to vector<8xf32>
    %106 = vector.shape_cast %105 : vector<8xf32> to vector<8x1xf32>
    %cst_40 = arith.constant 3.200000e+01 : f32
    %107 = vector.broadcast %cst_40 : f32 to vector<8x1xf32>
    %108 = arith.divf %106, %107 : vector<8x1xf32>
    %109 = vector.broadcast %108 : vector<8x1xf32> to vector<8x32xf32>
    %110 = arith.subf %104, %109 : vector<8x32xf32>
    %111 = arith.mulf %110, %110 : vector<8x32xf32>
    %cst_41 = arith.constant dense<0.000000e+00> : vector<8xf32>
    %112 = vector.multi_reduction <add>, %111, %cst_41 [1] : vector<8x32xf32> to vector<8xf32>
    %113 = vector.shape_cast %112 : vector<8xf32> to vector<8x1xf32>
    %cst_42 = arith.constant 3.200000e+01 : f32
    %114 = vector.broadcast %cst_42 : f32 to vector<8x1xf32>
    %115 = arith.divf %113, %114 : vector<8x1xf32>
    %116 = vector.broadcast %108 : vector<8x1xf32> to vector<8x32xf32>
    %117 = arith.subf %104, %116 : vector<8x32xf32>
    %cst_43 = arith.constant 9.99999996E-13 : f32
    %118 = vector.broadcast %cst_43 : f32 to vector<8x1xf32>
    %119 = arith.addf %115, %118 : vector<8x1xf32>
    %120 = math.rsqrt %119 : vector<8x1xf32>
    %121 = vector.broadcast %120 : vector<8x1xf32> to vector<8x32xf32>
    %122 = arith.mulf %117, %121 : vector<8x32xf32>
    %123 = vector.broadcast %101 : vector<1x32xf32> to vector<8x32xf32>
    %124 = arith.mulf %123, %122 : vector<8x32xf32>
    %125 = vector.broadcast %102 : vector<1x32xf32> to vector<8x32xf32>
    %126 = arith.addf %124, %125 : vector<8x32xf32>
    %127 = arith.truncf %126 : vector<8x32xf32> to vector<8x32xbf16>
    %c0_44 = arith.constant 0 : index
    %c0_45 = arith.constant 0 : index
    %c0_46 = arith.constant 0 : index
    %128 = vector.load %arg10[%c0_44, %c0_45, %c0_46] : memref<1x8x32xbf16, #tpu.memory_space<vmem>>, vector<1x8x32xbf16>
    %129 = vector.shape_cast %128 : vector<1x8x32xbf16> to vector<8x32xbf16>
    %130 = vector.shape_cast %127 : vector<8x32xbf16> to vector<1x8x32xbf16>
    tpu.vector_store %arg10[%c0_44, %c0_45, %c0_46], %130 {strides = array<i32>} : memref<1x8x32xbf16, #tpu.memory_space<vmem>>, vector<1x8x32xbf16>,
    return
  }
  func.func @transform_0(%arg0: i32, %arg1: i32) -> (i32, i32, i32) {
    %c0_i32 = arith.constant 0 : i32
    %c0_i32_0 = arith.constant 0 : i32
    return %arg0, %arg1, %c0_i32 : i32, i32, i32
  }
  func.func @transform_1(%arg0: i32, %arg1: i32) -> (i32, i32, i32) {
    %c0_i32 = arith.constant 0 : i32
    %c0_i32_0 = arith.constant 0 : i32
    %c0_i32_1 = arith.constant 0 : i32
    return %arg0, %c0_i32, %c0_i32_0 : i32, i32, i32
  }
  func.func @transform_2(%arg0: i32, %arg1: i32) -> (i32, i32, i32) {
    %c0_i32 = arith.constant 0 : i32
    %c0_i32_0 = arith.constant 0 : i32
    %c0_i32_1 = arith.constant 0 : i32
    return %arg0, %c0_i32, %c0_i32_0 : i32, i32, i32
  }
  func.func @transform_3(%arg0: i32, %arg1: i32) -> (i32, i32) {
    %c0_i32 = arith.constant 0 : i32
    %c0_i32_0 = arith.constant 0 : i32
    %c0_i32_1 = arith.constant 0 : i32
    return %c0_i32, %c0_i32_0 : i32, i32
  }
  func.func @transform_4(%arg0: i32, %arg1: i32) -> (i32, i32) {
    %c0_i32 = arith.constant 0 : i32
    %c0_i32_0 = arith.constant 0 : i32
    %c0_i32_1 = arith.constant 0 : i32
    return %c0_i32, %c0_i32_0 : i32, i32
  }
  func.func @transform_5(%arg0: i32, %arg1: i32) -> (i32, i32, i32) {
    %c0_i32 = arith.constant 0 : i32
    %c0_i32_0 = arith.constant 0 : i32
    return %arg0, %arg1, %c0_i32 : i32, i32, i32
  }
  func.func @transform_6(%arg0: i32, %arg1: i32) -> (i32, i32) {
    %c0_i32 = arith.constant 0 : i32
    %c0_i32_0 = arith.constant 0 : i32
    %c0_i32_1 = arith.constant 0 : i32
    return %c0_i32, %c0_i32_0 : i32, i32
  }
  func.func @transform_7(%arg0: i32, %arg1: i32) -> (i32, i32) {
    %c0_i32 = arith.constant 0 : i32
    %c0_i32_0 = arith.constant 0 : i32
    %c0_i32_1 = arith.constant 0 : i32
    return %c0_i32, %c0_i32_0 : i32, i32
  }
  func.func @transform_8(%arg0: i32, %arg1: i32) -> (i32, i32, i32) {
    %c0_i32 = arith.constant 0 : i32
    %c0_i32_0 = arith.constant 0 : i32
    return %arg0, %arg1, %c0_i32 : i32, i32, i32
  }
}

module attributes {stable_mosaic.version = 11 : i64} {
  func.func @_linear_kernel(%arg0: i32, %arg1: memref<16x32xbf16, #tpu.memory_space<vmem>>, %arg2: memref<32x64xbf16, #tpu.memory_space<vmem>>, %arg3: memref<1x64xf32, #tpu.memory_space<vmem>>, %arg4: memref<16x64xf32, #tpu.memory_space<vmem>>) attributes {dimension_semantics = [#tpu.dimension_semantics<parallel>], iteration_bounds = array<i64: 1>, scalar_prefetch = 0 : i64, scratch_operands = 0 : i64, tpu.core_type = #tpu.core_type<tc>, window_params = [{transform_indices = @transform_0, window_bounds = array<i64: 16, 32>}, {pipeline_mode = #tpu.pipeline_mode<synchronous>, transform_indices = @transform_1, window_bounds = array<i64: 32, 64>}, {pipeline_mode = #tpu.pipeline_mode<synchronous>, transform_indices = @transform_2, window_bounds = array<i64: 1, 64>}, {transform_indices = @transform_3, window_bounds = array<i64: 16, 64>}]} {
    %c0 = arith.constant 0 : index
    %c0_0 = arith.constant 0 : index
    %0 = vector.load %arg1[%c0, %c0_0] : memref<16x32xbf16, #tpu.memory_space<vmem>>, vector<16x32xbf16>
    %c0_1 = arith.constant 0 : index
    %c0_2 = arith.constant 0 : index
    %1 = vector.load %arg2[%c0_1, %c0_2] : memref<32x64xbf16, #tpu.memory_space<vmem>>, vector<32x64xbf16>
    %cst = arith.constant dense<0.000000e+00> : vector<16x64xf32>
    %2 = tpu.matmul %0, %1, %cst {dimension_numbers = #tpu.dot_dimension_numbers<[1], [0], [0], [1], [0, 0, 1, 1], [], []>} : vector<16x32xbf16>, vector<32x64xbf16>, vector<16x64xf32> -> vector<16x64xf32>
    %c0_3 = arith.constant 0 : index
    %c0_4 = arith.constant 0 : index
    %3 = vector.load %arg3[%c0_3, %c0_4] : memref<1x64xf32, #tpu.memory_space<vmem>>, vector<1x64xf32>
    %4 = vector.broadcast %3 : vector<1x64xf32> to vector<16x64xf32>
    %5 = arith.addf %2, %4 : vector<16x64xf32>
    %c0_5 = arith.constant 0 : index
    %c0_6 = arith.constant 0 : index
    %6 = vector.load %arg4[%c0_5, %c0_6] : memref<16x64xf32, #tpu.memory_space<vmem>>, vector<16x64xf32>
    tpu.vector_store %arg4[%c0_5, %c0_6], %5 {strides = array<i32>} : memref<16x64xf32, #tpu.memory_space<vmem>>, vector<16x64xf32>,
    return
  }
  func.func @transform_0(%arg0: i32) -> (i32, i32) {
    %c0_i32 = arith.constant 0 : i32
    %c0_i32_0 = arith.constant 0 : i32
    return %arg0, %c0_i32 : i32, i32
  }
  func.func @transform_1(%arg0: i32) -> (i32, i32) {
    %c0_i32 = arith.constant 0 : i32
    %c0_i32_0 = arith.constant 0 : i32
    %c0_i32_1 = arith.constant 0 : i32
    return %c0_i32, %c0_i32_0 : i32, i32
  }
  func.func @transform_2(%arg0: i32) -> (i32, i32) {
    %c0_i32 = arith.constant 0 : i32
    %c0_i32_0 = arith.constant 0 : i32
    %c0_i32_1 = arith.constant 0 : i32
    return %c0_i32, %c0_i32_0 : i32, i32
  }
  func.func @transform_3(%arg0: i32) -> (i32, i32) {
    %c0_i32 = arith.constant 0 : i32
    %c0_i32_0 = arith.constant 0 : i32
    return %arg0, %c0_i32 : i32, i32
  }
}

module attributes {stable_mosaic.version = 11 : i64} {
  func.func @_lstm_head_kernel(%arg0: i32, %arg1: memref<8x2x64xf32, #tpu.memory_space<vmem>>, %arg2: memref<16x64xbf16, #tpu.memory_space<vmem>>, %arg3: memref<16x8xbf16, #tpu.memory_space<vmem>>, %arg4: memref<1x8xf32, #tpu.memory_space<vmem>>, %arg5: memref<2x16xf32, #tpu.memory_space<vmem>>, %arg6: memref<2x8xf32, #tpu.memory_space<vmem>>) attributes {dimension_semantics = [#tpu.dimension_semantics<arbitrary>], iteration_bounds = array<i64: 1>, scalar_prefetch = 0 : i64, scratch_operands = 0 : i64, tpu.core_type = #tpu.core_type<tc>, window_params = [{pipeline_mode = #tpu.pipeline_mode<synchronous>, transform_indices = @transform_0, window_bounds = array<i64: 8, 2, 64>}, {pipeline_mode = #tpu.pipeline_mode<synchronous>, transform_indices = @transform_1, window_bounds = array<i64: 16, 64>}, {pipeline_mode = #tpu.pipeline_mode<synchronous>, transform_indices = @transform_2, window_bounds = array<i64: 16, 8>}, {pipeline_mode = #tpu.pipeline_mode<synchronous>, transform_indices = @transform_3, window_bounds = array<i64: 1, 8>}, {pipeline_mode = #tpu.pipeline_mode<synchronous>, transform_indices = @transform_4, window_bounds = array<i64: 2, 16>}, {pipeline_mode = #tpu.pipeline_mode<synchronous>, transform_indices = @transform_5, window_bounds = array<i64: 2, 8>}]} {
    %cst = arith.constant 0.000000e+00 : f32
    %0 = vector.broadcast %cst : f32 to vector<2x16xf32>
    %cst_0 = arith.constant 0.000000e+00 : f32
    %1 = vector.broadcast %cst_0 : f32 to vector<2x16xf32>
    %c0_i32 = arith.constant 0 : i32
    %2 = arith.index_cast %c0_i32 : i32 to index
    %c0 = arith.constant 0 : index
    %c0_1 = arith.constant 0 : index
    %3 = vector.load %arg1[%2, %c0, %c0_1] : memref<8x2x64xf32, #tpu.memory_space<vmem>>, vector<1x2x64xf32>
    %4 = vector.shape_cast %3 : vector<1x2x64xf32> to vector<2x64xf32>
    %5 = arith.truncf %0 : vector<2x16xf32> to vector<2x16xbf16>
    %c0_2 = arith.constant 0 : index
    %c0_3 = arith.constant 0 : index
    %6 = vector.load %arg2[%c0_2, %c0_3] : memref<16x64xbf16, #tpu.memory_space<vmem>>, vector<16x64xbf16>
    %cst_4 = arith.constant dense<0.000000e+00> : vector<2x64xf32>
    %7 = tpu.matmul %5, %6, %cst_4 {dimension_numbers = #tpu.dot_dimension_numbers<[1], [0], [0], [1], [0, 0, 1, 1], [], []>} : vector<2x16xbf16>, vector<16x64xbf16>, vector<2x64xf32> -> vector<2x64xf32>
    %8 = arith.addf %4, %7 : vector<2x64xf32>
    %9 = vector.extract_strided_slice %8 {offsets = [0, 0], sizes = [2, 16], strides = [1, 1]} : vector<2x64xf32> to vector<2x16xf32>
    %10 = arith.negf %9 : vector<2x16xf32>
    %11 = math.exp %10 : vector<2x16xf32>
    %cst_5 = arith.constant 1.000000e+00 : f32
    %12 = vector.broadcast %cst_5 : f32 to vector<2x16xf32>
    %13 = arith.addf %12, %11 : vector<2x16xf32>
    %14 = arith.divf %12, %13 : vector<2x16xf32>
    %15 = vector.extract_strided_slice %8 {offsets = [0, 16], sizes = [2, 16], strides = [1, 1]} : vector<2x64xf32> to vector<2x16xf32>
    %16 = arith.negf %15 : vector<2x16xf32>
    %17 = math.exp %16 : vector<2x16xf32>
    %cst_6 = arith.constant 1.000000e+00 : f32
    %18 = vector.broadcast %cst_6 : f32 to vector<2x16xf32>
    %19 = arith.addf %18, %17 : vector<2x16xf32>
    %20 = arith.divf %18, %19 : vector<2x16xf32>
    %21 = vector.extract_strided_slice %8 {offsets = [0, 32], sizes = [2, 16], strides = [1, 1]} : vector<2x64xf32> to vector<2x16xf32>
    %22 = math.tanh %21 : vector<2x16xf32>
    %23 = vector.extract_strided_slice %8 {offsets = [0, 48], sizes = [2, 16], strides = [1, 1]} : vector<2x64xf32> to vector<2x16xf32>
    %24 = arith.negf %23 : vector<2x16xf32>
    %25 = math.exp %24 : vector<2x16xf32>
    %cst_7 = arith.constant 1.000000e+00 : f32
    %26 = vector.broadcast %cst_7 : f32 to vector<2x16xf32>
    %27 = arith.addf %26, %25 : vector<2x16xf32>
    %28 = arith.divf %26, %27 : vector<2x16xf32>
    %29 = arith.mulf %20, %1 : vector<2x16xf32>
    %30 = arith.mulf %14, %22 : vector<2x16xf32>
    %31 = arith.addf %29, %30 : vector<2x16xf32>
    %32 = math.tanh %31 : vector<2x16xf32>
    %33 = arith.mulf %28, %32 : vector<2x16xf32>
    %c1_i32 = arith.constant 1 : i32
    %34 = arith.index_cast %c1_i32 : i32 to index
    %c0_8 = arith.constant 0 : index
    %c0_9 = arith.constant 0 : index
    %35 = vector.load %arg1[%34, %c0_8, %c0_9] : memref<8x2x64xf32, #tpu.memory_space<vmem>>, vector<1x2x64xf32>
    %36 = vector.shape_cast %35 : vector<1x2x64xf32> to vector<2x64xf32>
    %37 = arith.truncf %33 : vector<2x16xf32> to vector<2x16xbf16>
    %c0_10 = arith.constant 0 : index
    %c0_11 = arith.constant 0 : index
    %38 = vector.load %arg2[%c0_10, %c0_11] : memref<16x64xbf16, #tpu.memory_space<vmem>>, vector<16x64xbf16>
    %cst_12 = arith.constant dense<0.000000e+00> : vector<2x64xf32>
    %39 = tpu.matmul %37, %38, %cst_12 {dimension_numbers = #tpu.dot_dimension_numbers<[1], [0], [0], [1], [0, 0, 1, 1], [], []>} : vector<2x16xbf16>, vector<16x64xbf16>, vector<2x64xf32> -> vector<2x64xf32>
    %40 = arith.addf %36, %39 : vector<2x64xf32>
    %41 = vector.extract_strided_slice %40 {offsets = [0, 0], sizes = [2, 16], strides = [1, 1]} : vector<2x64xf32> to vector<2x16xf32>
    %42 = arith.negf %41 : vector<2x16xf32>
    %43 = math.exp %42 : vector<2x16xf32>
    %cst_13 = arith.constant 1.000000e+00 : f32
    %44 = vector.broadcast %cst_13 : f32 to vector<2x16xf32>
    %45 = arith.addf %44, %43 : vector<2x16xf32>
    %46 = arith.divf %44, %45 : vector<2x16xf32>
    %47 = vector.extract_strided_slice %40 {offsets = [0, 16], sizes = [2, 16], strides = [1, 1]} : vector<2x64xf32> to vector<2x16xf32>
    %48 = arith.negf %47 : vector<2x16xf32>
    %49 = math.exp %48 : vector<2x16xf32>
    %cst_14 = arith.constant 1.000000e+00 : f32
    %50 = vector.broadcast %cst_14 : f32 to vector<2x16xf32>
    %51 = arith.addf %50, %49 : vector<2x16xf32>
    %52 = arith.divf %50, %51 : vector<2x16xf32>
    %53 = vector.extract_strided_slice %40 {offsets = [0, 32], sizes = [2, 16], strides = [1, 1]} : vector<2x64xf32> to vector<2x16xf32>
    %54 = math.tanh %53 : vector<2x16xf32>
    %55 = vector.extract_strided_slice %40 {offsets = [0, 48], sizes = [2, 16], strides = [1, 1]} : vector<2x64xf32> to vector<2x16xf32>
    %56 = arith.negf %55 : vector<2x16xf32>
    %57 = math.exp %56 : vector<2x16xf32>
    %cst_15 = arith.constant 1.000000e+00 : f32
    %58 = vector.broadcast %cst_15 : f32 to vector<2x16xf32>
    %59 = arith.addf %58, %57 : vector<2x16xf32>
    %60 = arith.divf %58, %59 : vector<2x16xf32>
    %61 = arith.mulf %52, %31 : vector<2x16xf32>
    %62 = arith.mulf %46, %54 : vector<2x16xf32>
    %63 = arith.addf %61, %62 : vector<2x16xf32>
    %64 = math.tanh %63 : vector<2x16xf32>
    %65 = arith.mulf %60, %64 : vector<2x16xf32>
    %c2_i32 = arith.constant 2 : i32
    %66 = arith.index_cast %c2_i32 : i32 to index
    %c0_16 = arith.constant 0 : index
    %c0_17 = arith.constant 0 : index
    %67 = vector.load %arg1[%66, %c0_16, %c0_17] : memref<8x2x64xf32, #tpu.memory_space<vmem>>, vector<1x2x64xf32>
    %68 = vector.shape_cast %67 : vector<1x2x64xf32> to vector<2x64xf32>
    %69 = arith.truncf %65 : vector<2x16xf32> to vector<2x16xbf16>
    %c0_18 = arith.constant 0 : index
    %c0_19 = arith.constant 0 : index
    %70 = vector.load %arg2[%c0_18, %c0_19] : memref<16x64xbf16, #tpu.memory_space<vmem>>, vector<16x64xbf16>
    %cst_20 = arith.constant dense<0.000000e+00> : vector<2x64xf32>
    %71 = tpu.matmul %69, %70, %cst_20 {dimension_numbers = #tpu.dot_dimension_numbers<[1], [0], [0], [1], [0, 0, 1, 1], [], []>} : vector<2x16xbf16>, vector<16x64xbf16>, vector<2x64xf32> -> vector<2x64xf32>
    %72 = arith.addf %68, %71 : vector<2x64xf32>
    %73 = vector.extract_strided_slice %72 {offsets = [0, 0], sizes = [2, 16], strides = [1, 1]} : vector<2x64xf32> to vector<2x16xf32>
    %74 = arith.negf %73 : vector<2x16xf32>
    %75 = math.exp %74 : vector<2x16xf32>
    %cst_21 = arith.constant 1.000000e+00 : f32
    %76 = vector.broadcast %cst_21 : f32 to vector<2x16xf32>
    %77 = arith.addf %76, %75 : vector<2x16xf32>
    %78 = arith.divf %76, %77 : vector<2x16xf32>
    %79 = vector.extract_strided_slice %72 {offsets = [0, 16], sizes = [2, 16], strides = [1, 1]} : vector<2x64xf32> to vector<2x16xf32>
    %80 = arith.negf %79 : vector<2x16xf32>
    %81 = math.exp %80 : vector<2x16xf32>
    %cst_22 = arith.constant 1.000000e+00 : f32
    %82 = vector.broadcast %cst_22 : f32 to vector<2x16xf32>
    %83 = arith.addf %82, %81 : vector<2x16xf32>
    %84 = arith.divf %82, %83 : vector<2x16xf32>
    %85 = vector.extract_strided_slice %72 {offsets = [0, 32], sizes = [2, 16], strides = [1, 1]} : vector<2x64xf32> to vector<2x16xf32>
    %86 = math.tanh %85 : vector<2x16xf32>
    %87 = vector.extract_strided_slice %72 {offsets = [0, 48], sizes = [2, 16], strides = [1, 1]} : vector<2x64xf32> to vector<2x16xf32>
    %88 = arith.negf %87 : vector<2x16xf32>
    %89 = math.exp %88 : vector<2x16xf32>
    %cst_23 = arith.constant 1.000000e+00 : f32
    %90 = vector.broadcast %cst_23 : f32 to vector<2x16xf32>
    %91 = arith.addf %90, %89 : vector<2x16xf32>
    %92 = arith.divf %90, %91 : vector<2x16xf32>
    %93 = arith.mulf %84, %63 : vector<2x16xf32>
    %94 = arith.mulf %78, %86 : vector<2x16xf32>
    %95 = arith.addf %93, %94 : vector<2x16xf32>
    %96 = math.tanh %95 : vector<2x16xf32>
    %97 = arith.mulf %92, %96 : vector<2x16xf32>
    %c3_i32 = arith.constant 3 : i32
    %98 = arith.index_cast %c3_i32 : i32 to index
    %c0_24 = arith.constant 0 : index
    %c0_25 = arith.constant 0 : index
    %99 = vector.load %arg1[%98, %c0_24, %c0_25] : memref<8x2x64xf32, #tpu.memory_space<vmem>>, vector<1x2x64xf32>
    %100 = vector.shape_cast %99 : vector<1x2x64xf32> to vector<2x64xf32>
    %101 = arith.truncf %97 : vector<2x16xf32> to vector<2x16xbf16>
    %c0_26 = arith.constant 0 : index
    %c0_27 = arith.constant 0 : index
    %102 = vector.load %arg2[%c0_26, %c0_27] : memref<16x64xbf16, #tpu.memory_space<vmem>>, vector<16x64xbf16>
    %cst_28 = arith.constant dense<0.000000e+00> : vector<2x64xf32>
    %103 = tpu.matmul %101, %102, %cst_28 {dimension_numbers = #tpu.dot_dimension_numbers<[1], [0], [0], [1], [0, 0, 1, 1], [], []>} : vector<2x16xbf16>, vector<16x64xbf16>, vector<2x64xf32> -> vector<2x64xf32>
    %104 = arith.addf %100, %103 : vector<2x64xf32>
    %105 = vector.extract_strided_slice %104 {offsets = [0, 0], sizes = [2, 16], strides = [1, 1]} : vector<2x64xf32> to vector<2x16xf32>
    %106 = arith.negf %105 : vector<2x16xf32>
    %107 = math.exp %106 : vector<2x16xf32>
    %cst_29 = arith.constant 1.000000e+00 : f32
    %108 = vector.broadcast %cst_29 : f32 to vector<2x16xf32>
    %109 = arith.addf %108, %107 : vector<2x16xf32>
    %110 = arith.divf %108, %109 : vector<2x16xf32>
    %111 = vector.extract_strided_slice %104 {offsets = [0, 16], sizes = [2, 16], strides = [1, 1]} : vector<2x64xf32> to vector<2x16xf32>
    %112 = arith.negf %111 : vector<2x16xf32>
    %113 = math.exp %112 : vector<2x16xf32>
    %cst_30 = arith.constant 1.000000e+00 : f32
    %114 = vector.broadcast %cst_30 : f32 to vector<2x16xf32>
    %115 = arith.addf %114, %113 : vector<2x16xf32>
    %116 = arith.divf %114, %115 : vector<2x16xf32>
    %117 = vector.extract_strided_slice %104 {offsets = [0, 32], sizes = [2, 16], strides = [1, 1]} : vector<2x64xf32> to vector<2x16xf32>
    %118 = math.tanh %117 : vector<2x16xf32>
    %119 = vector.extract_strided_slice %104 {offsets = [0, 48], sizes = [2, 16], strides = [1, 1]} : vector<2x64xf32> to vector<2x16xf32>
    %120 = arith.negf %119 : vector<2x16xf32>
    %121 = math.exp %120 : vector<2x16xf32>
    %cst_31 = arith.constant 1.000000e+00 : f32
    %122 = vector.broadcast %cst_31 : f32 to vector<2x16xf32>
    %123 = arith.addf %122, %121 : vector<2x16xf32>
    %124 = arith.divf %122, %123 : vector<2x16xf32>
    %125 = arith.mulf %116, %95 : vector<2x16xf32>
    %126 = arith.mulf %110, %118 : vector<2x16xf32>
    %127 = arith.addf %125, %126 : vector<2x16xf32>
    %128 = math.tanh %127 : vector<2x16xf32>
    %129 = arith.mulf %124, %128 : vector<2x16xf32>
    %c4_i32 = arith.constant 4 : i32
    %130 = arith.index_cast %c4_i32 : i32 to index
    %c0_32 = arith.constant 0 : index
    %c0_33 = arith.constant 0 : index
    %131 = vector.load %arg1[%130, %c0_32, %c0_33] : memref<8x2x64xf32, #tpu.memory_space<vmem>>, vector<1x2x64xf32>
    %132 = vector.shape_cast %131 : vector<1x2x64xf32> to vector<2x64xf32>
    %133 = arith.truncf %129 : vector<2x16xf32> to vector<2x16xbf16>
    %c0_34 = arith.constant 0 : index
    %c0_35 = arith.constant 0 : index
    %134 = vector.load %arg2[%c0_34, %c0_35] : memref<16x64xbf16, #tpu.memory_space<vmem>>, vector<16x64xbf16>
    %cst_36 = arith.constant dense<0.000000e+00> : vector<2x64xf32>
    %135 = tpu.matmul %133, %134, %cst_36 {dimension_numbers = #tpu.dot_dimension_numbers<[1], [0], [0], [1], [0, 0, 1, 1], [], []>} : vector<2x16xbf16>, vector<16x64xbf16>, vector<2x64xf32> -> vector<2x64xf32>
    %136 = arith.addf %132, %135 : vector<2x64xf32>
    %137 = vector.extract_strided_slice %136 {offsets = [0, 0], sizes = [2, 16], strides = [1, 1]} : vector<2x64xf32> to vector<2x16xf32>
    %138 = arith.negf %137 : vector<2x16xf32>
    %139 = math.exp %138 : vector<2x16xf32>
    %cst_37 = arith.constant 1.000000e+00 : f32
    %140 = vector.broadcast %cst_37 : f32 to vector<2x16xf32>
    %141 = arith.addf %140, %139 : vector<2x16xf32>
    %142 = arith.divf %140, %141 : vector<2x16xf32>
    %143 = vector.extract_strided_slice %136 {offsets = [0, 16], sizes = [2, 16], strides = [1, 1]} : vector<2x64xf32> to vector<2x16xf32>
    %144 = arith.negf %143 : vector<2x16xf32>
    %145 = math.exp %144 : vector<2x16xf32>
    %cst_38 = arith.constant 1.000000e+00 : f32
    %146 = vector.broadcast %cst_38 : f32 to vector<2x16xf32>
    %147 = arith.addf %146, %145 : vector<2x16xf32>
    %148 = arith.divf %146, %147 : vector<2x16xf32>
    %149 = vector.extract_strided_slice %136 {offsets = [0, 32], sizes = [2, 16], strides = [1, 1]} : vector<2x64xf32> to vector<2x16xf32>
    %150 = math.tanh %149 : vector<2x16xf32>
    %151 = vector.extract_strided_slice %136 {offsets = [0, 48], sizes = [2, 16], strides = [1, 1]} : vector<2x64xf32> to vector<2x16xf32>
    %152 = arith.negf %151 : vector<2x16xf32>
    %153 = math.exp %152 : vector<2x16xf32>
    %cst_39 = arith.constant 1.000000e+00 : f32
    %154 = vector.broadcast %cst_39 : f32 to vector<2x16xf32>
    %155 = arith.addf %154, %153 : vector<2x16xf32>
    %156 = arith.divf %154, %155 : vector<2x16xf32>
    %157 = arith.mulf %148, %127 : vector<2x16xf32>
    %158 = arith.mulf %142, %150 : vector<2x16xf32>
    %159 = arith.addf %157, %158 : vector<2x16xf32>
    %160 = math.tanh %159 : vector<2x16xf32>
    %161 = arith.mulf %156, %160 : vector<2x16xf32>
    %c5_i32 = arith.constant 5 : i32
    %162 = arith.index_cast %c5_i32 : i32 to index
    %c0_40 = arith.constant 0 : index
    %c0_41 = arith.constant 0 : index
    %163 = vector.load %arg1[%162, %c0_40, %c0_41] : memref<8x2x64xf32, #tpu.memory_space<vmem>>, vector<1x2x64xf32>
    %164 = vector.shape_cast %163 : vector<1x2x64xf32> to vector<2x64xf32>
    %165 = arith.truncf %161 : vector<2x16xf32> to vector<2x16xbf16>
    %c0_42 = arith.constant 0 : index
    %c0_43 = arith.constant 0 : index
    %166 = vector.load %arg2[%c0_42, %c0_43] : memref<16x64xbf16, #tpu.memory_space<vmem>>, vector<16x64xbf16>
    %cst_44 = arith.constant dense<0.000000e+00> : vector<2x64xf32>
    %167 = tpu.matmul %165, %166, %cst_44 {dimension_numbers = #tpu.dot_dimension_numbers<[1], [0], [0], [1], [0, 0, 1, 1], [], []>} : vector<2x16xbf16>, vector<16x64xbf16>, vector<2x64xf32> -> vector<2x64xf32>
    %168 = arith.addf %164, %167 : vector<2x64xf32>
    %169 = vector.extract_strided_slice %168 {offsets = [0, 0], sizes = [2, 16], strides = [1, 1]} : vector<2x64xf32> to vector<2x16xf32>
    %170 = arith.negf %169 : vector<2x16xf32>
    %171 = math.exp %170 : vector<2x16xf32>
    %cst_45 = arith.constant 1.000000e+00 : f32
    %172 = vector.broadcast %cst_45 : f32 to vector<2x16xf32>
    %173 = arith.addf %172, %171 : vector<2x16xf32>
    %174 = arith.divf %172, %173 : vector<2x16xf32>
    %175 = vector.extract_strided_slice %168 {offsets = [0, 16], sizes = [2, 16], strides = [1, 1]} : vector<2x64xf32> to vector<2x16xf32>
    %176 = arith.negf %175 : vector<2x16xf32>
    %177 = math.exp %176 : vector<2x16xf32>
    %cst_46 = arith.constant 1.000000e+00 : f32
    %178 = vector.broadcast %cst_46 : f32 to vector<2x16xf32>
    %179 = arith.addf %178, %177 : vector<2x16xf32>
    %180 = arith.divf %178, %179 : vector<2x16xf32>
    %181 = vector.extract_strided_slice %168 {offsets = [0, 32], sizes = [2, 16], strides = [1, 1]} : vector<2x64xf32> to vector<2x16xf32>
    %182 = math.tanh %181 : vector<2x16xf32>
    %183 = vector.extract_strided_slice %168 {offsets = [0, 48], sizes = [2, 16], strides = [1, 1]} : vector<2x64xf32> to vector<2x16xf32>
    %184 = arith.negf %183 : vector<2x16xf32>
    %185 = math.exp %184 : vector<2x16xf32>
    %cst_47 = arith.constant 1.000000e+00 : f32
    %186 = vector.broadcast %cst_47 : f32 to vector<2x16xf32>
    %187 = arith.addf %186, %185 : vector<2x16xf32>
    %188 = arith.divf %186, %187 : vector<2x16xf32>
    %189 = arith.mulf %180, %159 : vector<2x16xf32>
    %190 = arith.mulf %174, %182 : vector<2x16xf32>
    %191 = arith.addf %189, %190 : vector<2x16xf32>
    %192 = math.tanh %191 : vector<2x16xf32>
    %193 = arith.mulf %188, %192 : vector<2x16xf32>
    %c6_i32 = arith.constant 6 : i32
    %194 = arith.index_cast %c6_i32 : i32 to index
    %c0_48 = arith.constant 0 : index
    %c0_49 = arith.constant 0 : index
    %195 = vector.load %arg1[%194, %c0_48, %c0_49] : memref<8x2x64xf32, #tpu.memory_space<vmem>>, vector<1x2x64xf32>
    %196 = vector.shape_cast %195 : vector<1x2x64xf32> to vector<2x64xf32>
    %197 = arith.truncf %193 : vector<2x16xf32> to vector<2x16xbf16>
    %c0_50 = arith.constant 0 : index
    %c0_51 = arith.constant 0 : index
    %198 = vector.load %arg2[%c0_50, %c0_51] : memref<16x64xbf16, #tpu.memory_space<vmem>>, vector<16x64xbf16>
    %cst_52 = arith.constant dense<0.000000e+00> : vector<2x64xf32>
    %199 = tpu.matmul %197, %198, %cst_52 {dimension_numbers = #tpu.dot_dimension_numbers<[1], [0], [0], [1], [0, 0, 1, 1], [], []>} : vector<2x16xbf16>, vector<16x64xbf16>, vector<2x64xf32> -> vector<2x64xf32>
    %200 = arith.addf %196, %199 : vector<2x64xf32>
    %201 = vector.extract_strided_slice %200 {offsets = [0, 0], sizes = [2, 16], strides = [1, 1]} : vector<2x64xf32> to vector<2x16xf32>
    %202 = arith.negf %201 : vector<2x16xf32>
    %203 = math.exp %202 : vector<2x16xf32>
    %cst_53 = arith.constant 1.000000e+00 : f32
    %204 = vector.broadcast %cst_53 : f32 to vector<2x16xf32>
    %205 = arith.addf %204, %203 : vector<2x16xf32>
    %206 = arith.divf %204, %205 : vector<2x16xf32>
    %207 = vector.extract_strided_slice %200 {offsets = [0, 16], sizes = [2, 16], strides = [1, 1]} : vector<2x64xf32> to vector<2x16xf32>
    %208 = arith.negf %207 : vector<2x16xf32>
    %209 = math.exp %208 : vector<2x16xf32>
    %cst_54 = arith.constant 1.000000e+00 : f32
    %210 = vector.broadcast %cst_54 : f32 to vector<2x16xf32>
    %211 = arith.addf %210, %209 : vector<2x16xf32>
    %212 = arith.divf %210, %211 : vector<2x16xf32>
    %213 = vector.extract_strided_slice %200 {offsets = [0, 32], sizes = [2, 16], strides = [1, 1]} : vector<2x64xf32> to vector<2x16xf32>
    %214 = math.tanh %213 : vector<2x16xf32>
    %215 = vector.extract_strided_slice %200 {offsets = [0, 48], sizes = [2, 16], strides = [1, 1]} : vector<2x64xf32> to vector<2x16xf32>
    %216 = arith.negf %215 : vector<2x16xf32>
    %217 = math.exp %216 : vector<2x16xf32>
    %cst_55 = arith.constant 1.000000e+00 : f32
    %218 = vector.broadcast %cst_55 : f32 to vector<2x16xf32>
    %219 = arith.addf %218, %217 : vector<2x16xf32>
    %220 = arith.divf %218, %219 : vector<2x16xf32>
    %221 = arith.mulf %212, %191 : vector<2x16xf32>
    %222 = arith.mulf %206, %214 : vector<2x16xf32>
    %223 = arith.addf %221, %222 : vector<2x16xf32>
    %224 = math.tanh %223 : vector<2x16xf32>
    %225 = arith.mulf %220, %224 : vector<2x16xf32>
    %c7_i32 = arith.constant 7 : i32
    %226 = arith.index_cast %c7_i32 : i32 to index
    %c0_56 = arith.constant 0 : index
    %c0_57 = arith.constant 0 : index
    %227 = vector.load %arg1[%226, %c0_56, %c0_57] : memref<8x2x64xf32, #tpu.memory_space<vmem>>, vector<1x2x64xf32>
    %228 = vector.shape_cast %227 : vector<1x2x64xf32> to vector<2x64xf32>
    %229 = arith.truncf %225 : vector<2x16xf32> to vector<2x16xbf16>
    %c0_58 = arith.constant 0 : index
    %c0_59 = arith.constant 0 : index
    %230 = vector.load %arg2[%c0_58, %c0_59] : memref<16x64xbf16, #tpu.memory_space<vmem>>, vector<16x64xbf16>
    %cst_60 = arith.constant dense<0.000000e+00> : vector<2x64xf32>
    %231 = tpu.matmul %229, %230, %cst_60 {dimension_numbers = #tpu.dot_dimension_numbers<[1], [0], [0], [1], [0, 0, 1, 1], [], []>} : vector<2x16xbf16>, vector<16x64xbf16>, vector<2x64xf32> -> vector<2x64xf32>
    %232 = arith.addf %228, %231 : vector<2x64xf32>
    %233 = vector.extract_strided_slice %232 {offsets = [0, 0], sizes = [2, 16], strides = [1, 1]} : vector<2x64xf32> to vector<2x16xf32>
    %234 = arith.negf %233 : vector<2x16xf32>
    %235 = math.exp %234 : vector<2x16xf32>
    %cst_61 = arith.constant 1.000000e+00 : f32
    %236 = vector.broadcast %cst_61 : f32 to vector<2x16xf32>
    %237 = arith.addf %236, %235 : vector<2x16xf32>
    %238 = arith.divf %236, %237 : vector<2x16xf32>
    %239 = vector.extract_strided_slice %232 {offsets = [0, 16], sizes = [2, 16], strides = [1, 1]} : vector<2x64xf32> to vector<2x16xf32>
    %240 = arith.negf %239 : vector<2x16xf32>
    %241 = math.exp %240 : vector<2x16xf32>
    %cst_62 = arith.constant 1.000000e+00 : f32
    %242 = vector.broadcast %cst_62 : f32 to vector<2x16xf32>
    %243 = arith.addf %242, %241 : vector<2x16xf32>
    %244 = arith.divf %242, %243 : vector<2x16xf32>
    %245 = vector.extract_strided_slice %232 {offsets = [0, 32], sizes = [2, 16], strides = [1, 1]} : vector<2x64xf32> to vector<2x16xf32>
    %246 = math.tanh %245 : vector<2x16xf32>
    %247 = vector.extract_strided_slice %232 {offsets = [0, 48], sizes = [2, 16], strides = [1, 1]} : vector<2x64xf32> to vector<2x16xf32>
    %248 = arith.negf %247 : vector<2x16xf32>
    %249 = math.exp %248 : vector<2x16xf32>
    %cst_63 = arith.constant 1.000000e+00 : f32
    %250 = vector.broadcast %cst_63 : f32 to vector<2x16xf32>
    %251 = arith.addf %250, %249 : vector<2x16xf32>
    %252 = arith.divf %250, %251 : vector<2x16xf32>
    %253 = arith.mulf %244, %223 : vector<2x16xf32>
    %254 = arith.mulf %238, %246 : vector<2x16xf32>
    %255 = arith.addf %253, %254 : vector<2x16xf32>
    %256 = math.tanh %255 : vector<2x16xf32>
    %257 = arith.mulf %252, %256 : vector<2x16xf32>
    %c8_i32 = arith.constant 8 : i32
    %c0_64 = arith.constant 0 : index
    %c0_65 = arith.constant 0 : index
    %258 = vector.load %arg5[%c0_64, %c0_65] : memref<2x16xf32, #tpu.memory_space<vmem>>, vector<2x16xf32>
    tpu.vector_store %arg5[%c0_64, %c0_65], %257 {strides = array<i32>} : memref<2x16xf32, #tpu.memory_space<vmem>>, vector<2x16xf32>,
    %259 = arith.truncf %257 : vector<2x16xf32> to vector<2x16xbf16>
    %c0_66 = arith.constant 0 : index
    %c0_67 = arith.constant 0 : index
    %260 = vector.load %arg3[%c0_66, %c0_67] : memref<16x8xbf16, #tpu.memory_space<vmem>>, vector<16x8xbf16>
    %cst_68 = arith.constant dense<0.000000e+00> : vector<2x8xf32>
    %261 = tpu.matmul %259, %260, %cst_68 {dimension_numbers = #tpu.dot_dimension_numbers<[1], [0], [0], [1], [0, 0, 1, 1], [], []>} : vector<2x16xbf16>, vector<16x8xbf16>, vector<2x8xf32> -> vector<2x8xf32>
    %c0_69 = arith.constant 0 : index
    %c0_70 = arith.constant 0 : index
    %262 = vector.load %arg4[%c0_69, %c0_70] : memref<1x8xf32, #tpu.memory_space<vmem>>, vector<1x8xf32>
    %263 = vector.broadcast %262 : vector<1x8xf32> to vector<2x8xf32>
    %264 = arith.addf %261, %263 : vector<2x8xf32>
    %c0_71 = arith.constant 0 : index
    %c0_72 = arith.constant 0 : index
    %265 = vector.load %arg6[%c0_71, %c0_72] : memref<2x8xf32, #tpu.memory_space<vmem>>, vector<2x8xf32>
    tpu.vector_store %arg6[%c0_71, %c0_72], %264 {strides = array<i32>} : memref<2x8xf32, #tpu.memory_space<vmem>>, vector<2x8xf32>,
    return
  }
  func.func @transform_0(%arg0: i32) -> (i32, i32, i32) {
    %c0_i32 = arith.constant 0 : i32
    %c0_i32_0 = arith.constant 0 : i32
    %c0_i32_1 = arith.constant 0 : i32
    %c0_i32_2 = arith.constant 0 : i32
    return %c0_i32, %c0_i32_0, %c0_i32_1 : i32, i32, i32
  }
  func.func @transform_1(%arg0: i32) -> (i32, i32) {
    %c0_i32 = arith.constant 0 : i32
    %c0_i32_0 = arith.constant 0 : i32
    %c0_i32_1 = arith.constant 0 : i32
    return %c0_i32, %c0_i32_0 : i32, i32
  }
  func.func @transform_2(%arg0: i32) -> (i32, i32) {
    %c0_i32 = arith.constant 0 : i32
    %c0_i32_0 = arith.constant 0 : i32
    %c0_i32_1 = arith.constant 0 : i32
    return %c0_i32, %c0_i32_0 : i32, i32
  }
  func.func @transform_3(%arg0: i32) -> (i32, i32) {
    %c0_i32 = arith.constant 0 : i32
    %c0_i32_0 = arith.constant 0 : i32
    %c0_i32_1 = arith.constant 0 : i32
    return %c0_i32, %c0_i32_0 : i32, i32
  }
  func.func @transform_4(%arg0: i32) -> (i32, i32) {
    %c0_i32 = arith.constant 0 : i32
    %c0_i32_0 = arith.constant 0 : i32
    %c0_i32_1 = arith.constant 0 : i32
    return %c0_i32, %c0_i32_0 : i32, i32
  }
  func.func @transform_5(%arg0: i32) -> (i32, i32) {
    %c0_i32 = arith.constant 0 : i32
    %c0_i32_0 = arith.constant 0 : i32
    %c0_i32_1 = arith.constant 0 : i32
    return %c0_i32, %c0_i32_0 : i32, i32
  }
}

</mosaic_0001>

<bundles_post_ra>
// kernel: visbert_forward.20
= control target key start
LH: loop header
LB: loop body
LE: loop exit
PB: predicated region body
PF: predicated region fallthrough
CT: control target
= control target key end

     0   :  { %v130_v0 = vmov 0.0   ;;  %vm131_vm0 = vmmov 0   ;;  %vm45_vm1 = vcmask 261120   ;;  %vm98_vm2 = vcmask 257024   ;;  %s170_s1 = inlined_call_operand.vmem [shape: bf16[32,32], index: 1, kind: input, shape index: {}]   ;;  %s171_s0 = inlined_call_operand.vmem [shape: bf16[16,32], index: 0, kind: input, shape index: {}]   ;;  %s172_s2 = inlined_call_operand.vmem [shape: f32[1,32], index: 2, kind: input, shape index: {}]   ;;  %s173_s3 = inlined_call_operand.vmem [shape: bf16[16,32], index: 3, kind: output, shape index: {}]  }
   0x1   :  { %117 = vmatprep.subr.bf16.mxu0 %v130_v0  ;;  %v127_v1 = vld [vmem:[%s170_s1 + $0x8] sm:$0xff]   ;;  %121 = vmatprep.mubr.msk.bf16.mxu0 %vm131_vm0, %v130_v0  ;;  %v128_v2 = vld [vmem:[%s170_s1] sm:$0xff]  }
   0x2   :  { %118 = vmatpush3.bf16.msra.mxu0 %v127_v1  ;;  %v129_v3 = vld [vmem:[%s171_s0] sm:$0xff]  }
   0x3   :  { %119 = vmatprep.subr.bf16.mxu0 %v130_v0  ;;  %v105_v4 = vld [vmem:[%s172_s2] ss:$0 sm:$0xff] }
   0x6   :  { %120 = vmatpush3.bf16.msra.mxu0 %v128_v2 }
   0x9   :  { %122 = vmatmul.mubr.msk.bf16.vlgmr.msra.gmra.mxu0 %vm45_vm1, %v129_v3 }
  0xc9   :  { %v83_v5 = vpop.f32.mrf.mxu0 }
  0xca   :  { %v84_v6 = vadd.f32 %v105_v4, %v83_v5 }
  0xcb   :  { %v123_v7 = vpop.f32.mrf.mxu0 }
  0xcc   :  { %v112_v8 = vpack.c.bf16 %v84_v6, %v84_v6 }
  0xcd   :  { %v86_v9 = vpop.f32.mrf.mxu0 }
  0xce   :  { %99 = vst.msk [vmem:[%s173_s3] sm:$0xf] %vm98_vm2, %v112_v8  ;;  %v87_v10 = vadd.f32 %v105_v4, %v86_v9 }
  0xcf   :  { %v124_v11 = vpop.f32.mrf.mxu0 }
  0xd0   :  { %v113_v12 = vpack.c.bf16 %v87_v10, %v87_v10 }
  0xd2   :  { %100 = vst.msk [vmem:[%s173_s3 + $0x4] sm:$0xf] %vm98_vm2, %v113_v12 }

// kernel: visbert_forward.13
= control target key start
LH: loop header
LB: loop body
LE: loop exit
PB: predicated region body
PF: predicated region fallthrough
CT: control target
= control target key end

     0   :  { %vm27_vm0 = vcmask 261120   ;;  %v201_v14 = vmov 0.0   ;;  %vm202_vm1 = vmmov 0   ;;  %vm79_vm2 = vcmask 257024   ;;  %s276_s0 = inlined_call_operand.vmem [shape: f32[16,32], index: 0, kind: input, shape index: {}]   ;;  %s277_s1 = inlined_call_operand.vmem [shape: bf16[32,96], index: 1, kind: input, shape index: {}]   ;;  %s278_s3 = inlined_call_operand.vmem [shape: f32[1,32], index: 3, kind: input, shape index: {}]   ;;  %s279_s4 = inlined_call_operand.vmem [shape: f32[1,32], index: 4, kind: input, shape index: {}]   ;;  %s280_s6 = inlined_call_operand.vmem [shape: bf16[16,32], index: 6, kind: output, shape index: {1}]   ;;  %s281_s2 = inlined_call_operand.vmem [shape: f32[1,96], index: 2, kind: input, shape index: {}]   ;;  %s282_s5 = inlined_call_operand.vmem [shape: bf16[16,96], index: 5, kind: output, shape index: {0}]  }
   0x1   :  { %v23_v0 = vld [vmem:[%s276_s0] sm:$0xff]  ;;  %v24_v1 = vld [vmem:[%s276_s0 + $0x8] sm:$0xff]  ;;  %185 = vmatprep.subr.bf16.mxu0 %v201_v14  ;;  %189 = vmatprep.mubr.msk.bf16.mxu0 %vm202_vm1, %v201_v14  ;;  %vm157_vm3 = vcmask 781312  }
   0x2   :  { %v28_v2 = vsel %vm27_vm0, %v23_v0, 0.0  ;;  %v31_v3 = vsel %vm27_vm0, %v24_v1, 0.0  ;;  %v195_v15 = vld [vmem:[%s277_s1 + $0x8] sm:$0xff]   ;;  %v196_v16 = vld [vmem:[%s277_s1] sm:$0xff]  }
   0x3   :  { %29 = vadd.xlane.f32.xlu0 %v28_v2  ;;  %186 = vmatpush3.bf16.msra.mxu0 %v195_v15  ;;  %v168_v24 = vld [vmem:[%s278_s3] ss:$0 sm:$0xff] }
   0x4   :  { %187 = vmatprep.subr.bf16.mxu0 %v201_v14  ;;  %v169_v26 = vld [vmem:[%s279_s4] ss:$0 sm:$0xff] }
   0x5   :  { %v172_v36 = vld [vmem:[%s281_s2] ss:$0 sm:$0xff] }
   0x7   :  { %32 = vadd.xlane.f32.xlu0 %v31_v3  ;;  %188 = vmatpush3.bf16.msra.mxu0 %v196_v16 }
  0x8c   :  { %v30_v4 = vpop.xlane.xlu0 %29 }
  0x8d   :  { %v35_v5 = vmul.f32 0.03125, %v30_v4 }
  0x8f   :  { %v37_v6 = vsub.f32 %v23_v0, %v35_v5 }
  0x90   :  { %v33_v7 = vpop.xlane.xlu0 %32 }
  0x91   :  { %v36_v8 = vmul.f32 0.03125, %v33_v7  ;;  %v39_v9 = vmul.f32 %v37_v6, %v37_v6 }
  0x93   :  { %v38_v10 = vsub.f32 %v24_v1, %v36_v8  ;;  %v41_v11 = vsel %vm27_vm0, %v39_v9, 0.0 }
  0x94   :  { %42 = vadd.xlane.f32.xlu1 %v41_v11 }
  0x95   :  { %v40_v12 = vmul.f32 %v38_v10, %v38_v10 }
  0x97   :  { %v44_v13 = vsel %vm27_vm0, %v40_v12, 0.0 }
  0x98   :  { %45 = vadd.xlane.f32.xlu1 %v44_v13 }
 0x11d   :  { %v43_v17 = vpop.xlane.xlu1 %42 }
 0x11e   :  { %v47_v18 = vmul.f32 0.03125, %v43_v17 }
 0x120   :  { %v49_v19 = vadd.f32 1e-12, %v47_v18 }
 0x121   :  { %v46_v20 = vpop.xlane.xlu1 %45 }
 0x122   :  { %197 = vrsqrt.f32 %v49_v19  ;;  %v48_v21 = vmul.f32 0.03125, %v46_v20 }
 0x124   :  { %v50_v22 = vadd.f32 1e-12, %v48_v21 }
 0x126   :  { %199 = vrsqrt.f32 %v50_v22 }
 0x12f   :  { %v198_v23 = vpop.eup %197 }
 0x130   :  { %v53_v25 = vmul.f32 %v198_v23, %v37_v6 }
 0x132   :  { %v61_v27 = vmul.f32 %v168_v24, %v53_v25 }
 0x133   :  { %v200_v28 = vpop.eup %199 }
 0x134   :  { %v54_v29 = vmul.f32 %v200_v28, %v38_v10  ;;  %v69_v30 = vadd.f32 %v169_v26, %v61_v27 }
 0x136   :  { %v62_v31 = vmul.f32 %v168_v24, %v54_v29  ;;  %v178_v32 = vpack.c.bf16 %v69_v30, %v69_v30 }
 0x138   :  { %v70_v33 = vadd.f32 %v169_v26, %v62_v31  ;;  %80 = vst.msk [vmem:[%s280_s6] sm:$0xf] %vm79_vm2, %v178_v32 }
 0x13a   :  { %v71_v34 = vpack.c.bf16 %v70_v33, %v69_v30  ;;  %v179_v35 = vpack.c.bf16 %v70_v33, %v70_v33 }
 0x13c   :  { %81 = vst.msk [vmem:[%s280_s6 + $0x4] sm:$0xf] %vm79_vm2, %v179_v35  ;;  %190 = vmatmul.mubr.msk.bf16.vlgmr.msra.gmra.mxu0 %vm27_vm0, %v71_v34 }
 0x1fc   :  { %v142_v37 = vpop.f32.mrf.mxu0 }
 0x1fd   :  { %v143_v38 = vadd.f32 %v172_v36, %v142_v37 }
 0x1fe   :  { %v191_v39 = vpop.f32.mrf.mxu0 }
 0x1ff   :  { %v180_v40 = vpack.c.bf16 %v143_v38, %v143_v38 }
 0x200   :  { %v145_v41 = vpop.f32.mrf.mxu0 }
 0x201   :  { %158 = vst.msk [vmem:[%s282_s5] sm:$0xf] %vm157_vm3, %v180_v40  ;;  %v146_v42 = vadd.f32 %v172_v36, %v145_v41 }
 0x202   :  { %v192_v43 = vpop.f32.mrf.mxu0 }
 0x203   :  { %v181_v44 = vpack.c.bf16 %v146_v42, %v146_v42 }
 0x205   :  { %159 = vst.msk [vmem:[%s282_s5 + $0x4] sm:$0xf] %vm157_vm3, %v181_v44 }

// kernel: visbert_forward.15
= control target key start
LH: loop header
LB: loop body
LE: loop exit
PB: predicated region body
PF: predicated region fallthrough
CT: control target
= control target key end

     0   :  { %v332_v0 = vmov 0.0   ;;  %vm333_vm0 = vmmov 0   ;;  %vm57_vm1 = vcmask 261120   ;;  %vm160_vm2 = vcmask 523264   ;;  %s418_s1 = inlined_call_operand.vmem [shape: bf16[32,64], index: 1, kind: input, shape index: {}]   ;;  %s419_s0 = inlined_call_operand.vmem [shape: bf16[16,32], index: 0, kind: input, shape index: {}]   ;;  %s420_s3 = inlined_call_operand.vmem [shape: bf16[64,32], index: 3, kind: input, shape index: {}]   ;;  %s421_s2 = inlined_call_operand.vmem [shape: f32[1,64], index: 2, kind: input, shape index: {}]   ;;  %s422_s4 = inlined_call_operand.vmem [shape: f32[1,32], index: 4, kind: input, shape index: {}]   ;;  %s423_s5 = inlined_call_operand.vmem [shape: f32[1,32], index: 5, kind: input, shape index: {}]   ;;  %s424_s6 = inlined_call_operand.vmem [shape: f32[1,32], index: 6, kind: input, shape index: {}]   ;;  %s425_s7 = inlined_call_operand.vmem [shape: bf16[16,32], index: 7, kind: output, shape index: {}]  }
   0x1   :  { %294 = vmatprep.subr.bf16.mxu0 %v332_v0  ;;  %v316_v1 = vld [vmem:[%s418_s1 + $0x8] sm:$0xff]   ;;  %298 = vmatprep.mubr.msk.bf16.mxu0 %vm333_vm0, %v332_v0  ;;  %v317_v2 = vld [vmem:[%s418_s1] sm:$0xff]   ;;  %v319_v4 = vld [vmem:[%s420_s3 + $0x18] sm:$0xff]   ;;  %vm262_vm3 = vcmask 257024  }
   0x2   :  { %302 = vmatprep.subr.bf16.mxu1 %v332_v0  ;;  %310 = vmatprep.mubr.msk.bf16.mxu1 %vm333_vm0, %v332_v0  ;;  %v27_v3 = vld [vmem:[%s419_s0] sm:$0xff]   ;;  %v320_v5 = vld [vmem:[%s420_s3 + $0x10] sm:$0xff]   ;;  %v321_v6 = vld [vmem:[%s420_s3 + $0x8] sm:$0xff]  }
   0x3   :  { %295 = vmatpush3.bf16.msra.mxu0 %v316_v1  ;;  %303 = vmatpush3.bf16.msra.mxu1 %v319_v4  ;;  %v322_v7 = vld [vmem:[%s420_s3] sm:$0xff]   ;;  %v205_v35 = vunpack.c.l.bf16 %v27_v3  ;;  %v206_v40 = vunpack.c.h.bf16 %v27_v3 }
   0x4   :  { %296 = vmatprep.subr.bf16.mxu0 %v332_v0  ;;  %304 = vmatprep.subr.bf16.mxu1 %v332_v0  ;;  %v269_v8 = vld [vmem:[%s421_s2] ss:$0 sm:$0xff] }
   0x5   :  { %v274_v34 = vld [vmem:[%s422_s4] ss:$0 sm:$0xff] }
   0x7   :  { %297 = vmatpush3.bf16.msra.mxu0 %v317_v2  ;;  %305 = vmatpush3.bf16.msra.mxu1 %v320_v5  ;;  %v281_v2 = vld [vmem:[%s424_s6] ss:$0 sm:$0xff] }
   0x8   :  { %306 = vmatprep.subr.bf16.mxu1 %v332_v0 }
   0xa   :  { %299 = vmatmul.mubr.msk.bf16.vlgmr.msra.gmra.mxu0 %vm57_vm1, %v27_v3 }
   0xb   :  { %307 = vmatpush3.bf16.msra.mxu1 %v321_v6 }
   0xc   :  { %308 = vmatprep.subr.bf16.mxu1 %v332_v0  ;;  %v280_v0 = vld [vmem:[%s423_s5] ss:$0 sm:$0xff] }
   0xf   :  { %309 = vmatpush3.bf16.msra.mxu1 %v322_v7 }
  0xca   :  { %v95_v9 = vpop.f32.mrf.mxu0 }
  0xcb   :  { %v96_v10 = vadd.f32 %v269_v8, %v95_v9 }
  0xcc   :  { %v300_v11 = vpop.f32.mrf.mxu0 }
  0xcd   :  { %v102_v12 = vmul.f32 %v96_v10, %v96_v10 }
  0xce   :  { %v98_v13 = vpop.f32.mrf.mxu0 }
  0xcf   :  { %v104_v14 = vmul.f32 %v102_v12, %v96_v10  ;;  %v99_v15 = vadd.f32 %v269_v8, %v98_v13 }
  0xd0   :  { %v301_v16 = vpop.f32.mrf.mxu0 }
  0xd1   :  { %v106_v17 = vmul.f32 0.044715, %v104_v14  ;;  %v103_v18 = vmul.f32 %v99_v15, %v99_v15 }
  0xd3   :  { %v108_v19 = vadd.f32 %v106_v17, %v96_v10  ;;  %v105_v20 = vmul.f32 %v103_v18, %v99_v15 }
  0xd5   :  { %v110_v21 = vmul.f32 0.7978846, %v108_v19  ;;  %v107_v22 = vmul.f32 0.044715, %v105_v20 }
  0xd7   :  { %324 = vtanh.f32 %v110_v21  ;;  %v109_v23 = vadd.f32 %v107_v22, %v99_v15 }
  0xd9   :  { %v111_v24 = vmul.f32 0.7978846, %v109_v23 }
  0xdb   :  { %326 = vtanh.f32 %v111_v24 }
  0xe4   :  { %v325_v25 = vpop.eup %324 }
  0xe5   :  { %v114_v26 = vadd.f32 1.0, %v325_v25 }
  0xe7   :  { %v116_v28 = vmul.f32 0.5, %v114_v26 }
  0xe8   :  { %v327_v27 = vpop.eup %326 }
  0xe9   :  { %v115_v29 = vadd.f32 1.0, %v327_v27  ;;  %v118_v31 = vmul.f32 %v116_v28, %v96_v10 }
  0xeb   :  { %v117_v30 = vmul.f32 0.5, %v115_v29 }
  0xed   :  { %v119_v32 = vmul.f32 %v117_v30, %v99_v15 }
  0xef   :  { %v120_v33 = vpack.c.bf16 %v119_v32, %v118_v31 }
  0xf1   :  { %311 = vmatmul.mubr.msk.bf16.vlgmr.msra.gmra.mxu1 %vm160_vm2, %v120_v33 }
 0x1b1   :  { %v198_v36 = vpop.f32.mrf.mxu1 }
 0x1b2   :  { %v199_v37 = vadd.f32 %v274_v34, %v198_v36 }
 0x1b3   :  { %v312_v38 = vpop.f32.mrf.mxu1 }
 0x1b4   :  { %v207_v39 = vadd.f32 %v205_v35, %v199_v37 }
 0x1b5   :  { %v201_v41 = vpop.f32.mrf.mxu1 }
 0x1b6   :  { %v202_v42 = vadd.f32 %v274_v34, %v201_v41  ;;  %v211_v43 = vsel %vm57_vm1, %v207_v39, 0.0 }
 0x1b7   :  { %212 = vadd.xlane.f32.xlu0 %v211_v43  ;;  %v313_v44 = vpop.f32.mrf.mxu1 }
 0x1b8   :  { %v208_v45 = vadd.f32 %v206_v40, %v202_v42 }
 0x1ba   :  { %v214_v46 = vsel %vm57_vm1, %v208_v45, 0.0 }
 0x1bb   :  { %215 = vadd.xlane.f32.xlu0 %v214_v46 }
 0x240   :  { %v213_v47 = vpop.xlane.xlu0 %212 }
 0x241   :  { %v218_v48 = vmul.f32 0.03125, %v213_v47 }
 0x243   :  { %v220_v49 = vsub.f32 %v207_v39, %v218_v48 }
 0x244   :  { %v216_v50 = vpop.xlane.xlu0 %215 }
 0x245   :  { %v219_v51 = vmul.f32 0.03125, %v216_v50  ;;  %v222_v52 = vmul.f32 %v220_v49, %v220_v49 }
 0x247   :  { %v221_v53 = vsub.f32 %v208_v45, %v219_v51  ;;  %v224_v54 = vsel %vm57_vm1, %v222_v52, 0.0 }
 0x248   :  { %225 = vadd.xlane.f32.xlu1 %v224_v54 }
 0x249   :  { %v223_v55 = vmul.f32 %v221_v53, %v221_v53 }
 0x24b   :  { %v227_v56 = vsel %vm57_vm1, %v223_v55, 0.0 }
 0x24c   :  { %228 = vadd.xlane.f32.xlu1 %v227_v56 }
 0x2d1   :  { %v226_v57 = vpop.xlane.xlu1 %225 }
 0x2d2   :  { %v230_v58 = vmul.f32 0.03125, %v226_v57 }
 0x2d4   :  { %v232_v59 = vadd.f32 1e-12, %v230_v58 }
 0x2d5   :  { %v229_v60 = vpop.xlane.xlu1 %228 }
 0x2d6   :  { %328 = vrsqrt.f32 %v232_v59  ;;  %v231_v61 = vmul.f32 0.03125, %v229_v60 }
 0x2d8   :  { %v233_v62 = vadd.f32 1e-12, %v231_v61 }
 0x2da   :  { %330 = vrsqrt.f32 %v233_v62 }
 0x2e3   :  { %v329_v63 = vpop.eup %328 }
 0x2e4   :  { %v236_v1 = vmul.f32 %v329_v63, %v220_v49 }
 0x2e6   :  { %v244_v3 = vmul.f32 %v280_v0, %v236_v1 }
 0x2e7   :  { %v331_v4 = vpop.eup %330 }
 0x2e8   :  { %v252_v5 = vadd.f32 %v281_v2, %v244_v3  ;;  %v237_v6 = vmul.f32 %v331_v4, %v221_v53 }
 0x2ea   :  { %v284_v7 = vpack.c.bf16 %v252_v5, %v252_v5  ;;  %v245_v8 = vmul.f32 %v280_v0, %v237_v6 }
 0x2ec   :  { %263 = vst.msk [vmem:[%s425_s7] sm:$0xf] %vm262_vm3, %v284_v7  ;;  %v253_v9 = vadd.f32 %v281_v2, %v245_v8 }
 0x2ee   :  { %v285_v10 = vpack.c.bf16 %v253_v9, %v253_v9 }
 0x2f0   :  { %264 = vst.msk [vmem:[%s425_s7 + $0x4] sm:$0xf] %vm262_vm3, %v285_v10 }

// kernel: visbert_forward.14
= control target key start
LH: loop header
LB: loop body
LE: loop exit
PB: predicated region body
PF: predicated region fallthrough
CT: control target
= control target key end

     0   :  { %s1170_s24 = smov 0   ;;  %s1291_s0 = inlined_call_operand.vmem [shape: bf16[2,8,96], index: 0, kind: input, shape index: {}]   ;;  %s1292_s1 = inlined_call_operand.vmem [shape: f32[2,1,8], index: 1, kind: input, shape index: {}]   ;;  %s1293_s2 = inlined_call_operand.vmem [shape: bf16[32,32], index: 2, kind: input, shape index: {}]   ;;  %s1294_s3 = inlined_call_operand.vmem [shape: f32[1,32], index: 3, kind: input, shape index: {}]   ;;  %s1295_s4 = inlined_call_operand.vmem [shape: bf16[2,8,32], index: 4, kind: input, shape index: {}]   ;;  %s1296_s5 = inlined_call_operand.vmem [shape: f32[1,32], index: 5, kind: input, shape index: {}]   ;;  %s1297_s6 = inlined_call_operand.vmem [shape: f32[1,32], index: 6, kind: input, shape index: {}]   ;;  %s1298_s7 = inlined_call_operand.vmem [shape: bf16[2,8,32], index: 7, kind: output, shape index: {}]  }
   0x1 LB: > { %s960_s25 = sadd.s32 4294967295, %s1112_s24   ;;  %p964_p0 = scmp.ge.s32.totalorder %s1112_s24, 1  ;;  %s1112_s24 = sphi %s1170_s24, %s17_s24  }
   0x2   : > { %p253_p1 = scmp.lt.s32.totalorder %s1112_s24, 3 }
   0x4   : > { %p254_p2 = pnand %p964_p0, %p253_p1 }
   0x5   : > { %p290_p3 = scmp.lt.s32.totalorder (!%p254_p2), %s960_s25, 1  ;;  %s1116_s30 = smov (!%p254_p2), 96  }
   0x6   : > { %257 = sbr.rel (%p254_p2) target bundleno = 2050 (0x802), region = 48  ;;  %s1117_s8 = smov (!%p254_p2), 64  }
   0x7   : > { %s1118_s9 = smov (!%p254_p2), 88   ;;  %s1119_s13 = smov (!%p254_p2), 72  }
   0x8   : > { %s1120_s14 = smov (!%p254_p2), 120   ;;  %s1121_s15 = smov (!%p254_p2), 80  }
   0x9   : > { %s1122_s16 = smov (!%p254_p2), 112   ;;  %s1123_s17 = smov (!%p254_p2), 104  }
   0xa   : > { %s1124_s18 = smov (!%p254_p2), 56   ;;  %s1125_s19 = smov (!%p254_p2), 48  }
   0xb   : > { %v1114_v0 = vmov 0.0   ;;  %vm1115_vm0 = vmmov 0   ;;  %s1300_s25 = smov (!%p290_p3, %s960_s25), 1  ;;  %vm318_vm1 = vcmask 64512   ;;  %vm390_vm2 = vcmask 1043456   ;;  %s1126_s20 = smov 40  }
   0xc   : > { %1005 = vmatprep.subr.bf16.mxu0 %v1114_v0  ;;  %1007 = vmatprep.mubr.msk.bf16.mxu0 %vm1115_vm0, %v1114_v0  ;;  %s1184_s26 = sshll.u32 %s1300_s25, 2  ;;  %s296_s12 = scalar_lea.vmem %s1292_s1, %s1300_s25  ;;  %vm783_vm3 = vcmask 130048   ;;  %vm785_vm4 = vcmask 195584   ;;  %vm806_vm5 = vcmask 261120   ;;  %vm884_vm6 = vcmask 257024  }
   0xd   : > { %1011 = vmatprep.subr.bf16.mxu1 %v1114_v0  ;;  %1013 = vmatprep.mubr.msk.bf16.mxu1 %vm1115_vm0, %v1114_v0  ;;  %s293_s29 = scalar_lea.vmem %s1291_s0, %s1184_s26  ;;  %v1203_v6 = vld [vmem:[%s296_s12] ss:$0 sm:$0xff]  ;;  %s1127_s21 = smov 8  }
   0xe   : > { %v306_v1 = vld [vmem:[%s293_s29] sm:$0xf]  ;;  %s1128_s28 = smov 16   ;;  %s1129_s29 = smov 24  }
   0xf   : > { %v1190_v2 = vcombine.low %v306_v1, %v306_v1 }
  0x11   : > { %316 = vrot.lane.b32.xlu0 %v1190_v2, %s1116_s30  ;;  %385 = vrot.lane.b32.xlu1 %v1190_v2, %s1117_s8 }
  0x15   : > { %436 = vrot.lane.b32.xlu1 %v1190_v2, %s1118_s9  ;;  %s300_s9 = scalar_lea.vmem %s1295_s4, %s1184_s26 }
  0x83   : > { %v317_v3 = vpop.permute.xlu0 %316  ;;  %v386_v13 = vpop.permute.xlu1 %385 }
  0x84   : > { %v323_v4 = vsel %vm318_vm1, %v317_v3, 0  ;;  %v392_v14 = vsel %vm390_vm2, %v386_v13, 0 }
  0x85   : > { %1006 = vmatpush3.bf16.xpose.msra.mxu0 %v323_v4  ;;  %1012 = vmatpush3.bf16.msra.mxu1 %v392_v14 }
  0x86   : > { %1023 = vmatprep.subr.bf16.mxu0 %v1114_v0  ;;  %1017 = vmatprep.subr.bf16.mxu1 %v1114_v0 }
  0x87   : > { %v437_v20 = vpop.permute.xlu1 %436 }
  0x88   : > { %v442_v26 = vsel %vm318_vm1, %v437_v20, 0 }
  0x8c   : > { %1008 = vmatmul.mubr.msk.bf16.vlgmr.msra.gmra.mxu0 %vm318_vm1, %v306_v1 }
  0x8d   : > { %1025 = vmatprep.mubr.msk.bf16.mxu0 %vm1115_vm0, %v1114_v0 }
 0x14c   : > { %v359_v5 = vpop.f32.mrf.mxu0 }
 0x14d   : > { %v365_v7 = vmul.f32 0.35355338, %v359_v5 }
 0x14e   : > { %v1009_v8 = vpop.f32.mrf.mxu0 }
 0x14f   : > { %v372_v9 = vadd.f32 %v1203_v6, %v365_v7 }
 0x150   : > { %v362_v10 = vpop.f32.mrf.mxu0 }
 0x151   : > { %v373_v11 = vsel %vm318_vm1, %v372_v9, -inf }
 0x152   : > { %374 = vmax.xlane.f32.xlu0 %v373_v11  ;;  %v1010_v12 = vpop.f32.mrf.mxu0 }
 0x168   : > { %660 = vrot.lane.b32.xlu0 %v1190_v2, %s1119_s13 }
 0x1db   : > { %v375_v15 = vpop.xlane.xlu0 %374 }
 0x1dc   : > { %v376_v16 = vsub.f32 %v372_v9, %v375_v15 }
 0x1de   : > { %v377_v17 = vmul.f32 1.442695, %v376_v16 }
 0x1df   : > { %v661_v29 = vpop.permute.xlu0 %660 }
 0x1e0   : > { %1088 = vpow2.f32 %v377_v17  ;;  %v666_v31 = vsel %vm318_vm1, %v661_v29, 0 }
 0x1ed   : > { %v1089_v18 = vpop.eup %1088 }
 0x1ee   : > { %v379_v19 = vsel %vm318_vm1, %v1089_v18, 0.0 }
 0x1ef   : > { %380 = vadd.xlane.f32.xlu1 %v379_v19 }
 0x200   : > { %434 = vrot.lane.b32.xlu1 %v1190_v2, %s1120_s14 }
 0x204   : > { %548 = vrot.lane.b32.xlu1 %v1190_v2, %s1121_s15 }
 0x208   : > { %546 = vrot.lane.b32.xlu1 %v1190_v2, %s1122_s16 }
 0x20c   : > { %658 = vrot.lane.b32.xlu1 %v1190_v2, %s1123_s17 }
 0x278   : > { %v381_v21 = vpop.xlane.xlu1 %380 }
 0x279   : > { %1090 = vrcp.f32 %v381_v21 }
 0x27c   : > { %v435_v24 = vpop.permute.xlu1 %434 }
 0x280   : > { %v549_v27 = vpop.permute.xlu1 %548 }
 0x281   : > { %v554_v28 = vsel %vm318_vm1, %v549_v27, 0 }
 0x284   : > { %v547_v30 = vpop.permute.xlu1 %546 }
 0x286   : > { %v1091_v22 = vpop.eup %1090 }
 0x287   : > { %v383_v23 = vmul.f32 %v1091_v22, %v1089_v18 }
 0x288   : > { %v659_v32 = vpop.permute.xlu1 %658 }
 0x289   : > { %v384_v25 = vpack.c.bf16 %v383_v23, %v383_v23 }
 0x28b   : > { %1014 = vmatmul.mubr.msk.bf16.vlgmr.msra.gmra.mxu1 %vm318_vm1, %v384_v25 }
 0x28c   : > { %1018 = vmatpush3.bf16.xpose.msra.mxu1 %v442_v26  ;;  %1019 = vmatprep.mubr.msk.bf16.mxu1 %vm1115_vm0, %v1114_v0 }
 0x28d   : > { %1029 = vmatprep.subr.bf16.mxu1 %v1114_v0 }
 0x293   : > { %1020 = vmatmul.mubr.msk.bf16.vlgmr.msra.gmra.mxu1 %vm318_vm1, %v435_v24 }
 0x294   : > { %1030 = vmatpush3.bf16.xpose.msra.mxu1 %v554_v28  ;;  %1031 = vmatprep.mubr.msk.bf16.mxu1 %vm1115_vm0, %v1114_v0 }
 0x295   : > { %1041 = vmatprep.subr.bf16.mxu1 %v1114_v0 }
 0x29b   : > { %1032 = vmatmul.mubr.msk.bf16.vlgmr.msra.gmra.mxu1 %vm318_vm1, %v547_v30 }
 0x29c   : > { %1042 = vmatpush3.bf16.xpose.msra.mxu1 %v666_v31  ;;  %1043 = vmatprep.mubr.msk.bf16.mxu1 %vm1115_vm0, %v1114_v0 }
 0x29d   : > { %1053 = vmatprep.subr.bf16.mxu1 %v1114_v0 }
 0x2a3   : > { %1044 = vmatmul.mubr.msk.bf16.vlgmr.msra.gmra.mxu1 %vm318_vm1, %v659_v32  ;;  %v1086_v32 = vld [vmem:[%s1293_s2 + $0x8] sm:$0xff]  }
 0x2a4   : > { %1057 = vmatprep.mubr.msk.bf16.mxu1 %vm1115_vm0, %v1114_v0  ;;  %1054 = vmatpush3.bf16.msra.mxu1 %v1086_v32 }
 0x2a5   : > { %1055 = vmatprep.subr.bf16.mxu1 %v1114_v0 }
 0x34b   : > { %v1233_v33 = vpop.f32.mrf.mxu1 }
 0x34d   : > { %v1015_v34 = vpop.f32.mrf.mxu1 }
 0x34e   : > { %v1087_v34 = vld [vmem:[%s1293_s2] sm:$0xff]  }
 0x34f   : > { %v431_v35 = vpop.f32.mrf.mxu1  ;;  %1056 = vmatpush3.bf16.msra.mxu1 %v1087_v34 }
 0x351   : > { %v1016_v36 = vpop.f32.mrf.mxu1 }
 0x353   : > { %v478_v37 = vpop.f32.mrf.mxu1 }
 0x354   : > { %v484_v38 = vmul.f32 0.35355338, %v478_v37 }
 0x355   : > { %v1021_v39 = vpop.f32.mrf.mxu1 }
 0x356   : > { %v485_v40 = vadd.f32 %v1203_v6, %v484_v38 }
 0x357   : > { %v481_v41 = vpop.f32.mrf.mxu1 }
 0x358   : > { %v486_v42 = vsel %vm318_vm1, %v485_v40, -inf }
 0x359   : > { %487 = vmax.xlane.f32.xlu1 %v486_v42  ;;  %v1022_v43 = vpop.f32.mrf.mxu1 }
 0x35b   : > { %v590_v44 = vpop.f32.mrf.mxu1 }
 0x35c   : > { %v596_v45 = vmul.f32 0.35355338, %v590_v44 }
 0x35d   : > { %v1033_v46 = vpop.f32.mrf.mxu1 }
 0x35e   : > { %v597_v47 = vadd.f32 %v1203_v6, %v596_v45 }
 0x35f   : > { %v593_v48 = vpop.f32.mrf.mxu1 }
 0x360   : > { %v598_v49 = vsel %vm318_vm1, %v597_v47, -inf }
 0x361   : > { %599 = vmax.xlane.f32.xlu0 %v598_v49  ;;  %v1034_v50 = vpop.f32.mrf.mxu1  ;;  %v850_v49 = vld [vmem:[%s300_s9] sm:$0xf] }
 0x362   : > { %v978_v50 = vld [vmem:[%s1294_s3] ss:$0 sm:$0xff] }
 0x363   : > { %v702_v51 = vpop.f32.mrf.mxu1 }
 0x364   : > { %v708_v52 = vmul.f32 0.35355338, %v702_v51  ;;  %v853_v51 = vunpack.c.l.bf16 %v850_v49 }
 0x365   : > { %v1045_v53 = vpop.f32.mrf.mxu1 }
 0x366   : > { %v709_v54 = vadd.f32 %v1203_v6, %v708_v52 }
 0x367   : > { %v705_v55 = vpop.f32.mrf.mxu1 }
 0x368   : > { %v710_v56 = vsel %vm318_vm1, %v709_v54, -inf }
 0x369   : > { %711 = vmax.xlane.f32.xlu1 %v710_v56  ;;  %v1046_v57 = vpop.f32.mrf.mxu1 }
 0x3e2   : > { %v488_v58 = vpop.xlane.xlu1 %487 }
 0x3e3   : > { %v489_v59 = vsub.f32 %v485_v40, %v488_v58 }
 0x3e5   : > { %v490_v60 = vmul.f32 1.442695, %v489_v59 }
 0x3e7   : > { %1092 = vpow2.f32 %v490_v60 }
 0x3ea   : > { %v600_v6 = vpop.xlane.xlu0 %599 }
 0x3eb   : > { %v601_v7 = vsub.f32 %v597_v47, %v600_v6 }
 0x3ed   : > { %v602_v8 = vmul.f32 1.442695, %v601_v7  ;;  %v983_v7 = vld [vmem:[%s1297_s6] ss:$0 sm:$0xff] }
 0x3f2   : > { %v712_v61 = vpop.xlane.xlu1 %711 }
 0x3f3   : > { %v713_v62 = vsub.f32 %v709_v54, %v712_v61 }
 0x3f4   : > { %v1093_v63 = vpop.eup %1092 }
 0x3f5   : > { %v714_v1 = vmul.f32 1.442695, %v713_v62  ;;  %v492_v3 = vsel %vm318_vm1, %v1093_v63, 0.0 }
 0x3f6   : > { %493 = vadd.xlane.f32.xlu1 %v492_v3 }
 0x3f7   : > { %1094 = vpow2.f32 %v714_v1 }
 0x3f8   : > { %1096 = vpow2.f32 %v602_v8 }
 0x404   : > { %v1095_v4 = vpop.eup %1094 }
 0x405   : > { %v716_v5 = vsel %vm318_vm1, %v1095_v4, 0.0  ;;  %v1097_v9 = vpop.eup %1096 }
 0x406   : > { %717 = vadd.xlane.f32.xlu0 %v716_v5  ;;  %v604_v10 = vsel %vm318_vm1, %v1097_v9, 0.0  ;;  %v982_v5 = vld [vmem:[%s1296_s5] ss:$0 sm:$0xff] }
 0x407   : > { %498 = vrot.lane.b32.xlu1 %v1190_v2, %s1124_s18  ;;  %s304_s18 = scalar_lea.vmem %s1298_s7, %s1184_s26 }
 0x41c   : > { %610 = vrot.lane.b32.xlu0 %v1190_v2, %s1125_s19 }
 0x42b   : > { %605 = vadd.xlane.f32.xlu1 %v604_v10 }
 0x43c   : > { %722 = vrot.lane.b32.xlu1 %v1190_v2, %s1126_s20 }
 0x47f   : > { %v494_v11 = vpop.xlane.xlu1 %493 }
 0x480   : > { %1098 = vrcp.f32 %v494_v11 }
 0x483   : > { %v499_v12 = vpop.permute.xlu1 %498 }
 0x484   : > { %v504_v13 = vsel %vm390_vm2, %v499_v12, 0 }
 0x485   : > { %1024 = vmatpush3.bf16.msra.mxu0 %v504_v13 }
 0x486   : > { %1035 = vmatprep.subr.bf16.mxu0 %v1114_v0 }
 0x48d   : > { %v1099_v14 = vpop.eup %1098 }
 0x48e   : > { %v496_v15 = vmul.f32 %v1099_v14, %v1093_v63 }
 0x48f   : > { %v718_v16 = vpop.xlane.xlu0 %717 }
 0x490   : > { %v497_v17 = vpack.c.bf16 %v496_v15, %v496_v15 }
 0x492   : > { %1026 = vmatmul.mubr.msk.bf16.vlgmr.msra.gmra.mxu0 %vm318_vm1, %v497_v17 }
 0x493   : > { %v611_v18 = vpop.permute.xlu0 %610  ;;  %1037 = vmatprep.mubr.msk.bf16.mxu0 %vm1115_vm0, %v1114_v0 }
 0x494   : > { %v616_v2 = vsel %vm390_vm2, %v611_v18, 0 }
 0x495   : > { %1036 = vmatpush3.bf16.msra.mxu0 %v616_v2 }
 0x496   : > { %1047 = vmatprep.subr.bf16.mxu0 %v1114_v0 }
 0x4b4   : > { %v606_v19 = vpop.xlane.xlu1 %605 }
 0x4b5   : > { %1100 = vrcp.f32 %v606_v19 }
 0x4b6   : > { %1102 = vrcp.f32 %v718_v16 }
 0x4b8   : > { %v723_v21 = vpop.permute.xlu1 %722 }
 0x4b9   : > { %v728_v23 = vsel %vm390_vm2, %v723_v21, 0 }
 0x4c2   : > { %v1101_v20 = vpop.eup %1100 }
 0x4c3   : > { %v608_v22 = vmul.f32 %v1101_v20, %v1097_v9  ;;  %v1103_v25 = vpop.eup %1102 }
 0x4c4   : > { %v720_v26 = vmul.f32 %v1103_v25, %v1095_v4 }
 0x4c5   : > { %v609_v24 = vpack.c.bf16 %v608_v22, %v608_v22 }
 0x4c6   : > { %v721_v27 = vpack.c.bf16 %v720_v26, %v720_v26 }
 0x4c7   : > { %1038 = vmatmul.mubr.msk.bf16.vlgmr.msra.gmra.mxu0 %vm318_vm1, %v609_v24 }
 0x4c8   : > { %1048 = vmatpush3.bf16.msra.mxu0 %v728_v23  ;;  %1049 = vmatprep.mubr.msk.bf16.mxu0 %vm1115_vm0, %v1114_v0 }
 0x4cf   : > { %1050 = vmatmul.mubr.msk.bf16.vlgmr.msra.gmra.mxu0 %vm318_vm1, %v721_v27 }
 0x552   : > { %v540_v28 = vpop.f32.mrf.mxu0 }
 0x553   : > { %771 = vrot.lane.b32.xlu1 %v540_v28, %s1127_s21 }
 0x554   : > { %v1027_v29 = vpop.f32.mrf.mxu0 }
 0x556   : > { %v543_v30 = vpop.f32.mrf.mxu0 }
 0x558   : > { %v1028_v31 = vpop.f32.mrf.mxu0 }
 0x587   : > { %v652_v35 = vpop.f32.mrf.mxu0 }
 0x588   : > { %775 = vrot.lane.b32.xlu0 %v652_v35, %s1128_s28 }
 0x589   : > { %v1039_v36 = vpop.f32.mrf.mxu0 }
 0x58b   : > { %v655_v37 = vpop.f32.mrf.mxu0 }
 0x58d   : > { %v1040_v38 = vpop.f32.mrf.mxu0 }
 0x58f   : > { %v764_v39 = vpop.f32.mrf.mxu0 }
 0x590   : > { %779 = vrot.lane.b32.xlu1 %v764_v39, %s1129_s29 }
 0x591   : > { %v1051_v40 = vpop.f32.mrf.mxu0 }
 0x593   : > { %v767_v41 = vpop.f32.mrf.mxu0 }
 0x595   : > { %v1052_v42 = vpop.f32.mrf.mxu0 }
 0x5c5   : > { %v772_v43 = vpop.permute.xlu1 %771 }
 0x5c6   : > { %v782_v0 = vsel %vm318_vm1, %v1233_v33, %v772_v43 }
 0x5fa   : > { %v776_v44 = vpop.permute.xlu0 %775 }
 0x5fb   : > { %v784_v45 = vsel %vm783_vm3, %v782_v0, %v776_v44 }
 0x602   : > { %v780_v46 = vpop.permute.xlu1 %779 }
 0x603   : > { %v786_v47 = vsel %vm785_vm4, %v784_v45, %v780_v46 }
 0x604   : > { %v787_v48 = vpack.c.bf16 %v786_v47, %v786_v47 }
 0x606   : > { %1058 = vmatmul.mubr.msk.bf16.vlgmr.msra.gmra.mxu1 %vm806_vm5, %v787_v48 }
 0x6c6   : > { %v844_v52 = vpop.f32.mrf.mxu1 }
 0x6c7   : > { %v845_v53 = vadd.f32 %v978_v50, %v844_v52 }
 0x6c8   : > { %v1059_v33 = vpop.f32.mrf.mxu1 }
 0x6c9   : > { %v854_v54 = vadd.f32 %v853_v51, %v845_v53 }
 0x6ca   : > { %v847_v55 = vpop.f32.mrf.mxu1 }
 0x6cb   : > { %v855_v56 = vsel %vm806_vm5, %v854_v54, 0.0 }
 0x6cc   : > { %856 = vadd.xlane.f32.xlu0 %v855_v56  ;;  %v1060_v57 = vpop.f32.mrf.mxu1 }
 0x755   : > { %v857_v58 = vpop.xlane.xlu0 %856 }
 0x756   : > { %v859_v59 = vmul.f32 0.03125, %v857_v58 }
 0x758   : > { %v860_v60 = vsub.f32 %v854_v54, %v859_v59 }
 0x75a   : > { %v861_v61 = vmul.f32 %v860_v60, %v860_v60 }
 0x75c   : > { %v862_v62 = vsel %vm806_vm5, %v861_v61, 0.0 }
 0x75d   : > { %863 = vadd.xlane.f32.xlu1 %v862_v62 }
 0x7e6   : > { %v864_v63 = vpop.xlane.xlu1 %863 }
 0x7e7   : > { %v865_v1 = vmul.f32 0.03125, %v864_v63 }
 0x7e9   : > { %v866_v3 = vadd.f32 1e-12, %v865_v1 }
 0x7eb   : > { %1104 = vrsqrt.f32 %v866_v3 }
 0x7f8   : > { %v1105_v4 = vpop.eup %1104 }
 0x7f9   : > { %v868_v6 = vmul.f32 %v1105_v4, %v860_v60 }
 0x7fb   : > { %v875_v8 = vmul.f32 %v982_v5, %v868_v6 }
 0x7fd   : > { %v882_v9 = vadd.f32 %v983_v7, %v875_v8 }
 0x7ff   : > { %v883_v10 = vpack.c.bf16 %v882_v9, %v882_v9 }
 0x801   : > { %885 = vst.msk [vmem:[%s304_s18] sm:$0xf] %vm884_vm6, %v883_v10 }
 0x802 PF: > { %s17_s24 = sadd.s32 1, %s1112_s24  }
 0x803   : > { %p14_p4 = scmp.ge.s32.totalorder %s17_s24, 4  }
 0x805   :  { %16 = sbr.rel (!%p14_p4) target bundleno = 1 (0x1), region = 84 }

// kernel: visbert_forward.17
= control target key start
LH: loop header
LB: loop body
LE: loop exit
PB: predicated region body
PF: predicated region fallthrough
CT: control target
= control target key end

     0   :  { %v109_v0 = vmov 0.0   ;;  %vm110_vm0 = vmmov 0   ;;  %vm39_vm1 = vcmask 261120   ;;  %vm84_vm2 = vcmask 781312   ;;  %s146_s1 = inlined_call_operand.vmem [shape: bf16[32,96], index: 1, kind: input, shape index: {}]   ;;  %s147_s0 = inlined_call_operand.vmem [shape: bf16[8,32], index: 0, kind: input, shape index: {}]   ;;  %s148_s2 = inlined_call_operand.vmem [shape: f32[1,96], index: 2, kind: input, shape index: {}]   ;;  %s149_s3 = inlined_call_operand.vmem [shape: bf16[8,96], index: 3, kind: output, shape index: {}]  }
   0x1   :  { %97 = vmatprep.subr.bf16.mxu0 %v109_v0  ;;  %v107_v1 = vld [vmem:[%s146_s1 + $0x8] sm:$0xff]   ;;  %101 = vmatprep.mubr.msk.bf16.mxu0 %vm110_vm0, %v109_v0  ;;  %v108_v2 = vld [vmem:[%s146_s1] sm:$0xff]  }
   0x2   :  { %98 = vmatpush3.bf16.msra.mxu0 %v107_v1  ;;  %v15_v3 = vld [vmem:[%s147_s0] sm:$0xf] }
   0x3   :  { %99 = vmatprep.subr.bf16.mxu0 %v109_v0  ;;  %v90_v4 = vld [vmem:[%s148_s2] ss:$0 sm:$0xff] }
   0x6   :  { %100 = vmatpush3.bf16.msra.mxu0 %v108_v2 }
   0x9   :  { %102 = vmatmul.mubr.msk.bf16.vlgmr.msra.gmra.mxu0 %vm39_vm1, %v15_v3 }
  0xc9   :  { %v77_v5 = vpop.f32.mrf.mxu0 }
  0xca   :  { %v78_v6 = vadd.f32 %v90_v4, %v77_v5 }
  0xcb   :  { %v103_v7 = vpop.f32.mrf.mxu0 }
  0xcc   :  { %v83_v8 = vpack.c.bf16 %v78_v6, %v78_v6 }
  0xcd   :  { %v80_v9 = vpop.f32.mrf.mxu0 }
  0xce   :  { %85 = vst.msk [vmem:[%s149_s3] sm:$0xf] %vm84_vm2, %v83_v8 }
  0xcf   :  { %v104_v10 = vpop.f32.mrf.mxu0 }

// kernel: visbert_forward.16
= control target key start
LH: loop header
LB: loop body
LE: loop exit
PB: predicated region body
PF: predicated region fallthrough
CT: control target
= control target key end

     0   :  { %v136_v0 = vmov 0.0   ;;  %vm137_vm0 = vmmov 0   ;;  %vm56_vm1 = vcmask 523264   ;;  %vm101_vm2 = vcmask 257024   ;;  %s179_s1 = inlined_call_operand.vmem [shape: bf16[64,32], index: 1, kind: input, shape index: {}]   ;;  %s180_s0 = inlined_call_operand.vmem [shape: f32[8,64], index: 0, kind: input, shape index: {}]   ;;  %s181_s2 = inlined_call_operand.vmem [shape: f32[1,32], index: 2, kind: input, shape index: {}]   ;;  %s182_s3 = inlined_call_operand.vmem [shape: bf16[8,32], index: 3, kind: output, shape index: {}]  }
   0x1   :  { %118 = vmatprep.subr.bf16.mxu0 %v136_v0  ;;  %v132_v1 = vld [vmem:[%s179_s1 + $0x18] sm:$0xff]   ;;  %126 = vmatprep.mubr.msk.bf16.mxu0 %vm137_vm0, %v136_v0  ;;  %v133_v2 = vld [vmem:[%s179_s1 + $0x10] sm:$0xff]   ;;  %v134_v3 = vld [vmem:[%s179_s1 + $0x8] sm:$0xff]  }
   0x2   :  { %119 = vmatpush3.bf16.msra.mxu0 %v132_v1  ;;  %v135_v4 = vld [vmem:[%s179_s1] sm:$0xff]  }
   0x3   :  { %120 = vmatprep.subr.bf16.mxu0 %v136_v0  ;;  %v15_v5 = vld [vmem:[%s180_s0] sm:$0xff] }
   0x4   :  { %v16_v6 = vpack.c.bf16 %v15_v5, %v15_v5  ;;  %v107_v7 = vld [vmem:[%s181_s2] ss:$0 sm:$0xff] }
   0x6   :  { %121 = vmatpush3.bf16.msra.mxu0 %v133_v2 }
   0x7   :  { %122 = vmatprep.subr.bf16.mxu0 %v136_v0 }
   0xa   :  { %123 = vmatpush3.bf16.msra.mxu0 %v134_v3 }
   0xb   :  { %124 = vmatprep.subr.bf16.mxu0 %v136_v0 }
   0xe   :  { %125 = vmatpush3.bf16.msra.mxu0 %v135_v4 }
  0x11   :  { %127 = vmatmul.mubr.msk.bf16.vlgmr.msra.gmra.mxu0 %vm56_vm1, %v16_v6 }
  0xd1   :  { %v94_v8 = vpop.f32.mrf.mxu0 }
  0xd2   :  { %v95_v9 = vadd.f32 %v107_v7, %v94_v8 }
  0xd3   :  { %v128_v10 = vpop.f32.mrf.mxu0 }
  0xd4   :  { %v100_v11 = vpack.c.bf16 %v95_v9, %v95_v9 }
  0xd5   :  { %v97_v12 = vpop.f32.mrf.mxu0 }
  0xd6   :  { %102 = vst.msk [vmem:[%s182_s3] sm:$0xf] %vm101_vm2, %v100_v11 }
  0xd7   :  { %v129_v13 = vpop.f32.mrf.mxu0 }

// kernel: visbert_forward.19
= control target key start
LH: loop header
LB: loop body
LE: loop exit
PB: predicated region body
PF: predicated region fallthrough
CT: control target
= control target key end

     0   :  { %v279_v0 = vmov 0.0   ;;  %vm280_vm0 = vmmov 0   ;;  %vm51_vm1 = vcmask 261120   ;;  %vm144_vm2 = vcmask 523264   ;;  %s360_s1 = inlined_call_operand.vmem [shape: bf16[32,64], index: 1, kind: input, shape index: {}]   ;;  %s361_s0 = inlined_call_operand.vmem [shape: bf16[8,32], index: 0, kind: input, shape index: {}]   ;;  %s362_s3 = inlined_call_operand.vmem [shape: bf16[64,32], index: 3, kind: input, shape index: {}]   ;;  %s363_s2 = inlined_call_operand.vmem [shape: f32[1,64], index: 2, kind: input, shape index: {}]   ;;  %s364_s4 = inlined_call_operand.vmem [shape: f32[1,32], index: 4, kind: input, shape index: {}]   ;;  %s365_s5 = inlined_call_operand.vmem [shape: f32[1,32], index: 5, kind: input, shape index: {}]   ;;  %s366_s6 = inlined_call_operand.vmem [shape: f32[1,32], index: 6, kind: input, shape index: {}]   ;;  %s367_s7 = inlined_call_operand.vmem [shape: bf16[8,32], index: 7, kind: output, shape index: {}]  }
   0x1   :  { %247 = vmatprep.subr.bf16.mxu0 %v279_v0  ;;  %v269_v1 = vld [vmem:[%s360_s1 + $0x8] sm:$0xff]   ;;  %251 = vmatprep.mubr.msk.bf16.mxu0 %vm280_vm0, %v279_v0  ;;  %v270_v2 = vld [vmem:[%s360_s1] sm:$0xff]   ;;  %v271_v4 = vld [vmem:[%s362_s3 + $0x18] sm:$0xff]   ;;  %vm221_vm3 = vcmask 257024  }
   0x2   :  { %255 = vmatprep.subr.bf16.mxu1 %v279_v0  ;;  %263 = vmatprep.mubr.msk.bf16.mxu1 %vm280_vm0, %v279_v0  ;;  %v27_v3 = vld [vmem:[%s361_s0] sm:$0xf]  ;;  %v272_v5 = vld [vmem:[%s362_s3 + $0x10] sm:$0xff]   ;;  %v273_v6 = vld [vmem:[%s362_s3 + $0x8] sm:$0xff]  }
   0x3   :  { %248 = vmatpush3.bf16.msra.mxu0 %v269_v1  ;;  %256 = vmatpush3.bf16.msra.mxu1 %v271_v4  ;;  %v274_v7 = vld [vmem:[%s362_s3] sm:$0xff]   ;;  %v188_v25 = vunpack.c.l.bf16 %v27_v3 }
   0x4   :  { %249 = vmatprep.subr.bf16.mxu0 %v279_v0  ;;  %257 = vmatprep.subr.bf16.mxu1 %v279_v0  ;;  %v227_v8 = vld [vmem:[%s363_s2] ss:$0 sm:$0xff] }
   0x5   :  { %v231_v24 = vld [vmem:[%s364_s4] ss:$0 sm:$0xff] }
   0x6   :  { %v237_v42 = vld [vmem:[%s365_s5] ss:$0 sm:$0xff] }
   0x7   :  { %250 = vmatpush3.bf16.msra.mxu0 %v270_v2  ;;  %258 = vmatpush3.bf16.msra.mxu1 %v272_v5  ;;  %v238_v44 = vld [vmem:[%s366_s6] ss:$0 sm:$0xff] }
   0x8   :  { %259 = vmatprep.subr.bf16.mxu1 %v279_v0 }
   0xa   :  { %252 = vmatmul.mubr.msk.bf16.vlgmr.msra.gmra.mxu0 %vm51_vm1, %v27_v3 }
   0xb   :  { %260 = vmatpush3.bf16.msra.mxu1 %v273_v6 }
   0xc   :  { %261 = vmatprep.subr.bf16.mxu1 %v279_v0 }
   0xf   :  { %262 = vmatpush3.bf16.msra.mxu1 %v274_v7 }
  0xca   :  { %v89_v9 = vpop.f32.mrf.mxu0 }
  0xcb   :  { %v90_v10 = vadd.f32 %v227_v8, %v89_v9 }
  0xcc   :  { %v253_v11 = vpop.f32.mrf.mxu0 }
  0xcd   :  { %v95_v12 = vmul.f32 %v90_v10, %v90_v10 }
  0xce   :  { %v92_v13 = vpop.f32.mrf.mxu0 }
  0xcf   :  { %v96_v14 = vmul.f32 %v95_v12, %v90_v10 }
  0xd0   :  { %v254_v15 = vpop.f32.mrf.mxu0 }
  0xd1   :  { %v97_v16 = vmul.f32 0.044715, %v96_v14 }
  0xd3   :  { %v98_v17 = vadd.f32 %v97_v16, %v90_v10 }
  0xd5   :  { %v99_v18 = vmul.f32 0.7978846, %v98_v17 }
  0xd7   :  { %275 = vtanh.f32 %v99_v18 }
  0xe4   :  { %v276_v19 = vpop.eup %275 }
  0xe5   :  { %v101_v20 = vadd.f32 1.0, %v276_v19 }
  0xe7   :  { %v102_v21 = vmul.f32 0.5, %v101_v20 }
  0xe9   :  { %v103_v22 = vmul.f32 %v102_v21, %v90_v10 }
  0xeb   :  { %v104_v23 = vpack.c.bf16 %v103_v22, %v103_v22 }
  0xed   :  { %264 = vmatmul.mubr.msk.bf16.vlgmr.msra.gmra.mxu1 %vm144_vm2, %v104_v23 }
 0x1ad   :  { %v182_v26 = vpop.f32.mrf.mxu1 }
 0x1ae   :  { %v183_v27 = vadd.f32 %v231_v24, %v182_v26 }
 0x1af   :  { %v265_v28 = vpop.f32.mrf.mxu1 }
 0x1b0   :  { %v189_v29 = vadd.f32 %v188_v25, %v183_v27 }
 0x1b1   :  { %v185_v30 = vpop.f32.mrf.mxu1 }
 0x1b2   :  { %v192_v31 = vsel %vm51_vm1, %v189_v29, 0.0 }
 0x1b3   :  { %193 = vadd.xlane.f32.xlu0 %v192_v31  ;;  %v266_v32 = vpop.f32.mrf.mxu1 }
 0x23c   :  { %v194_v33 = vpop.xlane.xlu0 %193 }
 0x23d   :  { %v196_v34 = vmul.f32 0.03125, %v194_v33 }
 0x23f   :  { %v197_v35 = vsub.f32 %v189_v29, %v196_v34 }
 0x241   :  { %v198_v36 = vmul.f32 %v197_v35, %v197_v35 }
 0x243   :  { %v199_v37 = vsel %vm51_vm1, %v198_v36, 0.0 }
 0x244   :  { %200 = vadd.xlane.f32.xlu0 %v199_v37 }
 0x2cd   :  { %v201_v38 = vpop.xlane.xlu0 %200 }
 0x2ce   :  { %v202_v39 = vmul.f32 0.03125, %v201_v38 }
 0x2d0   :  { %v203_v40 = vadd.f32 1e-12, %v202_v39 }
 0x2d2   :  { %277 = vrsqrt.f32 %v203_v40 }
 0x2df   :  { %v278_v41 = vpop.eup %277 }
 0x2e0   :  { %v205_v43 = vmul.f32 %v278_v41, %v197_v35 }
 0x2e2   :  { %v212_v45 = vmul.f32 %v237_v42, %v205_v43 }
 0x2e4   :  { %v219_v46 = vadd.f32 %v238_v44, %v212_v45 }
 0x2e6   :  { %v220_v47 = vpack.c.bf16 %v219_v46, %v219_v46 }
 0x2e8   :  { %222 = vst.msk [vmem:[%s367_s7] sm:$0xf] %vm221_vm3, %v220_v47 }

// kernel: visbert_forward.21
= control target key start
LH: loop header
LB: loop body
LE: loop exit
PB: predicated region body
PF: predicated region fallthrough
CT: control target
= control target key end

     0   :  { %v109_v0 = vmov 0.0   ;;  %vm110_vm0 = vmmov 0   ;;  %vm39_vm1 = vcmask 261120   ;;  %vm84_vm2 = vcmask 519168   ;;  %s146_s1 = inlined_call_operand.vmem [shape: bf16[32,64], index: 1, kind: input, shape index: {}]   ;;  %s147_s0 = inlined_call_operand.vmem [shape: bf16[8,32], index: 0, kind: input, shape index: {}]   ;;  %s148_s2 = inlined_call_operand.vmem [shape: f32[1,64], index: 2, kind: input, shape index: {}]   ;;  %s149_s3 = inlined_call_operand.vmem [shape: bf16[8,64], index: 3, kind: output, shape index: {}]  }
   0x1   :  { %97 = vmatprep.subr.bf16.mxu0 %v109_v0  ;;  %v107_v1 = vld [vmem:[%s146_s1 + $0x8] sm:$0xff]   ;;  %101 = vmatprep.mubr.msk.bf16.mxu0 %vm110_vm0, %v109_v0  ;;  %v108_v2 = vld [vmem:[%s146_s1] sm:$0xff]  }
   0x2   :  { %98 = vmatpush3.bf16.msra.mxu0 %v107_v1  ;;  %v15_v3 = vld [vmem:[%s147_s0] sm:$0xf] }
   0x3   :  { %99 = vmatprep.subr.bf16.mxu0 %v109_v0  ;;  %v90_v4 = vld [vmem:[%s148_s2] ss:$0 sm:$0xff] }
   0x6   :  { %100 = vmatpush3.bf16.msra.mxu0 %v108_v2 }
   0x9   :  { %102 = vmatmul.mubr.msk.bf16.vlgmr.msra.gmra.mxu0 %vm39_vm1, %v15_v3 }
  0xc9   :  { %v77_v5 = vpop.f32.mrf.mxu0 }
  0xca   :  { %v78_v6 = vadd.f32 %v90_v4, %v77_v5 }
  0xcb   :  { %v103_v7 = vpop.f32.mrf.mxu0 }
  0xcc   :  { %v83_v8 = vpack.c.bf16 %v78_v6, %v78_v6 }
  0xcd   :  { %v80_v9 = vpop.f32.mrf.mxu0 }
  0xce   :  { %85 = vst.msk [vmem:[%s149_s3] sm:$0xf] %vm84_vm2, %v83_v8 }
  0xcf   :  { %v104_v10 = vpop.f32.mrf.mxu0 }

// kernel: visbert_forward.18
= control target key start
LH: loop header
LB: loop body
LE: loop exit
PB: predicated region body
PF: predicated region fallthrough
CT: control target
= control target key end

     0   :  { %s1178_s24 = smov 0   ;;  %s1296_s0 = inlined_call_operand.vmem [shape: bf16[2,4,96], index: 0, kind: input, shape index: {}]   ;;  %s1297_s1 = inlined_call_operand.vmem [shape: f32[2,1,4], index: 1, kind: input, shape index: {}]   ;;  %s1298_s2 = inlined_call_operand.vmem [shape: bf16[32,32], index: 2, kind: input, shape index: {}]   ;;  %s1299_s3 = inlined_call_operand.vmem [shape: f32[1,32], index: 3, kind: input, shape index: {}]   ;;  %s1300_s4 = inlined_call_operand.vmem [shape: bf16[2,4,32], index: 4, kind: input, shape index: {}]   ;;  %s1301_s5 = inlined_call_operand.vmem [shape: f32[1,32], index: 5, kind: input, shape index: {}]   ;;  %s1302_s6 = inlined_call_operand.vmem [shape: f32[1,32], index: 6, kind: input, shape index: {}]   ;;  %s1303_s7 = inlined_call_operand.vmem [shape: bf16[2,4,32], index: 7, kind: output, shape index: {}]  }
   0x1 LB: > { %s968_s25 = sadd.s32 4294967295, %s1119_s24   ;;  %p972_p0 = scmp.ge.s32.totalorder %s1119_s24, 1  ;;  %s1119_s24 = sphi %s1178_s24, %s17_s24  }
   0x2   : > { %p253_p1 = scmp.lt.s32.totalorder %s1119_s24, 3 }
   0x4   : > { %p254_p2 = pnand %p972_p0, %p253_p1 }
   0x5   : > { %p290_p3 = scmp.lt.s32.totalorder (!%p254_p2), %s968_s25, 1  ;;  %s1124_s30 = smov (!%p254_p2), 96  }
   0x6   : > { %257 = sbr.rel (%p254_p2) target bundleno = 2053 (0x805), region = 48  ;;  %s1125_s8 = smov (!%p254_p2), 64  }
   0x7   : > { %s1126_s9 = smov (!%p254_p2), 88   ;;  %s1127_s13 = smov (!%p254_p2), 72  }
   0x8   : > { %s1128_s14 = smov (!%p254_p2), 120   ;;  %s1129_s15 = smov (!%p254_p2), 80  }
   0x9   : > { %s1130_s16 = smov (!%p254_p2), 112   ;;  %s1131_s17 = smov (!%p254_p2), 104  }
   0xa   : > { %s1132_s18 = smov (!%p254_p2), 56   ;;  %s1133_s19 = smov (!%p254_p2), 48  }
   0xb   : > { %v317_v0 = vlaneseq  ;;  %v1121_v1 = vmov 1983009808   ;;  %v1122_v3 = vmov 0.0   ;;  %s1305_s25 = smov (!%p290_p3, %s968_s25), 1  ;;  %vm1123_vm0 = vmmov 0   ;;  %s1134_s20 = smov 40  }
   0xc   : > { %v315_v2 = vunpack.c.l.s4 %v1121_v1  ;;  %1012 = vmatprep.subr.bf16.mxu0 %v1122_v3  ;;  %1018 = vmatprep.subr.bf16.mxu1 %v1122_v3  ;;  %s1192_s26 = sshll.u32 %s1305_s25, 1  ;;  %vm323_vm1 = vcmask 64512   ;;  %s296_s12 = scalar_lea.vmem %s1297_s1, %s1305_s25  ;;  %vm378_vm2 = vcmask 27648   ;;  %vm397_vm3 = vcmask 1041408  }
   0xd   : > { %v318_v4 = vshrl.u32 %v317_v0, 7  ;;  %1014 = vmatprep.mubr.msk.bf16.mxu0 %vm1123_vm0, %v1122_v3  ;;  %1020 = vmatprep.mubr.msk.bf16.mxu1 %vm1123_vm0, %v1122_v3  ;;  %s293_s29 = scalar_lea.vmem %s1296_s0, %s1192_s26  ;;  %v1211_v12 = vld [vmem:[%s296_s12] ss:$0 sm:$0xff]  ;;  %vm393_vm4 = vcmask 31744   ;;  %s1135_s21 = smov 8   ;;  %vm790_vm5 = vcmask 130048  }
   0xe   : > { %v316_v5 = vunpack.c.0.s8 %v315_v2  ;;  %v306_v7 = vld [vmem:[%s293_s29] sm:$0x3]  ;;  %s1136_s28 = smov 16   ;;  %s1137_s29 = smov 24   ;;  %vm792_vm6 = vcmask 195584   ;;  %vm813_vm7 = vcmask 261120  }
   0xf   : > { %vm862_vm8 = vcmask 257024   ;;  %vm892_vm9 = vcmask 254976  }
  0x10   : > { %v319_v6 = vsub.s32 %v316_v5, %v318_v4 }
  0x12   : > { %v1198_v8 = vrot.slane %v306_v7, %v319_v6 }
  0x14   : > { %321 = vrot.lane.b32.xlu0 %v1198_v8, %s1124_s30  ;;  %391 = vrot.lane.b32.xlu1 %v1198_v8, %s1125_s8 }
  0x18   : > { %443 = vrot.lane.b32.xlu1 %v1198_v8, %s1126_s9  ;;  %s300_s9 = scalar_lea.vmem %s1300_s4, %s1192_s26 }
  0x86   : > { %v322_v9 = vpop.permute.xlu0 %321  ;;  %v392_v19 = vpop.permute.xlu1 %391 }
  0x87   : > { %v328_v10 = vsel %vm323_vm1, %v322_v9, 0  ;;  %v399_v20 = vsel %vm397_vm3, %v392_v19, 0 }
  0x88   : > { %1013 = vmatpush3.bf16.xpose.msra.mxu0 %v328_v10  ;;  %1019 = vmatpush3.bf16.msra.mxu1 %v399_v20 }
  0x89   : > { %1030 = vmatprep.subr.bf16.mxu0 %v1122_v3  ;;  %1024 = vmatprep.subr.bf16.mxu1 %v1122_v3 }
  0x8a   : > { %v444_v26 = vpop.permute.xlu1 %443 }
  0x8b   : > { %v449_v32 = vsel %vm323_vm1, %v444_v26, 0 }
  0x8f   : > { %1015 = vmatmul.mubr.msk.bf16.vlgmr.msra.gmra.mxu0 %vm323_vm1, %v306_v7 }
  0x90   : > { %1032 = vmatprep.mubr.msk.bf16.mxu0 %vm1123_vm0, %v1122_v3 }
 0x14f   : > { %v364_v11 = vpop.f32.mrf.mxu0 }
 0x150   : > { %v370_v13 = vmul.f32 0.35355338, %v364_v11 }
 0x151   : > { %v1016_v14 = vpop.f32.mrf.mxu0 }
 0x152   : > { %v377_v15 = vadd.f32 %v1211_v12, %v370_v13 }
 0x153   : > { %v367_v16 = vpop.f32.mrf.mxu0 }
 0x154   : > { %v379_v17 = vsel %vm378_vm2, %v377_v15, -inf }
 0x155   : > { %380 = vmax.xlane.f32.xlu0 %v379_v17  ;;  %v1017_v18 = vpop.f32.mrf.mxu0 }
 0x16b   : > { %667 = vrot.lane.b32.xlu0 %v1198_v8, %s1127_s13 }
 0x1de   : > { %v381_v21 = vpop.xlane.xlu0 %380 }
 0x1df   : > { %v382_v22 = vsub.f32 %v377_v15, %v381_v21 }
 0x1e1   : > { %v383_v23 = vmul.f32 1.442695, %v382_v22 }
 0x1e2   : > { %v668_v35 = vpop.permute.xlu0 %667 }
 0x1e3   : > { %1095 = vpow2.f32 %v383_v23  ;;  %v673_v37 = vsel %vm323_vm1, %v668_v35, 0 }
 0x1f0   : > { %v1096_v24 = vpop.eup %1095 }
 0x1f1   : > { %v385_v25 = vsel %vm378_vm2, %v1096_v24, 0.0 }
 0x1f2   : > { %386 = vadd.xlane.f32.xlu1 %v385_v25 }
 0x203   : > { %441 = vrot.lane.b32.xlu1 %v1198_v8, %s1128_s14 }
 0x207   : > { %555 = vrot.lane.b32.xlu1 %v1198_v8, %s1129_s15 }
 0x20b   : > { %553 = vrot.lane.b32.xlu1 %v1198_v8, %s1130_s16 }
 0x20f   : > { %665 = vrot.lane.b32.xlu1 %v1198_v8, %s1131_s17 }
 0x27b   : > { %v387_v27 = vpop.xlane.xlu1 %386 }
 0x27c   : > { %1097 = vrcp.f32 %v387_v27 }
 0x27f   : > { %v442_v30 = vpop.permute.xlu1 %441 }
 0x283   : > { %v556_v33 = vpop.permute.xlu1 %555 }
 0x284   : > { %v561_v34 = vsel %vm323_vm1, %v556_v33, 0 }
 0x287   : > { %v554_v36 = vpop.permute.xlu1 %553 }
 0x289   : > { %v1098_v28 = vpop.eup %1097 }
 0x28a   : > { %v389_v29 = vmul.f32 %v1098_v28, %v1096_v24 }
 0x28b   : > { %v666_v38 = vpop.permute.xlu1 %665 }
 0x28c   : > { %v390_v31 = vpack.c.bf16 %v389_v29, %v389_v29 }
 0x28e   : > { %1021 = vmatmul.mubr.msk.bf16.vlgmr.msra.gmra.mxu1 %vm393_vm4, %v390_v31 }
 0x28f   : > { %1025 = vmatpush3.bf16.xpose.msra.mxu1 %v449_v32  ;;  %1026 = vmatprep.mubr.msk.bf16.mxu1 %vm1123_vm0, %v1122_v3 }
 0x290   : > { %1036 = vmatprep.subr.bf16.mxu1 %v1122_v3 }
 0x296   : > { %1027 = vmatmul.mubr.msk.bf16.vlgmr.msra.gmra.mxu1 %vm323_vm1, %v442_v30 }
 0x297   : > { %1037 = vmatpush3.bf16.xpose.msra.mxu1 %v561_v34  ;;  %1038 = vmatprep.mubr.msk.bf16.mxu1 %vm1123_vm0, %v1122_v3 }
 0x298   : > { %1048 = vmatprep.subr.bf16.mxu1 %v1122_v3 }
 0x29e   : > { %1039 = vmatmul.mubr.msk.bf16.vlgmr.msra.gmra.mxu1 %vm323_vm1, %v554_v36 }
 0x29f   : > { %1049 = vmatpush3.bf16.xpose.msra.mxu1 %v673_v37  ;;  %1050 = vmatprep.mubr.msk.bf16.mxu1 %vm1123_vm0, %v1122_v3 }
 0x2a0   : > { %1060 = vmatprep.subr.bf16.mxu1 %v1122_v3 }
 0x2a6   : > { %1051 = vmatmul.mubr.msk.bf16.vlgmr.msra.gmra.mxu1 %vm323_vm1, %v666_v38  ;;  %v1093_v38 = vld [vmem:[%s1298_s2 + $0x8] sm:$0xff]  }
 0x2a7   : > { %1064 = vmatprep.mubr.msk.bf16.mxu1 %vm1123_vm0, %v1122_v3  ;;  %1061 = vmatpush3.bf16.msra.mxu1 %v1093_v38 }
 0x2a8   : > { %1062 = vmatprep.subr.bf16.mxu1 %v1122_v3 }
 0x34e   : > { %v1241_v39 = vpop.f32.mrf.mxu1 }
 0x350   : > { %v1022_v40 = vpop.f32.mrf.mxu1 }
 0x351   : > { %v1094_v40 = vld [vmem:[%s1298_s2] sm:$0xff]  }
 0x352   : > { %v438_v41 = vpop.f32.mrf.mxu1  ;;  %1063 = vmatpush3.bf16.msra.mxu1 %v1094_v40 }
 0x354   : > { %v1023_v42 = vpop.f32.mrf.mxu1 }
 0x356   : > { %v485_v43 = vpop.f32.mrf.mxu1 }
 0x357   : > { %v491_v44 = vmul.f32 0.35355338, %v485_v43 }
 0x358   : > { %v1028_v45 = vpop.f32.mrf.mxu1 }
 0x359   : > { %v492_v46 = vadd.f32 %v1211_v12, %v491_v44 }
 0x35a   : > { %v488_v47 = vpop.f32.mrf.mxu1 }
 0x35b   : > { %v493_v48 = vsel %vm378_vm2, %v492_v46, -inf }
 0x35c   : > { %494 = vmax.xlane.f32.xlu1 %v493_v48  ;;  %v1029_v49 = vpop.f32.mrf.mxu1 }
 0x35e   : > { %v597_v50 = vpop.f32.mrf.mxu1 }
 0x35f   : > { %v603_v51 = vmul.f32 0.35355338, %v597_v50 }
 0x360   : > { %v1040_v52 = vpop.f32.mrf.mxu1 }
 0x361   : > { %v604_v53 = vadd.f32 %v1211_v12, %v603_v51 }
 0x362   : > { %v600_v54 = vpop.f32.mrf.mxu1 }
 0x363   : > { %v605_v55 = vsel %vm378_vm2, %v604_v53, -inf }
 0x364   : > { %606 = vmax.xlane.f32.xlu0 %v605_v55  ;;  %v1041_v56 = vpop.f32.mrf.mxu1  ;;  %v857_v55 = vld [vmem:[%s300_s9] sm:$0x3] }
 0x365   : > { %v985_v56 = vld [vmem:[%s1299_s3] ss:$0 sm:$0xff] }
 0x366   : > { %v709_v57 = vpop.f32.mrf.mxu1 }
 0x367   : > { %v715_v58 = vmul.f32 0.35355338, %v709_v57  ;;  %v860_v57 = vunpack.c.l.bf16 %v857_v55 }
 0x368   : > { %v1052_v59 = vpop.f32.mrf.mxu1 }
 0x369   : > { %v716_v60 = vadd.f32 %v1211_v12, %v715_v58 }
 0x36a   : > { %v712_v61 = vpop.f32.mrf.mxu1 }
 0x36b   : > { %v717_v62 = vsel %vm378_vm2, %v716_v60, -inf }
 0x36c   : > { %718 = vmax.xlane.f32.xlu1 %v717_v62  ;;  %v1053_v63 = vpop.f32.mrf.mxu1 }
 0x3e5   : > { %v495_v0 = vpop.xlane.xlu1 %494 }
 0x3e6   : > { %v496_v1 = vsub.f32 %v492_v46, %v495_v0 }
 0x3e8   : > { %v497_v2 = vmul.f32 1.442695, %v496_v1 }
 0x3ea   : > { %1099 = vpow2.f32 %v497_v2 }
 0x3ed   : > { %v607_v12 = vpop.xlane.xlu0 %606 }
 0x3ee   : > { %v608_v13 = vsub.f32 %v604_v53, %v607_v12 }
 0x3f0   : > { %v609_v14 = vmul.f32 1.442695, %v608_v13  ;;  %v990_v13 = vld [vmem:[%s1302_s6] ss:$0 sm:$0xff] }
 0x3f5   : > { %v719_v4 = vpop.xlane.xlu1 %718 }
 0x3f6   : > { %v720_v5 = vsub.f32 %v716_v60, %v719_v4 }
 0x3f7   : > { %v1100_v6 = vpop.eup %1099 }
 0x3f8   : > { %v721_v7 = vmul.f32 1.442695, %v720_v5  ;;  %v499_v9 = vsel %vm378_vm2, %v1100_v6, 0.0 }
 0x3f9   : > { %500 = vadd.xlane.f32.xlu1 %v499_v9 }
 0x3fa   : > { %1101 = vpow2.f32 %v721_v7 }
 0x3fb   : > { %1103 = vpow2.f32 %v609_v14 }
 0x407   : > { %v1102_v10 = vpop.eup %1101 }
 0x408   : > { %v723_v11 = vsel %vm378_vm2, %v1102_v10, 0.0  ;;  %v1104_v15 = vpop.eup %1103 }
 0x409   : > { %724 = vadd.xlane.f32.xlu0 %v723_v11  ;;  %v611_v16 = vsel %vm378_vm2, %v1104_v15, 0.0  ;;  %v989_v11 = vld [vmem:[%s1301_s5] ss:$0 sm:$0xff] }
 0x40a   : > { %505 = vrot.lane.b32.xlu1 %v1198_v8, %s1132_s18  ;;  %s304_s18 = scalar_lea.vmem %s1303_s7, %s1192_s26 }
 0x41f   : > { %617 = vrot.lane.b32.xlu0 %v1198_v8, %s1133_s19 }
 0x42e   : > { %612 = vadd.xlane.f32.xlu1 %v611_v16 }
 0x43f   : > { %729 = vrot.lane.b32.xlu1 %v1198_v8, %s1134_s20 }
 0x482   : > { %v501_v17 = vpop.xlane.xlu1 %500 }
 0x483   : > { %1105 = vrcp.f32 %v501_v17 }
 0x486   : > { %v506_v18 = vpop.permute.xlu1 %505 }
 0x487   : > { %v511_v19 = vsel %vm397_vm3, %v506_v18, 0 }
 0x488   : > { %1031 = vmatpush3.bf16.msra.mxu0 %v511_v19 }
 0x489   : > { %1042 = vmatprep.subr.bf16.mxu0 %v1122_v3 }
 0x490   : > { %v1106_v20 = vpop.eup %1105 }
 0x491   : > { %v503_v21 = vmul.f32 %v1106_v20, %v1100_v6 }
 0x492   : > { %v725_v22 = vpop.xlane.xlu0 %724 }
 0x493   : > { %v504_v23 = vpack.c.bf16 %v503_v21, %v503_v21 }
 0x495   : > { %1033 = vmatmul.mubr.msk.bf16.vlgmr.msra.gmra.mxu0 %vm393_vm4, %v504_v23 }
 0x496   : > { %v618_v24 = vpop.permute.xlu0 %617  ;;  %1044 = vmatprep.mubr.msk.bf16.mxu0 %vm1123_vm0, %v1122_v3 }
 0x497   : > { %v623_v8 = vsel %vm397_vm3, %v618_v24, 0 }
 0x498   : > { %1043 = vmatpush3.bf16.msra.mxu0 %v623_v8 }
 0x499   : > { %1054 = vmatprep.subr.bf16.mxu0 %v1122_v3 }
 0x4b7   : > { %v613_v25 = vpop.xlane.xlu1 %612 }
 0x4b8   : > { %1107 = vrcp.f32 %v613_v25 }
 0x4b9   : > { %1109 = vrcp.f32 %v725_v22 }
 0x4bb   : > { %v730_v27 = vpop.permute.xlu1 %729 }
 0x4bc   : > { %v735_v29 = vsel %vm397_vm3, %v730_v27, 0 }
 0x4c5   : > { %v1108_v26 = vpop.eup %1107 }
 0x4c6   : > { %v615_v28 = vmul.f32 %v1108_v26, %v1104_v15  ;;  %v1110_v31 = vpop.eup %1109 }
 0x4c7   : > { %v727_v32 = vmul.f32 %v1110_v31, %v1102_v10 }
 0x4c8   : > { %v616_v30 = vpack.c.bf16 %v615_v28, %v615_v28 }
 0x4c9   : > { %v728_v33 = vpack.c.bf16 %v727_v32, %v727_v32 }
 0x4ca   : > { %1045 = vmatmul.mubr.msk.bf16.vlgmr.msra.gmra.mxu0 %vm393_vm4, %v616_v30 }
 0x4cb   : > { %1055 = vmatpush3.bf16.msra.mxu0 %v735_v29  ;;  %1056 = vmatprep.mubr.msk.bf16.mxu0 %vm1123_vm0, %v1122_v3 }
 0x4d2   : > { %1057 = vmatmul.mubr.msk.bf16.vlgmr.msra.gmra.mxu0 %vm393_vm4, %v728_v33 }
 0x555   : > { %v547_v34 = vpop.f32.mrf.mxu0 }
 0x556   : > { %778 = vrot.lane.b32.xlu1 %v547_v34, %s1135_s21 }
 0x557   : > { %v1034_v35 = vpop.f32.mrf.mxu0 }
 0x559   : > { %v550_v36 = vpop.f32.mrf.mxu0 }
 0x55b   : > { %v1035_v37 = vpop.f32.mrf.mxu0 }
 0x58a   : > { %v659_v41 = vpop.f32.mrf.mxu0 }
 0x58b   : > { %782 = vrot.lane.b32.xlu0 %v659_v41, %s1136_s28 }
 0x58c   : > { %v1046_v42 = vpop.f32.mrf.mxu0 }
 0x58e   : > { %v662_v43 = vpop.f32.mrf.mxu0 }
 0x590   : > { %v1047_v44 = vpop.f32.mrf.mxu0 }
 0x592   : > { %v771_v45 = vpop.f32.mrf.mxu0 }
 0x593   : > { %786 = vrot.lane.b32.xlu1 %v771_v45, %s1137_s29 }
 0x594   : > { %v1058_v46 = vpop.f32.mrf.mxu0 }
 0x596   : > { %v774_v47 = vpop.f32.mrf.mxu0 }
 0x598   : > { %v1059_v48 = vpop.f32.mrf.mxu0 }
 0x5c8   : > { %v779_v49 = vpop.permute.xlu1 %778 }
 0x5c9   : > { %v789_v3 = vsel %vm323_vm1, %v1241_v39, %v779_v49 }
 0x5fd   : > { %v783_v50 = vpop.permute.xlu0 %782 }
 0x5fe   : > { %v791_v51 = vsel %vm790_vm5, %v789_v3, %v783_v50 }
 0x605   : > { %v787_v52 = vpop.permute.xlu1 %786 }
 0x606   : > { %v793_v53 = vsel %vm792_vm6, %v791_v51, %v787_v52 }
 0x607   : > { %v794_v54 = vpack.c.bf16 %v793_v53, %v793_v53 }
 0x609   : > { %1065 = vmatmul.mubr.msk.bf16.vlgmr.msra.gmra.mxu1 %vm813_vm7, %v794_v54 }
 0x6c9   : > { %v851_v58 = vpop.f32.mrf.mxu1 }
 0x6ca   : > { %v852_v59 = vadd.f32 %v985_v56, %v851_v58 }
 0x6cb   : > { %v1066_v60 = vpop.f32.mrf.mxu1 }
 0x6cc   : > { %v861_v39 = vadd.f32 %v860_v57, %v852_v59 }
 0x6cd   : > { %v854_v61 = vpop.f32.mrf.mxu1 }
 0x6ce   : > { %v863_v62 = vsel %vm862_vm8, %v861_v39, 0.0 }
 0x6cf   : > { %864 = vadd.xlane.f32.xlu0 %v863_v62  ;;  %v1067_v63 = vpop.f32.mrf.mxu1 }
 0x758   : > { %v865_v0 = vpop.xlane.xlu0 %864 }
 0x759   : > { %v867_v1 = vmul.f32 0.03125, %v865_v0 }
 0x75b   : > { %v868_v2 = vsub.f32 %v861_v39, %v867_v1 }
 0x75d   : > { %v869_v4 = vmul.f32 %v868_v2, %v868_v2 }
 0x75f   : > { %v870_v5 = vsel %vm862_vm8, %v869_v4, 0.0 }
 0x760   : > { %871 = vadd.xlane.f32.xlu1 %v870_v5 }
 0x7e9   : > { %v872_v6 = vpop.xlane.xlu1 %871 }
 0x7ea   : > { %v873_v7 = vmul.f32 0.03125, %v872_v6 }
 0x7ec   : > { %v874_v9 = vadd.f32 1e-12, %v873_v7 }
 0x7ee   : > { %1111 = vrsqrt.f32 %v874_v9 }
 0x7fb   : > { %v1112_v10 = vpop.eup %1111 }
 0x7fc   : > { %v876_v12 = vmul.f32 %v1112_v10, %v868_v2 }
 0x7fe   : > { %v883_v14 = vmul.f32 %v989_v11, %v876_v12 }
 0x800   : > { %v890_v15 = vadd.f32 %v990_v13, %v883_v14 }
 0x802   : > { %v891_v16 = vpack.c.bf16 %v890_v15, %v890_v15 }
 0x804   : > { %893 = vst.msk [vmem:[%s304_s18] sm:$0x3] %vm892_vm9, %v891_v16 }
 0x805 PF: > { %s17_s24 = sadd.s32 1, %s1119_s24  }
 0x806   : > { %p14_p4 = scmp.ge.s32.totalorder %s17_s24, 4  }
 0x808   :  { %16 = sbr.rel (!%p14_p4) target bundleno = 1 (0x1), region = 84 }

// kernel: visbert_forward.24
= control target key start
LH: loop header
LB: loop body
LE: loop exit
PB: predicated region body
PF: predicated region fallthrough
CT: control target
= control target key end

     0   :  { %v118_v0 = vmov 0.0   ;;  %vm119_vm0 = vmmov 0   ;;  %vm45_vm1 = vcmask 261120   ;;  %vm90_vm2 = vcmask 523264   ;;  %s158_s1 = inlined_call_operand.vmem [shape: bf16[32,64], index: 1, kind: input, shape index: {}]   ;;  %s159_s0 = inlined_call_operand.vmem [shape: bf16[16,32], index: 0, kind: input, shape index: {}]   ;;  %s160_s2 = inlined_call_operand.vmem [shape: f32[1,64], index: 2, kind: input, shape index: {}]   ;;  %s161_s3 = inlined_call_operand.vmem [shape: f32[16,64], index: 3, kind: output, shape index: {}]  }
   0x1   :  { %105 = vmatprep.subr.bf16.mxu0 %v118_v0  ;;  %v115_v1 = vld [vmem:[%s158_s1 + $0x8] sm:$0xff]   ;;  %109 = vmatprep.mubr.msk.bf16.mxu0 %vm119_vm0, %v118_v0  ;;  %v116_v2 = vld [vmem:[%s158_s1] sm:$0xff]  }
   0x2   :  { %106 = vmatpush3.bf16.msra.mxu0 %v115_v1  ;;  %v117_v3 = vld [vmem:[%s159_s0] sm:$0xff]  }
   0x3   :  { %107 = vmatprep.subr.bf16.mxu0 %v118_v0  ;;  %v97_v4 = vld [vmem:[%s160_s2] ss:$0 sm:$0xff] }
   0x6   :  { %108 = vmatpush3.bf16.msra.mxu0 %v116_v2 }
   0x9   :  { %110 = vmatmul.mubr.msk.bf16.vlgmr.msra.gmra.mxu0 %vm45_vm1, %v117_v3 }
  0xc9   :  { %v83_v5 = vpop.f32.mrf.mxu0 }
  0xca   :  { %v84_v6 = vadd.f32 %v97_v4, %v83_v5 }
  0xcb   :  { %v111_v7 = vpop.f32.mrf.mxu0 }
  0xcc   :  { %91 = vst.msk [vmem:[%s161_s3] sm:$0xff] %vm90_vm2, %v84_v6 }
  0xcd   :  { %v86_v8 = vpop.f32.mrf.mxu0 }
  0xce   :  { %v87_v9 = vadd.f32 %v97_v4, %v86_v8 }
  0xcf   :  { %v112_v10 = vpop.f32.mrf.mxu0 }
  0xd0   :  { %92 = vst.msk [vmem:[%s161_s3 + $0x8] sm:$0xff] %vm90_vm2, %v87_v9 }

// kernel: visbert_forward.22
= control target key start
LH: loop header
LB: loop body
LE: loop exit
PB: predicated region body
PF: predicated region fallthrough
CT: control target
= control target key end

     0   :  { %s1332_s27 = smov 0   ;;  %s1334_s28 = smov 0   ;;  %s1468_s0 = inlined_call_operand.vmem [shape: bf16[2,8,32], index: 0, kind: input, shape index: {}]   ;;  %s1469_s1 = inlined_call_operand.vmem [shape: bf16[2,4,64], index: 1, kind: input, shape index: {}]   ;;  %s1470_s2 = inlined_call_operand.vmem [shape: f32[2,1,4], index: 2, kind: input, shape index: {}]   ;;  %s1471_s3 = inlined_call_operand.vmem [shape: bf16[32,32], index: 3, kind: input, shape index: {}]   ;;  %s1472_s4 = inlined_call_operand.vmem [shape: f32[1,32], index: 4, kind: input, shape index: {}]   ;;  %s1473_s5 = inlined_call_operand.vmem [shape: bf16[2,8,32], index: 5, kind: input, shape index: {}]   ;;  %s1474_s6 = inlined_call_operand.vmem [shape: f32[1,32], index: 6, kind: input, shape index: {}]   ;;  %s1475_s7 = inlined_call_operand.vmem [shape: f32[1,32], index: 7, kind: input, shape index: {}]   ;;  %s1476_s8 = inlined_call_operand.vmem [shape: bf16[2,8,32], index: 8, kind: output, shape index: {}]  }
   0x1   :  { %s1336_s29 = smov 0  }
   0x2 LB: > { %s30_s30 = sadd.s32 1, %s1268_s28  ;;  %p1094_p0 = scmp.ge.s32.totalorder %s1272_s29, 1  ;;  %s1272_s29 = sphi %s1336_s29, %s18_s29   ;;  %s1268_s28 = sphi %s1334_s28, %s1478_s28   ;;  %s1264_s27 = sphi %s1332_s27, %s1477_s27  }
   0x3   : > { %p32_p1 = scmp.ge.s32.totalorder %s30_s30, 2  ;;  %p311_p2 = scmp.lt.s32.totalorder %s1272_s29, 3 }
   0x5   : > { %s1480_s30 = smov (%p32_p1, %s30_s30), 0  ;;  %p312_p3 = pnand %p1094_p0, %p311_p2 }
   0x6   : > { %p363_p4 = scmp.lt.s32.totalorder (!%p312_p3), %s1264_s27, 1  ;;  %s1277_s20 = smov (!%p312_p3), 96  }
   0x7   : > { %315 = sbr.rel (%p312_p3) target bundleno = 1889 (0x761), region = 52  ;;  %s1278_s21 = smov (!%p312_p3), 120  }
   0x8   : > { %s1279_s22 = smov (!%p312_p3), 112   ;;  %s1280_s23 = smov (!%p312_p3), 104  }
   0x9   : > { %s1281_s24 = smov (!%p312_p3), 88   ;;  %s1282_s25 = smov (!%p312_p3), 72  }
   0xa   : > { %s1283_s26 = smov (!%p312_p3), 80   ;;  %s1284_s10 = smov (!%p312_p3), 8  }
   0xb   : > { %s1285_s14 = smov (!%p312_p3), 16   ;;  %s1286_s15 = smov (!%p312_p3), 24  }
   0xc   : > { %v1274_v0 = vmov 0.0   ;;  %s1482_s27 = smov (!%p363_p4, %s1264_s27), 1  ;;  %vm1275_vm0 = vmmov 0   ;;  %vm400_vm1 = vcmask 64512   ;;  %vm455_vm2 = vcmask 31744  }
   0xd   : > { %1136 = vmatprep.subr.bf16.mxu0 %v1274_v0  ;;  %1142 = vmatprep.subr.bf16.mxu1 %v1274_v0  ;;  %s1096_s9 = sshll.u32 %s1482_s27, 1  ;;  %s1359_s13 = sshll.u32 %s1482_s27, 2  ;;  %v1276_v12 = vmov 1983009808   ;;  %v472_v14 = vlaneseq  ;;  %vm481_vm3 = vcmask 1041408   ;;  %vm877_vm4 = vcmask 130048  }
   0xe   : > { %1138 = vmatprep.mubr.msk.bf16.mxu0 %vm1275_vm0, %v1274_v0  ;;  %1144 = vmatprep.mubr.msk.bf16.mxu1 %vm1275_vm0, %v1274_v0  ;;  %s373_s12 = scalar_lea.vmem %s1469_s1, %s1096_s9  ;;  %s369_s16 = scalar_lea.vmem %s1468_s0, %s1359_s13  ;;  %v470_v13 = vunpack.c.l.s4 %v1276_v12  ;;  %vm879_vm5 = vcmask 195584   ;;  %vm900_vm6 = vcmask 261120   ;;  %vm978_vm7 = vcmask 257024  }
   0xf   : > { %v393_v1 = vld [vmem:[%s373_s12] sm:$0x3]  ;;  %s376_s19 = scalar_lea.vmem %s1470_s2, %s1482_s27  ;;  %v473_v16 = vshrl.u32 %v472_v14, 7  ;;  %s383_s18 = scalar_lea.vmem %s1473_s5, %s1359_s13 }
  0x10   : > { %v405_v2 = vsel %vm400_vm1, %v393_v1, 0  ;;  %v392_v3 = vld [vmem:[%s369_s16] sm:$0xf]  ;;  %v471_v15 = vunpack.c.0.s8 %v470_v13  ;;  %s390_s27 = scalar_lea.vmem %s1476_s8, %s1359_s13 }
  0x11   : > { %1137 = vmatpush3.bf16.xpose.msra.mxu0 %v405_v2  ;;  %v1373_v5 = vld [vmem:[%s376_s19] ss:$0 sm:$0xff]  ;;  %v1102_v19 = vcombine.low %v392_v3, %v392_v3 }
  0x12   : > { %1154 = vmatprep.subr.bf16.mxu0 %v1274_v0  ;;  %v474_v17 = vsub.s32 %v471_v15, %v473_v16 }
  0x14   : > { %v1377_v18 = vrot.slane %v393_v1, %v474_v17 }
  0x16   : > { %476 = vrot.lane.b32.xlu1 %v1377_v18, %s1277_s20 }
  0x18   : > { %1139 = vmatmul.mubr.msk.bf16.vlgmr.msra.gmra.mxu0 %vm400_vm1, %v392_v3 }
  0x19   : > { %1156 = vmatprep.mubr.msk.bf16.mxu0 %vm1275_vm0, %v1274_v0 }
  0x1a   : > { %530 = vrot.lane.b32.xlu1 %v1377_v18, %s1278_s21 }
  0x1e   : > { %642 = vrot.lane.b32.xlu1 %v1377_v18, %s1279_s22 }
  0x22   : > { %640 = vrot.lane.b32.xlu1 %v1102_v19, %s1279_s22 }
  0x26   : > { %754 = vrot.lane.b32.xlu1 %v1377_v18, %s1280_s23 }
  0x2a   : > { %752 = vrot.lane.b32.xlu1 %v1102_v19, %s1280_s23 }
  0x88   : > { %v477_v25 = vpop.permute.xlu1 %476 }
  0x89   : > { %v483_v26 = vsel %vm481_vm3, %v477_v25, 0 }
  0x8a   : > { %1143 = vmatpush3.bf16.msra.mxu1 %v483_v26 }
  0x8b   : > { %1148 = vmatprep.subr.bf16.mxu1 %v1274_v0 }
  0x8c   : > { %v531_v29 = vpop.permute.xlu1 %530 }
  0x8d   : > { %v536_v31 = vsel %vm400_vm1, %v531_v29, 0 }
  0x90   : > { %v643_v33 = vpop.permute.xlu1 %642 }
  0x91   : > { %v648_v36 = vsel %vm400_vm1, %v643_v33, 0 }
  0x94   : > { %v641_v35 = vpop.permute.xlu1 %640 }
  0x98   : > { %v755_v37 = vpop.permute.xlu1 %754 }
  0x99   : > { %v760_v38 = vsel %vm400_vm1, %v755_v37, 0 }
  0x9c   : > { %v753_v39 = vpop.permute.xlu1 %752 }
  0xd8   : > { %v441_v4 = vpop.f32.mrf.mxu0 }
  0xd9   : > { %v447_v6 = vmul.f32 0.35355338, %v441_v4 }
  0xda   : > { %v1140_v7 = vpop.f32.mrf.mxu0 }
  0xdb   : > { %v454_v8 = vadd.f32 %v1373_v5, %v447_v6 }
  0xdc   : > { %v444_v9 = vpop.f32.mrf.mxu0 }
  0xdd   : > { %v456_v10 = vsel %vm455_vm2, %v454_v8, -inf }
  0xde   : > { %457 = vmax.xlane.f32.xlu0 %v456_v10  ;;  %v1141_v11 = vpop.f32.mrf.mxu0 }
 0x167   : > { %v458_v20 = vpop.xlane.xlu0 %457 }
 0x168   : > { %v459_v21 = vsub.f32 %v454_v8, %v458_v20 }
 0x16a   : > { %v460_v22 = vmul.f32 1.442695, %v459_v21 }
 0x16c   : > { %1232 = vpow2.f32 %v460_v22 }
 0x179   : > { %v1233_v23 = vpop.eup %1232 }
 0x17a   : > { %v462_v24 = vsel %vm455_vm2, %v1233_v23, 0.0 }
 0x17b   : > { %463 = vadd.xlane.f32.xlu0 %v462_v24 }
 0x191   : > { %528 = vrot.lane.b32.xlu0 %v1102_v19, %s1278_s21 }
 0x204   : > { %v464_v27 = vpop.xlane.xlu0 %463 }
 0x205   : > { %1234 = vrcp.f32 %v464_v27 }
 0x208   : > { %v529_v34 = vpop.permute.xlu0 %528 }
 0x212   : > { %v1235_v28 = vpop.eup %1234 }
 0x213   : > { %v466_v30 = vmul.f32 %v1235_v28, %v1233_v23 }
 0x215   : > { %v467_v32 = vpack.c.bf16 %v466_v30, %v466_v30 }
 0x217   : > { %1145 = vmatmul.mubr.msk.bf16.vlgmr.msra.gmra.mxu1 %vm455_vm2, %v467_v32 }
 0x218   : > { %1149 = vmatpush3.bf16.xpose.msra.mxu1 %v536_v31  ;;  %1150 = vmatprep.mubr.msk.bf16.mxu1 %vm1275_vm0, %v1274_v0 }
 0x219   : > { %1160 = vmatprep.subr.bf16.mxu1 %v1274_v0 }
 0x21f   : > { %1151 = vmatmul.mubr.msk.bf16.vlgmr.msra.gmra.mxu1 %vm400_vm1, %v529_v34 }
 0x220   : > { %1161 = vmatpush3.bf16.xpose.msra.mxu1 %v648_v36  ;;  %1162 = vmatprep.mubr.msk.bf16.mxu1 %vm1275_vm0, %v1274_v0 }
 0x221   : > { %1172 = vmatprep.subr.bf16.mxu1 %v1274_v0 }
 0x227   : > { %1163 = vmatmul.mubr.msk.bf16.vlgmr.msra.gmra.mxu1 %vm400_vm1, %v641_v35  ;;  %v1230_v35 = vld [vmem:[%s1471_s3 + $0x8] sm:$0xff]  }
 0x228   : > { %1173 = vmatpush3.bf16.xpose.msra.mxu1 %v760_v38  ;;  %1174 = vmatprep.mubr.msk.bf16.mxu1 %vm1275_vm0, %v1274_v0  ;;  %v1231_v38 = vld [vmem:[%s1471_s3] sm:$0xff]  }
 0x229   : > { %1184 = vmatprep.subr.bf16.mxu1 %v1274_v0 }
 0x22f   : > { %1175 = vmatmul.mubr.msk.bf16.vlgmr.msra.gmra.mxu1 %vm400_vm1, %v753_v39 }
 0x230   : > { %1188 = vmatprep.mubr.msk.bf16.mxu1 %vm1275_vm0, %v1274_v0  ;;  %1185 = vmatpush3.bf16.msra.mxu1 %v1230_v35 }
 0x231   : > { %1186 = vmatprep.subr.bf16.mxu1 %v1274_v0 }
 0x234   : > { %1187 = vmatpush3.bf16.msra.mxu1 %v1231_v38 }
 0x2d7   : > { %v1404_v40 = vpop.f32.mrf.mxu1 }
 0x2d9   : > { %v1146_v41 = vpop.f32.mrf.mxu1 }
 0x2db   : > { %v522_v42 = vpop.f32.mrf.mxu1 }
 0x2dd   : > { %v1147_v43 = vpop.f32.mrf.mxu1 }
 0x2df   : > { %v572_v44 = vpop.f32.mrf.mxu1 }
 0x2e0   : > { %v578_v45 = vmul.f32 0.35355338, %v572_v44 }
 0x2e1   : > { %v1152_v46 = vpop.f32.mrf.mxu1 }
 0x2e2   : > { %v579_v47 = vadd.f32 %v1373_v5, %v578_v45 }
 0x2e3   : > { %v575_v48 = vpop.f32.mrf.mxu1 }
 0x2e4   : > { %v580_v49 = vsel %vm455_vm2, %v579_v47, -inf }
 0x2e5   : > { %581 = vmax.xlane.f32.xlu1 %v580_v49  ;;  %v1153_v50 = vpop.f32.mrf.mxu1 }
 0x2e7   : > { %v684_v51 = vpop.f32.mrf.mxu1 }
 0x2e8   : > { %v690_v52 = vmul.f32 0.35355338, %v684_v51 }
 0x2e9   : > { %v1164_v53 = vpop.f32.mrf.mxu1 }
 0x2ea   : > { %v691_v54 = vadd.f32 %v1373_v5, %v690_v52 }
 0x2eb   : > { %v687_v55 = vpop.f32.mrf.mxu1 }
 0x2ec   : > { %v692_v56 = vsel %vm455_vm2, %v691_v54, -inf }
 0x2ed   : > { %693 = vmax.xlane.f32.xlu0 %v692_v56  ;;  %v1165_v57 = vpop.f32.mrf.mxu1  ;;  %v944_v56 = vld [vmem:[%s383_s18] sm:$0xf] }
 0x2ee   : > { %v1109_v57 = vld [vmem:[%s1472_s4] ss:$0 sm:$0xff] }
 0x2ef   : > { %v796_v58 = vpop.f32.mrf.mxu1 }
 0x2f0   : > { %v802_v59 = vmul.f32 0.35355338, %v796_v58  ;;  %v947_v58 = vunpack.c.l.bf16 %v944_v56 }
 0x2f1   : > { %v1176_v60 = vpop.f32.mrf.mxu1 }
 0x2f2   : > { %v803_v61 = vadd.f32 %v1373_v5, %v802_v59 }
 0x2f3   : > { %v799_v62 = vpop.f32.mrf.mxu1 }
 0x2f4   : > { %v804_v63 = vsel %vm455_vm2, %v803_v61, -inf }
 0x2f5   : > { %805 = vmax.xlane.f32.xlu1 %v804_v63  ;;  %v1177_v1 = vpop.f32.mrf.mxu1 }
 0x306   : > { %592 = vrot.lane.b32.xlu1 %v1377_v18, %s1281_s24 }
 0x36e   : > { %v582_v2 = vpop.xlane.xlu1 %581 }
 0x36f   : > { %v583_v3 = vsub.f32 %v579_v47, %v582_v2 }
 0x371   : > { %v584_v4 = vmul.f32 1.442695, %v583_v3 }
 0x373   : > { %1236 = vpow2.f32 %v584_v4 }
 0x376   : > { %v694_v6 = vpop.xlane.xlu0 %693 }
 0x377   : > { %v695_v7 = vsub.f32 %v691_v54, %v694_v6 }
 0x379   : > { %v696_v8 = vmul.f32 1.442695, %v695_v7 }
 0x37b   : > { %1238 = vpow2.f32 %v696_v8 }
 0x37e   : > { %v806_v9 = vpop.xlane.xlu1 %805 }
 0x37f   : > { %v807_v10 = vsub.f32 %v803_v61, %v806_v9 }
 0x380   : > { %v1237_v11 = vpop.eup %1236 }
 0x381   : > { %v808_v5 = vmul.f32 1.442695, %v807_v10  ;;  %v586_v12 = vsel %vm455_vm2, %v1237_v11, 0.0 }
 0x382   : > { %587 = vadd.xlane.f32.xlu0 %v586_v12  ;;  %v593_v13 = vpop.permute.xlu1 %592 }
 0x383   : > { %1240 = vpow2.f32 %v808_v5  ;;  %v598_v14 = vsel %vm481_vm3, %v593_v13, 0  ;;  %v1113_v5 = vld [vmem:[%s1474_s6] ss:$0 sm:$0xff] }
 0x384   : > { %1155 = vmatpush3.bf16.msra.mxu0 %v598_v14  ;;  %v1114_v13 = vld [vmem:[%s1475_s7] ss:$0 sm:$0xff] }
 0x385   : > { %1166 = vmatprep.subr.bf16.mxu0 %v1274_v0 }
 0x388   : > { %v1239_v15 = vpop.eup %1238 }
 0x389   : > { %v698_v16 = vsel %vm455_vm2, %v1239_v15, 0.0 }
 0x38a   : > { %699 = vadd.xlane.f32.xlu1 %v698_v16 }
 0x390   : > { %v1241_v17 = vpop.eup %1240 }
 0x391   : > { %v810_v19 = vsel %vm455_vm2, %v1241_v17, 0.0 }
 0x392   : > { %811 = vadd.xlane.f32.xlu0 %v810_v19 }
 0x39b   : > { %816 = vrot.lane.b32.xlu1 %v1377_v18, %s1282_s25 }
 0x3a8   : > { %704 = vrot.lane.b32.xlu0 %v1377_v18, %s1283_s26 }
 0x40b   : > { %v588_v20 = vpop.xlane.xlu0 %587 }
 0x40c   : > { %1242 = vrcp.f32 %v588_v20 }
 0x413   : > { %v700_v21 = vpop.xlane.xlu1 %699 }
 0x414   : > { %1244 = vrcp.f32 %v700_v21 }
 0x417   : > { %v817_v18 = vpop.permute.xlu1 %816 }
 0x418   : > { %v822_v31 = vsel %vm481_vm3, %v817_v18, 0 }
 0x419   : > { %v1243_v22 = vpop.eup %1242 }
 0x41a   : > { %v590_v23 = vmul.f32 %v1243_v22, %v1237_v11 }
 0x41b   : > { %v812_v24 = vpop.xlane.xlu0 %811 }
 0x41c   : > { %1246 = vrcp.f32 %v812_v24  ;;  %v591_v25 = vpack.c.bf16 %v590_v23, %v590_v23 }
 0x41e   : > { %1157 = vmatmul.mubr.msk.bf16.vlgmr.msra.gmra.mxu0 %vm455_vm2, %v591_v25 }
 0x41f   : > { %v705_v26 = vpop.permute.xlu0 %704  ;;  %1168 = vmatprep.mubr.msk.bf16.mxu0 %vm1275_vm0, %v1274_v0 }
 0x420   : > { %v710_v27 = vsel %vm481_vm3, %v705_v26, 0 }
 0x421   : > { %v1245_v28 = vpop.eup %1244  ;;  %1167 = vmatpush3.bf16.msra.mxu0 %v710_v27 }
 0x422   : > { %v702_v29 = vmul.f32 %v1245_v28, %v1239_v15  ;;  %1178 = vmatprep.subr.bf16.mxu0 %v1274_v0 }
 0x424   : > { %v703_v30 = vpack.c.bf16 %v702_v29, %v702_v29 }
 0x426   : > { %1169 = vmatmul.mubr.msk.bf16.vlgmr.msra.gmra.mxu0 %vm455_vm2, %v703_v30 }
 0x427   : > { %1179 = vmatpush3.bf16.msra.mxu0 %v822_v31  ;;  %1180 = vmatprep.mubr.msk.bf16.mxu0 %vm1275_vm0, %v1274_v0 }
 0x429   : > { %v1247_v32 = vpop.eup %1246 }
 0x42a   : > { %v814_v33 = vmul.f32 %v1247_v32, %v1241_v17 }
 0x42c   : > { %v815_v34 = vpack.c.bf16 %v814_v33, %v814_v33 }
 0x42e   : > { %1181 = vmatmul.mubr.msk.bf16.vlgmr.msra.gmra.mxu0 %vm455_vm2, %v815_v34 }
 0x4de   : > { %v634_v36 = vpop.f32.mrf.mxu0 }
 0x4df   : > { %865 = vrot.lane.b32.xlu1 %v634_v36, %s1284_s10 }
 0x4e0   : > { %v1158_v37 = vpop.f32.mrf.mxu0 }
 0x4e2   : > { %v637_v39 = vpop.f32.mrf.mxu0 }
 0x4e4   : > { %v1159_v41 = vpop.f32.mrf.mxu0 }
 0x4e6   : > { %v746_v42 = vpop.f32.mrf.mxu0 }
 0x4e7   : > { %869 = vrot.lane.b32.xlu0 %v746_v42, %s1285_s14 }
 0x4e8   : > { %v1170_v43 = vpop.f32.mrf.mxu0 }
 0x4ea   : > { %v749_v44 = vpop.f32.mrf.mxu0 }
 0x4ec   : > { %v1171_v45 = vpop.f32.mrf.mxu0 }
 0x4ee   : > { %v858_v46 = vpop.f32.mrf.mxu0 }
 0x4ef   : > { %873 = vrot.lane.b32.xlu1 %v858_v46, %s1286_s15 }
 0x4f0   : > { %v1182_v0 = vpop.f32.mrf.mxu0 }
 0x4f2   : > { %v861_v47 = vpop.f32.mrf.mxu0 }
 0x4f4   : > { %v1183_v48 = vpop.f32.mrf.mxu0 }
 0x551   : > { %v866_v49 = vpop.permute.xlu1 %865 }
 0x552   : > { %v876_v51 = vsel %vm400_vm1, %v1404_v40, %v866_v49 }
 0x559   : > { %v870_v50 = vpop.permute.xlu0 %869 }
 0x55a   : > { %v878_v52 = vsel %vm877_vm4, %v876_v51, %v870_v50 }
 0x561   : > { %v874_v53 = vpop.permute.xlu1 %873 }
 0x562   : > { %v880_v54 = vsel %vm879_vm5, %v878_v52, %v874_v53 }
 0x563   : > { %v881_v55 = vpack.c.bf16 %v880_v54, %v880_v54 }
 0x565   : > { %1189 = vmatmul.mubr.msk.bf16.vlgmr.msra.gmra.mxu1 %vm900_vm6, %v881_v55 }
 0x625   : > { %v938_v59 = vpop.f32.mrf.mxu1 }
 0x626   : > { %v939_v60 = vadd.f32 %v1109_v57, %v938_v59 }
 0x627   : > { %v1190_v40 = vpop.f32.mrf.mxu1 }
 0x628   : > { %v948_v61 = vadd.f32 %v947_v58, %v939_v60 }
 0x629   : > { %v941_v62 = vpop.f32.mrf.mxu1 }
 0x62a   : > { %v949_v63 = vsel %vm900_vm6, %v948_v61, 0.0 }
 0x62b   : > { %950 = vadd.xlane.f32.xlu0 %v949_v63  ;;  %v1191_v1 = vpop.f32.mrf.mxu1 }
 0x6b4   : > { %v951_v2 = vpop.xlane.xlu0 %950 }
 0x6b5   : > { %v953_v3 = vmul.f32 0.03125, %v951_v2 }
 0x6b7   : > { %v954_v4 = vsub.f32 %v948_v61, %v953_v3 }
 0x6b9   : > { %v955_v6 = vmul.f32 %v954_v4, %v954_v4 }
 0x6bb   : > { %v956_v7 = vsel %vm900_vm6, %v955_v6, 0.0 }
 0x6bc   : > { %957 = vadd.xlane.f32.xlu1 %v956_v7 }
 0x745   : > { %v958_v8 = vpop.xlane.xlu1 %957 }
 0x746   : > { %v959_v9 = vmul.f32 0.03125, %v958_v8 }
 0x748   : > { %v960_v10 = vadd.f32 1e-12, %v959_v9 }
 0x74a   : > { %1248 = vrsqrt.f32 %v960_v10 }
 0x757   : > { %v1249_v11 = vpop.eup %1248 }
 0x758   : > { %v962_v12 = vmul.f32 %v1249_v11, %v954_v4 }
 0x75a   : > { %v969_v14 = vmul.f32 %v1113_v5, %v962_v12 }
 0x75c   : > { %v976_v15 = vadd.f32 %v1114_v13, %v969_v14 }
 0x75e   : > { %v977_v16 = vpack.c.bf16 %v976_v15, %v976_v15 }
 0x760   : > { %979 = vst.msk [vmem:[%s390_s27] sm:$0xf] %vm978_vm7, %v977_v16 }
 0x761 PF: > { %s18_s29 = sadd.s32 1, %s1272_s29   ;;  %s1477_s27 = smov %s1268_s28 }
 0x762   : > { %p15_p5 = scmp.ge.s32.totalorder %s18_s29, 4   ;;  %s1478_s28 = smov %s1480_s30 }
 0x764   :  { %17 = sbr.rel (!%p15_p5) target bundleno = 2 (0x2), region = 91 }

// kernel: visbert_forward.25
= control target key start
LH: loop header
LB: loop body
LE: loop exit
PB: predicated region body
PF: predicated region fallthrough
CT: control target
= control target key end

     0   :  { %11 = vsyncpa [#allocation3], 0  ;;  %v933_v1 = vmov 0.0   ;;  %vm934_vm0 = vmmov 0   ;;  %s1089_s0 = inlined_call_operand.vmem [shape: f32[8,2,64], index: 0, kind: input, shape index: {}]   ;;  %s1090_s1 = inlined_call_operand.vmem [shape: bf16[16,64], index: 1, kind: input, shape index: {}]   ;;  %s1091_s2 = inlined_call_operand.vmem [shape: bf16[16,8], index: 2, kind: input, shape index: {}]   ;;  %s1092_s3 = inlined_call_operand.vmem [shape: f32[1,8], index: 3, kind: input, shape index: {}]   ;;  %s1093_s4 = inlined_call_operand.hbm [shape: f32[2,16], index: 4, kind: output, shape index: {0}]   ;;  %s1094_s5 = inlined_call_operand.hbm [shape: f32[2,8], index: 5, kind: output, shape index: {1}]  }
   0x1   :  { %v975_v0 = vld [vmem:[%s1090_s1] sm:$0xff]   ;;  %760 = vmatprep.subr.bf16.mxu0 %v933_v1  ;;  %766 = vmatprep.subr.bf16.mxu1 %v933_v1 }
   0x2   :  { %761 = vmatpush3.bf16.msra.mxu0 %v975_v0  ;;  %762 = vmatprep.mubr.msk.bf16.mxu0 %vm934_vm0, %v933_v1 }
   0x3   :  { %12 = vsyncpa [#allocation5], 0  ;;  %767 = vmatpush3.bf16.msra.mxu1 %v975_v0  ;;  %768 = vmatprep.mubr.msk.bf16.mxu1 %vm934_vm0, %v933_v1  ;;  %v935_v2 = vmov 0   ;;  %v22_v3 = vld [vmem:[%s1089_s0] sm:$0x3]  ;;  %s936_s21 = smov 96  }
   0x4   :  { %772 = vmatprep.subr.bf16.mxu0 %v933_v1  ;;  %778 = vmatprep.subr.bf16.mxu1 %v933_v1  ;;  %s937_s22 = smov 16   ;;  %s938_s23 = smov 32   ;;  %vm31_vm1 = vcmask 130048   ;;  %v718_v24 = vld [vmem:[%s1089_s0 + $0x2] sm:$0x3]  ;;  %vm622_vm2 = vcmask 123904  }
   0x5   :  { %763 = vmatmul.mubr.bf16.vlgmr.msra.gmra.mxu0 %v935_v2  ;;  %s939_s24 = smov 80   ;;  %v721_v45 = vld [vmem:[%s1089_s0 + $0x4] sm:$0x3]  ;;  %s940_s15 = smov [#allocation2]  }
   0x6   :  { %773 = vmatpush3.bf16.msra.mxu0 %v975_v0  ;;  %774 = vmatprep.mubr.msk.bf16.mxu0 %vm934_vm0, %v933_v1  ;;  %s694_s16 = sshll.u32 %s940_s15, 4  ;;  %s695_s16 = int_to_ptr.vmem [resolvable:$true] %s694_s16 }
   0x7   :  { %784 = vmatprep.subr.bf16.mxu0 %v933_v1  ;;  %p894_p1 = scmp.lt.s32.totalorder %s695_s16, %s695_s16 }
  0xc5   :  { %v69_v4 = vpop.f32.mrf.mxu0 }
  0xc6   :  { %v75_v5 = vadd.f32 %v69_v4, %v22_v3  ;;  %v724_v4 = vld [vmem:[%s1089_s0 + $0x6] sm:$0x3] }
  0xc7   :  { %v764_v6 = vpop.f32.mrf.mxu0 }
  0xc8   :  { %825 = vtanh.f32 %v75_v5  ;;  %v717_v10 = vmul.f32 -1.442695, %v75_v5 }
  0xc9   :  { %v72_v7 = vpop.f32.mrf.mxu0 }
  0xca   :  { %827 = vpow2.f32 %v717_v10 }
  0xcb   :  { %v765_v8 = vpop.f32.mrf.mxu0 }
  0xd5   :  { %v826_v9 = vpop.eup %825 }
  0xd6   :  { %85 = vrot.lane.b32.xlu0 %v826_v9, %s936_s21 }
  0xd7   :  { %v828_v11 = vpop.eup %827 }
  0xd8   :  { %v79_v12 = vadd.f32 1.0, %v828_v11 }
  0xda   :  { %829 = vrcp.f32 %v79_v12 }
  0xe7   :  { %v830_v13 = vpop.eup %829 }
  0xe8   :  { %v83_v16 = vmul.f32 0.0, %v830_v13 }
 0x148   :  { %v86_v14 = vpop.permute.xlu0 %85 }
 0x149   :  { %v88_v15 = vmul.f32 %v830_v13, %v86_v14 }
 0x14b   :  { %90 = vrot.lane.b32.xlu0 %v88_v15, %s937_s22 }
 0x1bd   :  { %v91_v17 = vpop.permute.xlu0 %90 }
 0x1be   :  { %v93_v18 = vadd.f32 %v91_v17, %v83_v16 }
 0x1c0   :  { %831 = vtanh.f32 %v93_v18 }
 0x1cd   :  { %v832_v19 = vpop.eup %831 }
 0x1ce   :  { %96 = vrot.lane.b32.xlu1 %v832_v19, %s938_s23 }
 0x240   :  { %v97_v20 = vpop.permute.xlu1 %96 }
 0x241   :  { %v99_v21 = vmul.f32 %v830_v13, %v97_v20 }
 0x243   :  { %v102_v22 = vpack.c.bf16 %v99_v21, %v99_v21 }
 0x245   :  { %104 = vrot.lane.b32.xlu1 %v102_v22, %s939_s24 }
 0x2b7   :  { %v105_v23 = vpop.permute.xlu1 %104 }
 0x2b8   :  { %769 = vmatmul.mubr.msk.bf16.vlgmr.msra.gmra.mxu1 %vm31_vm1, %v105_v23 }
 0x2b9   :  { %779 = vmatpush3.bf16.msra.mxu1 %v975_v0  ;;  %780 = vmatprep.mubr.msk.bf16.mxu1 %vm934_vm0, %v933_v1 }
 0x2ba   :  { %790 = vmatprep.subr.bf16.mxu1 %v933_v1 }
 0x378   :  { %v143_v25 = vpop.f32.mrf.mxu1 }
 0x379   :  { %v149_v26 = vadd.f32 %v718_v24, %v143_v25  ;;  %v727_v25 = vld [vmem:[%s1089_s0 + $0x8] sm:$0x3] }
 0x37a   :  { %v770_v27 = vpop.f32.mrf.mxu1 }
 0x37b   :  { %833 = vtanh.f32 %v149_v26  ;;  %v720_v31 = vmul.f32 -1.442695, %v149_v26 }
 0x37c   :  { %v146_v28 = vpop.f32.mrf.mxu1 }
 0x37d   :  { %835 = vpow2.f32 %v720_v31 }
 0x37e   :  { %v771_v29 = vpop.f32.mrf.mxu1 }
 0x388   :  { %v834_v30 = vpop.eup %833 }
 0x389   :  { %159 = vrot.lane.b32.xlu0 %v834_v30, %s936_s21 }
 0x38a   :  { %v836_v32 = vpop.eup %835 }
 0x38b   :  { %v153_v33 = vadd.f32 1.0, %v836_v32 }
 0x38d   :  { %837 = vrcp.f32 %v153_v33 }
 0x39a   :  { %v838_v34 = vpop.eup %837 }
 0x39b   :  { %v157_v37 = vmul.f32 %v838_v34, %v93_v18 }
 0x3fb   :  { %v160_v35 = vpop.permute.xlu0 %159 }
 0x3fc   :  { %v162_v36 = vmul.f32 %v838_v34, %v160_v35 }
 0x3fe   :  { %164 = vrot.lane.b32.xlu1 %v162_v36, %s937_s22 }
 0x470   :  { %v165_v38 = vpop.permute.xlu1 %164 }
 0x471   :  { %v167_v39 = vadd.f32 %v165_v38, %v157_v37 }
 0x473   :  { %839 = vtanh.f32 %v167_v39 }
 0x480   :  { %v840_v40 = vpop.eup %839 }
 0x481   :  { %170 = vrot.lane.b32.xlu0 %v840_v40, %s938_s23 }
 0x4f3   :  { %v171_v41 = vpop.permute.xlu0 %170 }
 0x4f4   :  { %v173_v42 = vmul.f32 %v838_v34, %v171_v41 }
 0x4f6   :  { %v176_v43 = vpack.c.bf16 %v173_v42, %v173_v42 }
 0x4f8   :  { %178 = vrot.lane.b32.xlu1 %v176_v43, %s939_s24 }
 0x56a   :  { %v179_v44 = vpop.permute.xlu1 %178 }
 0x56b   :  { %775 = vmatmul.mubr.msk.bf16.vlgmr.msra.gmra.mxu0 %vm31_vm1, %v179_v44 }
 0x56c   :  { %785 = vmatpush3.bf16.msra.mxu0 %v975_v0  ;;  %786 = vmatprep.mubr.msk.bf16.mxu0 %vm934_vm0, %v933_v1 }
 0x56d   :  { %796 = vmatprep.subr.bf16.mxu0 %v933_v1 }
 0x62b   :  { %v217_v46 = vpop.f32.mrf.mxu0 }
 0x62c   :  { %v223_v47 = vadd.f32 %v721_v45, %v217_v46  ;;  %v730_v46 = vld [vmem:[%s1089_s0 + $0xa] sm:$0x3] }
 0x62d   :  { %v776_v48 = vpop.f32.mrf.mxu0 }
 0x62e   :  { %841 = vtanh.f32 %v223_v47  ;;  %v723_v52 = vmul.f32 -1.442695, %v223_v47 }
 0x62f   :  { %v220_v49 = vpop.f32.mrf.mxu0 }
 0x630   :  { %843 = vpow2.f32 %v723_v52 }
 0x631   :  { %v777_v50 = vpop.f32.mrf.mxu0 }
 0x63b   :  { %v842_v51 = vpop.eup %841 }
 0x63c   :  { %233 = vrot.lane.b32.xlu0 %v842_v51, %s936_s21 }
 0x63d   :  { %v844_v53 = vpop.eup %843 }
 0x63e   :  { %v227_v54 = vadd.f32 1.0, %v844_v53 }
 0x640   :  { %845 = vrcp.f32 %v227_v54 }
 0x64d   :  { %v846_v55 = vpop.eup %845 }
 0x64e   :  { %v231_v58 = vmul.f32 %v846_v55, %v167_v39 }
 0x6ae   :  { %v234_v56 = vpop.permute.xlu0 %233 }
 0x6af   :  { %v236_v57 = vmul.f32 %v846_v55, %v234_v56 }
 0x6b1   :  { %238 = vrot.lane.b32.xlu1 %v236_v57, %s937_s22 }
 0x723   :  { %v239_v59 = vpop.permute.xlu1 %238 }
 0x724   :  { %v241_v60 = vadd.f32 %v239_v59, %v231_v58 }
 0x726   :  { %847 = vtanh.f32 %v241_v60 }
 0x733   :  { %v848_v61 = vpop.eup %847 }
 0x734   :  { %244 = vrot.lane.b32.xlu0 %v848_v61, %s938_s23 }
 0x7a6   :  { %v245_v62 = vpop.permute.xlu0 %244 }
 0x7a7   :  { %v247_v63 = vmul.f32 %v846_v55, %v245_v62 }
 0x7a9   :  { %v250_v2 = vpack.c.bf16 %v247_v63, %v247_v63 }
 0x7ab   :  { %252 = vrot.lane.b32.xlu1 %v250_v2, %s939_s24 }
 0x81d   :  { %v253_v3 = vpop.permute.xlu1 %252 }
 0x81e   :  { %781 = vmatmul.mubr.msk.bf16.vlgmr.msra.gmra.mxu1 %vm31_vm1, %v253_v3 }
 0x81f   :  { %791 = vmatpush3.bf16.msra.mxu1 %v975_v0  ;;  %792 = vmatprep.mubr.msk.bf16.mxu1 %vm934_vm0, %v933_v1 }
 0x820   :  { %802 = vmatprep.subr.bf16.mxu1 %v933_v1 }
 0x8de   :  { %v291_v5 = vpop.f32.mrf.mxu1 }
 0x8df   :  { %v297_v6 = vadd.f32 %v724_v4, %v291_v5  ;;  %v733_v4 = vld [vmem:[%s1089_s0 + $0xc] sm:$0x3] }
 0x8e0   :  { %v782_v7 = vpop.f32.mrf.mxu1 }
 0x8e1   :  { %849 = vtanh.f32 %v297_v6  ;;  %v726_v11 = vmul.f32 -1.442695, %v297_v6 }
 0x8e2   :  { %v294_v8 = vpop.f32.mrf.mxu1 }
 0x8e3   :  { %851 = vpow2.f32 %v726_v11 }
 0x8e4   :  { %v783_v9 = vpop.f32.mrf.mxu1 }
 0x8ee   :  { %v850_v10 = vpop.eup %849 }
 0x8ef   :  { %307 = vrot.lane.b32.xlu0 %v850_v10, %s936_s21 }
 0x8f0   :  { %v852_v12 = vpop.eup %851 }
 0x8f1   :  { %v301_v13 = vadd.f32 1.0, %v852_v12 }
 0x8f3   :  { %853 = vrcp.f32 %v301_v13 }
 0x900   :  { %v854_v14 = vpop.eup %853 }
 0x901   :  { %v305_v17 = vmul.f32 %v854_v14, %v241_v60 }
 0x961   :  { %v308_v15 = vpop.permute.xlu0 %307 }
 0x962   :  { %v310_v16 = vmul.f32 %v854_v14, %v308_v15 }
 0x964   :  { %312 = vrot.lane.b32.xlu1 %v310_v16, %s937_s22 }
 0x9d6   :  { %v313_v18 = vpop.permute.xlu1 %312 }
 0x9d7   :  { %v315_v19 = vadd.f32 %v313_v18, %v305_v17 }
 0x9d9   :  { %855 = vtanh.f32 %v315_v19 }
 0x9e6   :  { %v856_v20 = vpop.eup %855 }
 0x9e7   :  { %318 = vrot.lane.b32.xlu0 %v856_v20, %s938_s23 }
 0xa59   :  { %v319_v21 = vpop.permute.xlu0 %318 }
 0xa5a   :  { %v321_v22 = vmul.f32 %v854_v14, %v319_v21 }
 0xa5c   :  { %v324_v23 = vpack.c.bf16 %v321_v22, %v321_v22 }
 0xa5e   :  { %326 = vrot.lane.b32.xlu1 %v324_v23, %s939_s24 }
 0xad0   :  { %v327_v24 = vpop.permute.xlu1 %326 }
 0xad1   :  { %787 = vmatmul.mubr.msk.bf16.vlgmr.msra.gmra.mxu0 %vm31_vm1, %v327_v24  ;;  %v736_v24 = vld [vmem:[%s1089_s0 + $0xe] sm:$0x3] }
 0xad2   :  { %797 = vmatpush3.bf16.msra.mxu0 %v975_v0  ;;  %798 = vmatprep.mubr.msk.bf16.mxu0 %vm934_vm0, %v933_v1 }
 0xad3   :  { %808 = vmatprep.subr.bf16.mxu0 %v933_v1 }
 0xb91   :  { %v365_v26 = vpop.f32.mrf.mxu0 }
 0xb92   :  { %v371_v27 = vadd.f32 %v727_v25, %v365_v26 }
 0xb93   :  { %v788_v28 = vpop.f32.mrf.mxu0 }
 0xb94   :  { %857 = vtanh.f32 %v371_v27  ;;  %v729_v32 = vmul.f32 -1.442695, %v371_v27 }
 0xb95   :  { %v368_v29 = vpop.f32.mrf.mxu0 }
 0xb96   :  { %859 = vpow2.f32 %v729_v32 }
 0xb97   :  { %v789_v30 = vpop.f32.mrf.mxu0 }
 0xba1   :  { %v858_v31 = vpop.eup %857 }
 0xba2   :  { %381 = vrot.lane.b32.xlu0 %v858_v31, %s936_s21 }
 0xba3   :  { %v860_v33 = vpop.eup %859 }
 0xba4   :  { %v375_v34 = vadd.f32 1.0, %v860_v33 }
 0xba6   :  { %861 = vrcp.f32 %v375_v34 }
 0xbb3   :  { %v862_v35 = vpop.eup %861 }
 0xbb4   :  { %v379_v38 = vmul.f32 %v862_v35, %v315_v19 }
 0xc14   :  { %v382_v36 = vpop.permute.xlu0 %381 }
 0xc15   :  { %v384_v37 = vmul.f32 %v862_v35, %v382_v36 }
 0xc17   :  { %386 = vrot.lane.b32.xlu1 %v384_v37, %s937_s22 }
 0xc89   :  { %v387_v39 = vpop.permute.xlu1 %386 }
 0xc8a   :  { %v389_v40 = vadd.f32 %v387_v39, %v379_v38 }
 0xc8c   :  { %863 = vtanh.f32 %v389_v40 }
 0xc99   :  { %v864_v41 = vpop.eup %863 }
 0xc9a   :  { %392 = vrot.lane.b32.xlu0 %v864_v41, %s938_s23 }
 0xd0c   :  { %v393_v42 = vpop.permute.xlu0 %392 }
 0xd0d   :  { %v395_v43 = vmul.f32 %v862_v35, %v393_v42 }
 0xd0f   :  { %v398_v44 = vpack.c.bf16 %v395_v43, %v395_v43 }
 0xd11   :  { %400 = vrot.lane.b32.xlu1 %v398_v44, %s939_s24 }
 0xd83   :  { %v401_v45 = vpop.permute.xlu1 %400 }
 0xd84   :  { %793 = vmatmul.mubr.msk.bf16.vlgmr.msra.gmra.mxu1 %vm31_vm1, %v401_v45 }
 0xd85   :  { %803 = vmatpush3.bf16.msra.mxu1 %v975_v0  ;;  %804 = vmatprep.mubr.msk.bf16.mxu1 %vm934_vm0, %v933_v1 }
 0xe44   :  { %v439_v47 = vpop.f32.mrf.mxu1 }
 0xe45   :  { %v445_v48 = vadd.f32 %v730_v46, %v439_v47 }
 0xe46   :  { %v794_v49 = vpop.f32.mrf.mxu1 }
 0xe47   :  { %865 = vtanh.f32 %v445_v48  ;;  %v732_v53 = vmul.f32 -1.442695, %v445_v48 }
 0xe48   :  { %v442_v50 = vpop.f32.mrf.mxu1 }
 0xe49   :  { %867 = vpow2.f32 %v732_v53 }
 0xe4a   :  { %v795_v51 = vpop.f32.mrf.mxu1 }
 0xe54   :  { %v866_v52 = vpop.eup %865 }
 0xe55   :  { %455 = vrot.lane.b32.xlu0 %v866_v52, %s936_s21 }
 0xe56   :  { %v868_v54 = vpop.eup %867 }
 0xe57   :  { %v449_v0 = vadd.f32 1.0, %v868_v54 }
 0xe59   :  { %869 = vrcp.f32 %v449_v0 }
 0xe66   :  { %v870_v55 = vpop.eup %869 }
 0xe67   :  { %v453_v58 = vmul.f32 %v870_v55, %v389_v40  ;;  %v824_v40 = vld [vmem:[%s1091_s2] sm:$0xff]   ;;  %s889_s2 = scalar_lea.vmem %s695_s16, 32 }
 0xe68   :  { %p890_p0 = scmp.ne.s32.totalorder %s695_s16, %s889_s2  ;;  %p895_p2 = scmp.lt.s32.totalorder %s889_s2, %s889_s2 }
 0xe6a   :  { %p896_p3 = por %p895_p2, %p894_p1 }
 0xe6c   :  { %p897_p4 = pnand %p896_p3, %p890_p0 }
 0xec7   :  { %v456_v56 = vpop.permute.xlu0 %455 }
 0xec8   :  { %v458_v57 = vmul.f32 %v870_v55, %v456_v56 }
 0xeca   :  { %460 = vrot.lane.b32.xlu1 %v458_v57, %s937_s22 }
 0xf3c   :  { %v461_v59 = vpop.permute.xlu1 %460 }
 0xf3d   :  { %v463_v60 = vadd.f32 %v461_v59, %v453_v58 }
 0xf3f   :  { %871 = vtanh.f32 %v463_v60 }
 0xf4c   :  { %v872_v61 = vpop.eup %871 }
 0xf4d   :  { %466 = vrot.lane.b32.xlu0 %v872_v61, %s938_s23 }
 0xfbf   :  { %v467_v62 = vpop.permute.xlu0 %466 }
 0xfc0   :  { %v469_v63 = vmul.f32 %v870_v55, %v467_v62 }
 0xfc2   :  { %v472_v2 = vpack.c.bf16 %v469_v63, %v469_v63 }
 0xfc4   :  { %474 = vrot.lane.b32.xlu1 %v472_v2, %s939_s24 }
0x1036   :  { %v475_v3 = vpop.permute.xlu1 %474 }
0x1037   :  { %799 = vmatmul.mubr.msk.bf16.vlgmr.msra.gmra.mxu0 %vm31_vm1, %v475_v3 }
0x1038   :  { %810 = vmatprep.mubr.msk.bf16.mxu0 %vm934_vm0, %v933_v1  ;;  %809 = vmatpush3.bf16.msra.mxu0 %v824_v40 }
0x10f7   :  { %v513_v5 = vpop.f32.mrf.mxu0 }
0x10f8   :  { %v519_v6 = vadd.f32 %v733_v4, %v513_v5 }
0x10f9   :  { %v800_v7 = vpop.f32.mrf.mxu0 }
0x10fa   :  { %873 = vtanh.f32 %v519_v6  ;;  %v735_v11 = vmul.f32 -1.442695, %v519_v6 }
0x10fb   :  { %v516_v8 = vpop.f32.mrf.mxu0 }
0x10fc   :  { %875 = vpow2.f32 %v735_v11 }
0x10fd   :  { %v801_v9 = vpop.f32.mrf.mxu0 }
0x1107   :  { %v874_v10 = vpop.eup %873 }
0x1108   :  { %529 = vrot.lane.b32.xlu0 %v874_v10, %s936_s21 }
0x1109   :  { %v876_v12 = vpop.eup %875 }
0x110a   :  { %v523_v13 = vadd.f32 1.0, %v876_v12 }
0x110c   :  { %877 = vrcp.f32 %v523_v13 }
0x1119   :  { %v878_v14 = vpop.eup %877 }
0x111a   :  { %v527_v16 = vmul.f32 %v878_v14, %v463_v60 }
0x117a   :  { %v530_v1 = vpop.permute.xlu0 %529 }
0x117b   :  { %v532_v15 = vmul.f32 %v878_v14, %v530_v1 }
0x117d   :  { %534 = vrot.lane.b32.xlu1 %v532_v15, %s937_s22 }
0x11ef   :  { %v535_v17 = vpop.permute.xlu1 %534 }
0x11f0   :  { %v537_v18 = vadd.f32 %v535_v17, %v527_v16 }
0x11f2   :  { %879 = vtanh.f32 %v537_v18 }
0x11ff   :  { %v880_v19 = vpop.eup %879 }
0x1200   :  { %540 = vrot.lane.b32.xlu0 %v880_v19, %s938_s23 }
0x1272   :  { %v541_v20 = vpop.permute.xlu0 %540 }
0x1273   :  { %v543_v21 = vmul.f32 %v878_v14, %v541_v20 }
0x1275   :  { %v546_v22 = vpack.c.bf16 %v543_v21, %v543_v21 }
0x1277   :  { %548 = vrot.lane.b32.xlu1 %v546_v22, %s939_s24 }
0x12e9   :  { %v549_v23 = vpop.permute.xlu1 %548 }
0x12ea   :  { %805 = vmatmul.mubr.msk.bf16.vlgmr.msra.gmra.mxu1 %vm31_vm1, %v549_v23 }
0x13aa   :  { %v587_v25 = vpop.f32.mrf.mxu1 }
0x13ab   :  { %v593_v26 = vadd.f32 %v736_v24, %v587_v25 }
0x13ac   :  { %v806_v27 = vpop.f32.mrf.mxu1 }
0x13ad   :  { %881 = vtanh.f32 %v593_v26  ;;  %v738_v31 = vmul.f32 -1.442695, %v593_v26 }
0x13ae   :  { %v590_v28 = vpop.f32.mrf.mxu1 }
0x13af   :  { %883 = vpow2.f32 %v738_v31 }
0x13b0   :  { %v807_v29 = vpop.f32.mrf.mxu1 }
0x13ba   :  { %v882_v30 = vpop.eup %881 }
0x13bb   :  { %603 = vrot.lane.b32.xlu0 %v882_v30, %s936_s21 }
0x13bc   :  { %v884_v32 = vpop.eup %883 }
0x13bd   :  { %v597_v33 = vadd.f32 1.0, %v884_v32 }
0x13bf   :  { %885 = vrcp.f32 %v597_v33 }
0x13cc   :  { %v886_v34 = vpop.eup %885 }
0x13cd   :  { %v601_v37 = vmul.f32 %v886_v34, %v537_v18 }
0x142d   :  { %v604_v35 = vpop.permute.xlu0 %603 }
0x142e   :  { %v606_v36 = vmul.f32 %v886_v34, %v604_v35 }
0x1430   :  { %608 = vrot.lane.b32.xlu1 %v606_v36, %s937_s22 }
0x14a2   :  { %v609_v38 = vpop.permute.xlu1 %608 }
0x14a3   :  { %v611_v39 = vadd.f32 %v609_v38, %v601_v37 }
0x14a5   :  { %887 = vtanh.f32 %v611_v39 }
0x14b2   :  { %v888_v41 = vpop.eup %887 }
0x14b3   :  { %614 = vrot.lane.b32.xlu0 %v888_v41, %s938_s23 }
0x1525   :  { %v615_v42 = vpop.permute.xlu0 %614 }
0x1526   :  { %v617_v43 = vmul.f32 %v886_v34, %v615_v42 }
0x1528   :  { %v624_v44 = vpack.c.bf16 %v617_v43, %v617_v43  ;;  %619 = vrot.lane.b32.xlu0 %v617_v43, %s939_s24 }
0x152a   :  { %635 = vrot.lane.b32.xlu1 %v624_v44, %s939_s24 }
0x159a   :  { %v620_v45 = vpop.permute.xlu0 %619 }
0x159b   :  { %623 = vst.msk [vmem:[#allocation2] sm:$0x3] %vm622_vm2, %v620_v45 }
0x159c   :  { %v636_v46 = vpop.permute.xlu1 %635 }
0x159d   :  { %811 = vmatmul.mubr.msk.bf16.vlgmr.msra.gmra.mxu0 %vm31_vm1, %v636_v46 }
0x159e   :  { %900 = shalt.err (!%p897_p4)
}
0x159f   :  { %697 = dma.vmem_to_hbm [thread:$0]  %s695_s16, 32, %s1093_s4, [#allocation3]   ;;  %v739_v47 = vld [vmem:[%s1092_s3] ss:$0 sm:$0xff]  ;;  %vm686_vm3 = vcmask 58368  }
0x15a0   :  { %s941_s20 = smov [#allocation4]  }
0x15a1   :  { %s704_s21 = sshll.u32 %s941_s20, 4  ;;  %s705_s21 = int_to_ptr.vmem [resolvable:$true] %s704_s21 }
0x15a2   :  { %s909_s22 = scalar_lea.vmem %s705_s21, 32  ;;  %p914_p6 = scmp.lt.s32.totalorder %s705_s21, %s705_s21 }
0x15a3   :  { %p910_p5 = scmp.ne.s32.totalorder %s705_s21, %s909_s22  ;;  %p915_p7 = scmp.lt.s32.totalorder %s909_s22, %s909_s22 }
0x15a5   :  { %p916_p8 = por %p915_p7, %p914_p6 }
0x15a7   :  { %p917_p9 = pnand %p916_p8, %p910_p5 }
0x165d   :  { %v680_v48 = vpop.f32.mrf.mxu0 }
0x165e   :  { %v681_v49 = vadd.f32 %v739_v47, %v680_v48 }
0x165f   :  { %v812_v50 = vpop.f32.mrf.mxu0 }
0x1660   :  { %687 = vst.msk [vmem:[#allocation4] sm:$0x3] %vm686_vm3, %v681_v49 }
0x1661   :  { %v683_v51 = vpop.f32.mrf.mxu0 }
0x1662   :  { %920 = shalt.err (!%p917_p9)
}
0x1663   :  { %707 = dma.vmem_to_hbm [thread:$0]  %s705_s21, 32, %s1094_s5, [#allocation5]   ;;  %v813_v52 = vpop.f32.mrf.mxu0 }
0x1664   :  { %929 = dma.done.wait [#allocation3], 32  }
0x1665   :  { %930 = vsyncadd [#allocation3], 4294967264 }
0x1666   :  { %931 = dma.done.wait [#allocation5], 32  }
0x1667   :  { %932 = vsyncadd [#allocation5], 4294967264 }
0x1668   :  { %714 = vsyncpa [#allocation3], 1 }
0x1669   :  { %715 = vsyncpa [#allocation5], 1 }

</bundles_post_ra>
